<compile_context>
chip_gen: v6e
topology: v6e:2x2x1
jax: 0.10.0
libtpu: 0.0.40
codegen_flags: <defaults>
</compile_context>

<pallas_src>
import functools

import jax
import jax.numpy as jnp
from jax import lax
from jax.experimental import pallas as pl
from jax.experimental.pallas import tpu as pltpu

LANE = 128


def _round_up(x, m):
    return ((x + m - 1) // m) * m


# ---------------------------------------------------------------------------
# Fused Pallas kernel: whole GNN forward pass (gather/segment-add formulation)
# ---------------------------------------------------------------------------
def _gnn_fused_kernel(
    # SMEM scalar tables
    recv_ref,      # (E,) int32 receiver vertex index per edge
    send_ref,      # (E,) int32 sender vertex index per edge
    # data (VMEM)
    vx_ref,        # (N, Kpad)  padded vertex-encoder input, bf16
    oe_ref,        # (E, 128)   padded one-hot edges (lanes 0..1 valid), bf16
    latest_ref,    # (N, 128)   padded latest positions (lanes 0..2 valid), f32
    # vertex encoder
    vw0, vb0, vw1, vb1, vw2, vb2,
    # edge encoder (first layer split: one-hot part / position-diff part)
    ew0_oh, ew0_d, eb0, ew1, eb1, ew2, eb2,
    # edge propagator (full K = EEMB + 2*VEMB), vertex propagator (K = VEMB + EEMB)
    pw, pb, qw, qb,
    # decoder (last layer padded to 128 output lanes)
    dw0, db0, dw1, db1, dw2, db2,
    # output
    out_ref,       # (N, 128)   lanes 0..2 = next positions, f32
    # VMEM scratch
    diff_s,        # (E, 128)   f32  edge position diff
    rv_s,          # (E, VEMB)  f32  gathered receiver vertex embeddings
    sv_s,          # (E, VEMB)  f32  gathered sender vertex embeddings
    vemb_s,        # (N, VEMB)  f32  current vertex embedding
    v0_s,          # (N, VEMB)  f32  step-0 vertex embedding (residual)
    eemb_s,        # (E, EEMB)  f32  current edge embedding
    recve_s,       # (N, EEMB)  f32  per-vertex aggregated edge embedding
    ecat_s,        # (E, EEMB + 2*VEMB) bf16  K-merged edge-propagator input
    vcat_s,        # (N, VEMB + EEMB)   bf16  K-merged vertex-propagator input
    *, mp_steps, clamp):
    f32 = jnp.float32
    bf16 = jnp.bfloat16

    E = diff_s.shape[0]
    N, VEMB = vemb_s.shape
    EEMB = eemb_s.shape[1]

    def mm(a, w_ref):
        # bf16 inputs, f32 accumulation on the MXU.
        return jnp.dot(a.astype(bf16), w_ref[...], preferred_element_type=f32)

    def relu(x):
        return jnp.maximum(x, 0.0)

    # ---------------- vertex encoder: Linear+ReLU x3 ----------------
    h = relu(mm(vx_ref[...], vw0) + vb0[...])
    h = relu(mm(h, vw1) + vb1[...])
    v_emb0 = relu(mm(h, vw2) + vb2[...])                 # (N, VEMB) f32
    vemb_s[...] = v_emb0
    v0_s[...] = v_emb0

    # ---------------- edge position diff via index gather ----------------
    # diff[e] = latest[recv[e]] - latest[send[e]]   (padded lanes stay zero)
    def diff_body(e, c):
        r = recv_ref[e]
        s = send_ref[e]
        diff_s[pl.ds(e, 1), :] = (latest_ref[pl.ds(r, 1), :]
                                  - latest_ref[pl.ds(s, 1), :])
        return c
    lax.fori_loop(0, E, diff_body, 0)

    # ---------------- edge encoder ----------------
    g = relu(mm(oe_ref[...], ew0_oh) + mm(diff_s[...], ew0_d) + eb0[...])
    g = relu(mm(g, ew1) + eb1[...])
    eemb_s[...] = relu(mm(g, ew2) + eb2[...])             # (E, EEMB) f32

    # ---------------- message passing ----------------
    # Hoist loop-invariant (1, 128) bias reads out of the loop (do NOT hoist the
    # big weight tiles -> vreg pressure).
    pb_v = pb[...]
    qb_v = qb[...]

    def mp_step():
        # Gather receiver / sender vertex embeddings per edge.
        def gather_body(e, c):
            r = recv_ref[e]
            s = send_ref[e]
            rv_s[pl.ds(e, 1), :] = vemb_s[pl.ds(r, 1), :]
            sv_s[pl.ds(e, 1), :] = vemb_s[pl.ds(s, 1), :]
            return c
        lax.fori_loop(0, E, gather_body, 0)

        # Edge propagator: single K-merged contraction of concat(e, recv, send).
        ecat_s[:, :EEMB] = eemb_s[...].astype(bf16)
        ecat_s[:, EEMB:EEMB + VEMB] = rv_s[...].astype(bf16)
        ecat_s[:, EEMB + VEMB:] = sv_s[...].astype(bf16)
        eemb_s[...] = relu(
            jnp.dot(ecat_s[...], pw[...], preferred_element_type=f32) + pb_v)

        # Segment / scatter add: recv_e[n] = sum_{e: recv[e]==n} e_emb[e]
        recve_s[...] = jnp.zeros(recve_s.shape, recve_s.dtype)

        def scatter_body(e, c):
            r = recv_ref[e]
            recve_s[pl.ds(r, 1), :] = (recve_s[pl.ds(r, 1), :]
                                       + eemb_s[pl.ds(e, 1), :])
            return c
        lax.fori_loop(0, E, scatter_body, 0)

        # Vertex propagator (K-merged) with residual added before ReLU.
        vcat_s[:, :VEMB] = vemb_s[...].astype(bf16)
        vcat_s[:, VEMB:] = recve_s[...].astype(bf16)
        vemb_s[...] = relu(
            jnp.dot(vcat_s[...], qw[...], preferred_element_type=f32)
            + qb_v + v0_s[...])

    if mp_steps <= 4:
        for _ in range(mp_steps):          # static unroll: LLO sees whole body
            mp_step()
    else:
        def mp_loop_body(i, c):
            mp_step()
            return c
        lax.fori_loop(0, mp_steps, mp_loop_body, 0)

    # ---------------- decoder + clamp + add latest state ----------------
    d = relu(mm(vemb_s[...], dw0) + db0[...])
    d = relu(mm(d, dw1) + db1[...])
    delta_pad = mm(d, dw2) + db2[...]                     # (N, 128) f32
    out_ref[...] = latest_ref[...] + jnp.clip(delta_pad, -clamp, clamp)


# ---------------------------------------------------------------------------
# Parameter construction (deterministic, PyTorch nn.Linear-style init)
# ---------------------------------------------------------------------------
def _init_linear(key, fan_in, fan_out):
    kw, kb = jax.random.split(key)
    bound = 1.0 / jnp.sqrt(fan_in)
    w = jax.random.uniform(kw, (fan_in, fan_out), jnp.float32, -bound, bound)
    b = jax.random.uniform(kb, (fan_out,), jnp.float32, -bound, bound)
    return {"w": w, "b": b}


def make_params(key, *, state_history_size, vertex_embedding_size,
                edge_embedding_size, num_features_vertex, num_features_edge,
                num_features_decode):
    S = state_history_size
    vertex_enc_in = 3 * S + 3 * (S - 1) + 2
    edge_enc_in = 2 + 3
    edge_prop_in = edge_embedding_size + 2 * vertex_embedding_size
    vertex_prop_in = vertex_embedding_size + edge_embedding_size

    keys = jax.random.split(key, 12)
    return {
        "vertex_encoder": [
            _init_linear(keys[0], vertex_enc_in, num_features_vertex),
            _init_linear(keys[1], num_features_vertex, num_features_vertex),
            _init_linear(keys[2], num_features_vertex, vertex_embedding_size),
        ],
        "edge_encoder": [
            _init_linear(keys[3], edge_enc_in, num_features_edge),
            _init_linear(keys[4], num_features_edge, num_features_edge),
            _init_linear(keys[5], num_features_edge, edge_embedding_size),
        ],
        "edge_propagator": _init_linear(keys[6], edge_prop_in,
                                        edge_embedding_size),
        "vertex_propagator": _init_linear(keys[7], vertex_prop_in,
                                          vertex_embedding_size),
        "decoder": [
            _init_linear(keys[8], vertex_embedding_size, num_features_decode),
            _init_linear(keys[9], num_features_decode, num_features_decode),
            _init_linear(keys[10], num_features_decode, 3),
        ],
    }


# ---------------------------------------------------------------------------
# Weight preparation: pad / cast to bf16 once (reused every call).  Biases f32.
# Embedding sizes should be multiples of 128 for lane-aligned K-merged buffers.
# ---------------------------------------------------------------------------
def prepare_kernel_weights(params, *, vertex_enc_in_dim):
    f32, bf16 = jnp.float32, jnp.bfloat16
    ve = params["vertex_encoder"]
    ee = params["edge_encoder"]
    ep = params["edge_propagator"]
    vp = params["vertex_propagator"]
    de = params["decoder"]

    def rowpad(w, rows):
        k, n = w.shape
        return jnp.zeros((rows, n), f32).at[:k].set(w)

    def b2(b):
        return b.reshape(1, -1).astype(f32)

    k_pad = _round_up(vertex_enc_in_dim, LANE)

    # vertex encoder (first-layer rows padded to match the padded kernel input)
    vw0 = rowpad(ve[0]["w"], k_pad).astype(bf16)
    vb0, vw1, vb1 = b2(ve[0]["b"]), ve[1]["w"].astype(bf16), b2(ve[1]["b"])
    vw2, vb2 = ve[2]["w"].astype(bf16), b2(ve[2]["b"])

    # edge encoder: first-layer W is (2+3, FE); split one-hot / diff parts,
    # each padded to 128 rows (padded lanes of the kernel inputs are zero)
    ew0 = ee[0]["w"]
    ew0_oh = rowpad(ew0[:2], LANE).astype(bf16)
    ew0_d = rowpad(ew0[2:5], LANE).astype(bf16)
    eb0, ew1, eb1 = b2(ee[0]["b"]), ee[1]["w"].astype(bf16), b2(ee[1]["b"])
    ew2, eb2 = ee[2]["w"].astype(bf16), b2(ee[2]["b"])

    # propagators: full (concat-ordered) weights, single MXU contraction each
    pw, pb = ep["w"].astype(bf16), b2(ep["b"])
    qw, qb = vp["w"].astype(bf16), b2(vp["b"])

    # decoder; last layer output padded from 3 to 128 lanes (zero columns)
    dw0, db0 = de[0]["w"].astype(bf16), b2(de[0]["b"])
    dw1, db1 = de[1]["w"].astype(bf16), b2(de[1]["b"])
    fd = de[2]["w"].shape[0]
    dw2 = jnp.zeros((fd, LANE), f32).at[:, :3].set(de[2]["w"]).astype(bf16)
    db2 = jnp.zeros((1, LANE), f32).at[:, :3].set(de[2]["b"])

    return (vw0, vb0, vw1, vb1, vw2, vb2,
            ew0_oh, ew0_d, eb0, ew1, eb1, ew2, eb2,
            pw, pb, qw, qb,
            dw0, db0, dw1, db1, dw2, db2)


# ---------------------------------------------------------------------------
# Forward pass (non-batched path of GNN_baseline.forward)
# ---------------------------------------------------------------------------
def gnn_baseline_forward(kernel_weights, vertices_history, onehot_vertices,
                         onehot_edges, Rr, Rs, *, message_passing_steps,
                         clamp_velocity=100.0):
    f32, bf16 = jnp.float32, jnp.bfloat16
    vertices_history = vertices_history.astype(f32)
    onehot_vertices = onehot_vertices.astype(f32)
    onehot_edges = onehot_edges.astype(f32)

    S, N, _ = vertices_history.shape
    E = Rr.shape[0]

    # Rr / Rs are one-hot incidence matrices (module docstring); recover the
    # receiver / sender vertex index per edge once, outside the kernel.
    recv_idx = jnp.argmax(Rr, axis=1).astype(jnp.int32)
    send_idx = jnp.argmax(Rs, axis=1).astype(jnp.int32)

    # --- cheap JAX glue (runs once per call, outside the kernel) ---
    velocity = vertices_history[1:] - vertices_history[:-1]
    vh_flat = jnp.transpose(vertices_history, (1, 0, 2)).reshape(N, -1)
    vel_flat = jnp.transpose(velocity, (1, 0, 2)).reshape(N, -1)
    vx_in = jnp.concatenate([vh_flat, vel_flat, onehot_vertices], axis=1)
    k_in = vx_in.shape[1]
    k_pad = _round_up(k_in, LANE)
    vx_in = jnp.pad(vx_in, ((0, 0), (0, k_pad - k_in))).astype(bf16)   # (N,Kpad)

    oe_pad = jnp.pad(onehot_edges,
                     ((0, 0), (0, LANE - onehot_edges.shape[1]))).astype(bf16)
    latest = vertices_history[-1]                                  # (N, 3)
    latest_pad = jnp.pad(latest, ((0, 0), (0, LANE - 3)))          # (N,128) f32

    (vw0, vb0, vw1, vb1, vw2, vb2,
     ew0_oh, ew0_d, eb0, ew1, eb1, ew2, eb2,
     pw, pb, qw, qb,
     dw0, db0, dw1, db1, dw2, db2) = kernel_weights
    VEMB = qw.shape[1]
    EEMB = pw.shape[1]

    args = (recv_idx, send_idx, vx_in, oe_pad, latest_pad) + tuple(kernel_weights)

    # --- advisory cost estimate for the XLA scheduler ---
    flops = 2 * (
        N * (vw0.size + vw1.size + vw2.size + dw0.size + dw1.size + dw2.size)
        + E * (ew0_oh.size + ew0_d.size + ew1.size + ew2.size)
        + message_passing_steps * (E * pw.size + N * qw.size))
    in_bytes = sum(int(a.size) * a.dtype.itemsize for a in args)
    out_bytes = N * LANE * 4

    # --- explicit VMEM budget (review item): data + weights + scratch + headroom ---
    scratch_bytes = (
        4 * (E * LANE + 2 * E * VEMB + 2 * N * VEMB + E * EEMB + N * EEMB)
        + 2 * (E * (EEMB + 2 * VEMB) + N * (VEMB + EEMB)))
    vmem_limit = int(min(max(4 * (in_bytes + out_bytes + scratch_bytes),
                             16 * 2 ** 20), 64 * 2 ** 20))

    out_pad = pl.pallas_call(
        functools.partial(_gnn_fused_kernel,
                          mp_steps=message_passing_steps,
                          clamp=clamp_velocity),
        out_shape=jax.ShapeDtypeStruct((N, LANE), f32),
        in_specs=([pl.BlockSpec(memory_space=pltpu.MemorySpace.SMEM)] * 2
                  + [pl.BlockSpec(memory_space=pltpu.MemorySpace.VMEM)]
                  * (len(args) - 2)),
        out_specs=pl.BlockSpec(memory_space=pltpu.MemorySpace.VMEM),
        scratch_shapes=[
            pltpu.VMEM((E, LANE), f32),                 # diff
            pltpu.VMEM((E, VEMB), f32),                 # recv vertex emb
            pltpu.VMEM((E, VEMB), f32),                 # send vertex emb
            pltpu.VMEM((N, VEMB), f32),                 # vertex emb
            pltpu.VMEM((N, VEMB), f32),                 # residual v0
            pltpu.VMEM((E, EEMB), f32),                 # edge emb
            pltpu.VMEM((N, EEMB), f32),                 # aggregated edge emb
            pltpu.VMEM((E, EEMB + 2 * VEMB), bf16),     # K-merged edge-prop input
            pltpu.VMEM((N, VEMB + EEMB), bf16),         # K-merged vertex-prop input
        ],
        compiler_params=pltpu.CompilerParams(vmem_limit_bytes=vmem_limit),
        cost_estimate=pl.CostEstimate(flops=int(flops), transcendentals=0,
                                      bytes_accessed=int(in_bytes + out_bytes)),
    )(*args)

    return out_pad[:, :3]


# ---------------------------------------------------------------------------
# Pure-JAX reference (mirrors the PyTorch module) for the correctness check
# ---------------------------------------------------------------------------
def gnn_baseline_reference(params, vertices_history, onehot_vertices,
                           onehot_edges, Rr, Rs, *, message_passing_steps,
                           clamp_velocity=100.0):
    f32 = jnp.float32
    vertices_history = vertices_history.astype(f32)
    onehot_vertices = onehot_vertices.astype(f32)
    onehot_edges = onehot_edges.astype(f32)
    Rr = Rr.astype(f32)
    Rs = Rs.astype(f32)

    def encoder(layers, x):
        for l in layers:
            x = jnp.maximum(x @ l["w"] + l["b"], 0.0)
        return x

    S, N, _ = vertices_history.shape
    velocity = vertices_history[1:] - vertices_history[:-1]
    vh_flat = jnp.transpose(vertices_history, (1, 0, 2)).reshape(N, -1)
    vel_flat = jnp.transpose(velocity, (1, 0, 2)).reshape(N, -1)
    vx_in = jnp.concatenate([vh_flat, vel_flat, onehot_vertices], axis=1)

    latest = vertices_history[-1]
    diff = Rr @ latest - Rs @ latest
    ee_in = jnp.concatenate([onehot_edges, diff], axis=1)

    v_emb = encoder(params["vertex_encoder"], vx_in)
    e_emb = encoder(params["edge_encoder"], ee_in)
    v0 = v_emb
    rr_t = Rr.T
    for _ in range(message_passing_steps):
        recv_v = Rr @ v_emb
        send_v = Rs @ v_emb
        e_in = jnp.concatenate([e_emb, recv_v, send_v], axis=1)
        e_emb = jnp.maximum(
            e_in @ params["edge_propagator"]["w"]
            + params["edge_propagator"]["b"], 0.0)
        recv_e = rr_t @ e_emb
        v_in = jnp.concatenate([v_emb, recv_e], axis=1)
        v_emb = jnp.maximum(
            v_in @ params["vertex_propagator"]["w"]
            + params["vertex_propagator"]["b"] + v0, 0.0)

    d = params["decoder"]
    h = jnp.maximum(v_emb @ d[0]["w"] + d[0]["b"], 0.0)
    h = jnp.maximum(h @ d[1]["w"] + d[1]["b"], 0.0)
    delta = h @ d[2]["w"] + d[2]["b"]
    return latest + jnp.clip(delta, -clamp_velocity, clamp_velocity)


# ---------------------------------------------------------------------------
if __name__ == "__main__":
    # Small but module-consistent sizes (128-wide features -> lane aligned)
    S = 4            # state_history_size
    N = 16           # num_vertices
    E = 24           # number of edges
    VEMB = 128       # vertex_embedding_size
    EEMB = 128       # edge_embedding_size
    FV = 128         # num_features_vertex
    FE = 128         # num_features_edge
    FD = 128         # num_features_decode
    MP_STEPS = 3     # message_passing_steps (<=4 -> static unroll path)

    key = jax.random.PRNGKey(0)
    k_par, k_vh, k_ov, k_oe, k_rr, k_rs = jax.random.split(key, 6)

    params = make_params(
        k_par,
        state_history_size=S,
        vertex_embedding_size=VEMB,
        edge_embedding_size=EEMB,
        num_features_vertex=FV,
        num_features_edge=FE,
        num_features_decode=FD,
    )
    vertex_enc_in_dim = 3 * S + 3 * (S - 1) + 2
    kernel_weights = prepare_kernel_weights(params,
                                            vertex_enc_in_dim=vertex_enc_in_dim)

    vertices_history = jax.random.normal(k_vh, (S, N, 3), jnp.float32)
    onehot_vertices = jax.nn.one_hot(
        jax.random.randint(k_ov, (N,), 0, 2), 2, dtype=jnp.float32)
    onehot_edges = jax.nn.one_hot(
        jax.random.randint(k_oe, (E,), 0, 2), 2, dtype=jnp.float32)
    recv_idx = jax.random.randint(k_rr, (E,), 0, N)
    send_idx = jax.random.randint(k_rs, (E,), 0, N)
    Rr = jax.nn.one_hot(recv_idx, N, dtype=jnp.float32)   # (E, N)
    Rs = jax.nn.one_hot(send_idx, N, dtype=jnp.float32)   # (E, N)

    fwd = jax.jit(functools.partial(gnn_baseline_forward,
                                    message_passing_steps=MP_STEPS))
    next_pos = fwd(kernel_weights, vertices_history, onehot_vertices,
                   onehot_edges, Rr, Rs)
    jax.block_until_ready(next_pos)

    ref = gnn_baseline_reference(params, vertices_history, onehot_vertices,
                                 onehot_edges, Rr, Rs,
                                 message_passing_steps=MP_STEPS)
    max_err = float(jnp.max(jnp.abs(next_pos - ref)))

    assert next_pos.shape == (N, 3)
    assert bool(jnp.all(jnp.isfinite(next_pos)))
    assert max_err < 1e-1, f"mismatch vs reference: {max_err}"
    print("KERNEL_OK")
</pallas_src>

<mosaic_0001>
module attributes {stable_mosaic.version = 11 : i64} {
  func.func @_gnn_fused_kernel(%arg0: memref<24xi32, #tpu.memory_space<smem>>, %arg1: memref<24xi32, #tpu.memory_space<smem>>, %arg2: memref<16x128xbf16, #tpu.memory_space<vmem>>, %arg3: memref<24x128xbf16, #tpu.memory_space<vmem>>, %arg4: memref<16x128xf32, #tpu.memory_space<vmem>>, %arg5: memref<128x128xbf16, #tpu.memory_space<vmem>>, %arg6: memref<1x128xf32, #tpu.memory_space<vmem>>, %arg7: memref<128x128xbf16, #tpu.memory_space<vmem>>, %arg8: memref<1x128xf32, #tpu.memory_space<vmem>>, %arg9: memref<128x128xbf16, #tpu.memory_space<vmem>>, %arg10: memref<1x128xf32, #tpu.memory_space<vmem>>, %arg11: memref<128x128xbf16, #tpu.memory_space<vmem>>, %arg12: memref<128x128xbf16, #tpu.memory_space<vmem>>, %arg13: memref<1x128xf32, #tpu.memory_space<vmem>>, %arg14: memref<128x128xbf16, #tpu.memory_space<vmem>>, %arg15: memref<1x128xf32, #tpu.memory_space<vmem>>, %arg16: memref<128x128xbf16, #tpu.memory_space<vmem>>, %arg17: memref<1x128xf32, #tpu.memory_space<vmem>>, %arg18: memref<384x128xbf16, #tpu.memory_space<vmem>>, %arg19: memref<1x128xf32, #tpu.memory_space<vmem>>, %arg20: memref<256x128xbf16, #tpu.memory_space<vmem>>, %arg21: memref<1x128xf32, #tpu.memory_space<vmem>>, %arg22: memref<128x128xbf16, #tpu.memory_space<vmem>>, %arg23: memref<1x128xf32, #tpu.memory_space<vmem>>, %arg24: memref<128x128xbf16, #tpu.memory_space<vmem>>, %arg25: memref<1x128xf32, #tpu.memory_space<vmem>>, %arg26: memref<128x128xbf16, #tpu.memory_space<vmem>>, %arg27: memref<1x128xf32, #tpu.memory_space<vmem>>, %arg28: memref<16x128xf32, #tpu.memory_space<vmem>>, %arg29: memref<24x128xf32, #tpu.memory_space<vmem>>, %arg30: memref<24x128xf32, #tpu.memory_space<vmem>>, %arg31: memref<24x128xf32, #tpu.memory_space<vmem>>, %arg32: memref<16x128xf32, #tpu.memory_space<vmem>>, %arg33: memref<16x128xf32, #tpu.memory_space<vmem>>, %arg34: memref<24x128xf32, #tpu.memory_space<vmem>>, %arg35: memref<16x128xf32, #tpu.memory_space<vmem>>, %arg36: memref<24x384xbf16, #tpu.memory_space<vmem>>, %arg37: memref<16x256xbf16, #tpu.memory_space<vmem>>) attributes {dimension_semantics = [], scalar_prefetch = 0 : i64, scratch_operands = 9 : i64, tpu.core_type = #tpu.core_type<tc>} {
    %c0 = arith.constant 0 : index
    %c0_0 = arith.constant 0 : index
    %0 = vector.load %arg2[%c0, %c0_0] : memref<16x128xbf16, #tpu.memory_space<vmem>>, vector<16x128xbf16>
    %c0_1 = arith.constant 0 : index
    %c0_2 = arith.constant 0 : index
    %1 = vector.load %arg5[%c0_1, %c0_2] : memref<128x128xbf16, #tpu.memory_space<vmem>>, vector<128x128xbf16>
    %cst = arith.constant dense<0.000000e+00> : vector<16x128xf32>
    %2 = tpu.matmul %0, %1, %cst {dimension_numbers = #tpu.dot_dimension_numbers<[1], [0], [0], [1], [0, 0, 1, 1], [], []>} : vector<16x128xbf16>, vector<128x128xbf16>, vector<16x128xf32> -> vector<16x128xf32>
    %c0_3 = arith.constant 0 : index
    %c0_4 = arith.constant 0 : index
    %3 = vector.load %arg6[%c0_3, %c0_4] : memref<1x128xf32, #tpu.memory_space<vmem>>, vector<1x128xf32>
    %4 = vector.broadcast %3 : vector<1x128xf32> to vector<16x128xf32>
    %5 = arith.addf %2, %4 : vector<16x128xf32>
    %cst_5 = arith.constant 0.000000e+00 : f32
    %6 = vector.broadcast %cst_5 : f32 to vector<16x128xf32>
    %7 = arith.maximumf %5, %6 : vector<16x128xf32>
    %8 = arith.truncf %7 : vector<16x128xf32> to vector<16x128xbf16>
    %c0_6 = arith.constant 0 : index
    %c0_7 = arith.constant 0 : index
    %9 = vector.load %arg7[%c0_6, %c0_7] : memref<128x128xbf16, #tpu.memory_space<vmem>>, vector<128x128xbf16>
    %cst_8 = arith.constant dense<0.000000e+00> : vector<16x128xf32>
    %10 = tpu.matmul %8, %9, %cst_8 {dimension_numbers = #tpu.dot_dimension_numbers<[1], [0], [0], [1], [0, 0, 1, 1], [], []>} : vector<16x128xbf16>, vector<128x128xbf16>, vector<16x128xf32> -> vector<16x128xf32>
    %c0_9 = arith.constant 0 : index
    %c0_10 = arith.constant 0 : index
    %11 = vector.load %arg8[%c0_9, %c0_10] : memref<1x128xf32, #tpu.memory_space<vmem>>, vector<1x128xf32>
    %12 = vector.broadcast %11 : vector<1x128xf32> to vector<16x128xf32>
    %13 = arith.addf %10, %12 : vector<16x128xf32>
    %cst_11 = arith.constant 0.000000e+00 : f32
    %14 = vector.broadcast %cst_11 : f32 to vector<16x128xf32>
    %15 = arith.maximumf %13, %14 : vector<16x128xf32>
    %16 = arith.truncf %15 : vector<16x128xf32> to vector<16x128xbf16>
    %c0_12 = arith.constant 0 : index
    %c0_13 = arith.constant 0 : index
    %17 = vector.load %arg9[%c0_12, %c0_13] : memref<128x128xbf16, #tpu.memory_space<vmem>>, vector<128x128xbf16>
    %cst_14 = arith.constant dense<0.000000e+00> : vector<16x128xf32>
    %18 = tpu.matmul %16, %17, %cst_14 {dimension_numbers = #tpu.dot_dimension_numbers<[1], [0], [0], [1], [0, 0, 1, 1], [], []>} : vector<16x128xbf16>, vector<128x128xbf16>, vector<16x128xf32> -> vector<16x128xf32>
    %c0_15 = arith.constant 0 : index
    %c0_16 = arith.constant 0 : index
    %19 = vector.load %arg10[%c0_15, %c0_16] : memref<1x128xf32, #tpu.memory_space<vmem>>, vector<1x128xf32>
    %20 = vector.broadcast %19 : vector<1x128xf32> to vector<16x128xf32>
    %21 = arith.addf %18, %20 : vector<16x128xf32>
    %cst_17 = arith.constant 0.000000e+00 : f32
    %22 = vector.broadcast %cst_17 : f32 to vector<16x128xf32>
    %23 = arith.maximumf %21, %22 : vector<16x128xf32>
    %c0_18 = arith.constant 0 : index
    %c0_19 = arith.constant 0 : index
    %24 = vector.load %arg32[%c0_18, %c0_19] : memref<16x128xf32, #tpu.memory_space<vmem>>, vector<16x128xf32>
    tpu.vector_store %arg32[%c0_18, %c0_19], %23 {strides = array<i32>} : memref<16x128xf32, #tpu.memory_space<vmem>>, vector<16x128xf32>,
    %c0_20 = arith.constant 0 : index
    %c0_21 = arith.constant 0 : index
    %25 = vector.load %arg33[%c0_20, %c0_21] : memref<16x128xf32, #tpu.memory_space<vmem>>, vector<16x128xf32>
    tpu.vector_store %arg33[%c0_20, %c0_21], %23 {strides = array<i32>} : memref<16x128xf32, #tpu.memory_space<vmem>>, vector<16x128xf32>,
    %c0_i32 = arith.constant 0 : i32
    %c24_i32 = arith.constant 24 : i32
    %26 = arith.addi %c0_i32, %c24_i32 : i32
    %c1_i32 = arith.constant 1 : i32
    scf.for %arg38 = %c0_i32 to %26 step %c1_i32  : i32 {
      %200 = arith.index_cast %arg38 : i32 to index
      %201 = memref.load %arg0[%200] : memref<24xi32, #tpu.memory_space<smem>>
      %202 = arith.index_cast %arg38 : i32 to index
      %203 = memref.load %arg1[%202] : memref<24xi32, #tpu.memory_space<smem>>
      %204 = arith.index_cast %201 : i32 to index
      %c0_224 = arith.constant 0 : index
      %205 = vector.load %arg4[%204, %c0_224] : memref<16x128xf32, #tpu.memory_space<vmem>>, vector<1x128xf32>
      %206 = arith.index_cast %203 : i32 to index
      %c0_225 = arith.constant 0 : index
      %207 = vector.load %arg4[%206, %c0_225] : memref<16x128xf32, #tpu.memory_space<vmem>>, vector<1x128xf32>
      %208 = arith.subf %205, %207 : vector<1x128xf32>
      %209 = arith.index_cast %arg38 : i32 to index
      %c0_226 = arith.constant 0 : index
      %210 = vector.load %arg29[%209, %c0_226] : memref<24x128xf32, #tpu.memory_space<vmem>>, vector<1x128xf32>
      tpu.vector_store %arg29[%209, %c0_226], %208 {strides = array<i32>} : memref<24x128xf32, #tpu.memory_space<vmem>>, vector<1x128xf32>,
    }
    %c24_i32_22 = arith.constant 24 : i32
    %c0_23 = arith.constant 0 : index
    %c0_24 = arith.constant 0 : index
    %27 = vector.load %arg3[%c0_23, %c0_24] : memref<24x128xbf16, #tpu.memory_space<vmem>>, vector<24x128xbf16>
    %c0_25 = arith.constant 0 : index
    %c0_26 = arith.constant 0 : index
    %28 = vector.load %arg11[%c0_25, %c0_26] : memref<128x128xbf16, #tpu.memory_space<vmem>>, vector<128x128xbf16>
    %cst_27 = arith.constant dense<0.000000e+00> : vector<24x128xf32>
    %29 = tpu.matmul %27, %28, %cst_27 {dimension_numbers = #tpu.dot_dimension_numbers<[1], [0], [0], [1], [0, 0, 1, 1], [], []>} : vector<24x128xbf16>, vector<128x128xbf16>, vector<24x128xf32> -> vector<24x128xf32>
    %c0_28 = arith.constant 0 : index
    %c0_29 = arith.constant 0 : index
    %30 = vector.load %arg29[%c0_28, %c0_29] : memref<24x128xf32, #tpu.memory_space<vmem>>, vector<24x128xf32>
    %31 = arith.truncf %30 : vector<24x128xf32> to vector<24x128xbf16>
    %c0_30 = arith.constant 0 : index
    %c0_31 = arith.constant 0 : index
    %32 = vector.load %arg12[%c0_30, %c0_31] : memref<128x128xbf16, #tpu.memory_space<vmem>>, vector<128x128xbf16>
    %cst_32 = arith.constant dense<0.000000e+00> : vector<24x128xf32>
    %33 = tpu.matmul %31, %32, %cst_32 {dimension_numbers = #tpu.dot_dimension_numbers<[1], [0], [0], [1], [0, 0, 1, 1], [], []>} : vector<24x128xbf16>, vector<128x128xbf16>, vector<24x128xf32> -> vector<24x128xf32>
    %34 = arith.addf %29, %33 : vector<24x128xf32>
    %c0_33 = arith.constant 0 : index
    %c0_34 = arith.constant 0 : index
    %35 = vector.load %arg13[%c0_33, %c0_34] : memref<1x128xf32, #tpu.memory_space<vmem>>, vector<1x128xf32>
    %36 = vector.broadcast %35 : vector<1x128xf32> to vector<24x128xf32>
    %37 = arith.addf %34, %36 : vector<24x128xf32>
    %cst_35 = arith.constant 0.000000e+00 : f32
    %38 = vector.broadcast %cst_35 : f32 to vector<24x128xf32>
    %39 = arith.maximumf %37, %38 : vector<24x128xf32>
    %40 = arith.truncf %39 : vector<24x128xf32> to vector<24x128xbf16>
    %c0_36 = arith.constant 0 : index
    %c0_37 = arith.constant 0 : index
    %41 = vector.load %arg14[%c0_36, %c0_37] : memref<128x128xbf16, #tpu.memory_space<vmem>>, vector<128x128xbf16>
    %cst_38 = arith.constant dense<0.000000e+00> : vector<24x128xf32>
    %42 = tpu.matmul %40, %41, %cst_38 {dimension_numbers = #tpu.dot_dimension_numbers<[1], [0], [0], [1], [0, 0, 1, 1], [], []>} : vector<24x128xbf16>, vector<128x128xbf16>, vector<24x128xf32> -> vector<24x128xf32>
    %c0_39 = arith.constant 0 : index
    %c0_40 = arith.constant 0 : index
    %43 = vector.load %arg15[%c0_39, %c0_40] : memref<1x128xf32, #tpu.memory_space<vmem>>, vector<1x128xf32>
    %44 = vector.broadcast %43 : vector<1x128xf32> to vector<24x128xf32>
    %45 = arith.addf %42, %44 : vector<24x128xf32>
    %cst_41 = arith.constant 0.000000e+00 : f32
    %46 = vector.broadcast %cst_41 : f32 to vector<24x128xf32>
    %47 = arith.maximumf %45, %46 : vector<24x128xf32>
    %48 = arith.truncf %47 : vector<24x128xf32> to vector<24x128xbf16>
    %c0_42 = arith.constant 0 : index
    %c0_43 = arith.constant 0 : index
    %49 = vector.load %arg16[%c0_42, %c0_43] : memref<128x128xbf16, #tpu.memory_space<vmem>>, vector<128x128xbf16>
    %cst_44 = arith.constant dense<0.000000e+00> : vector<24x128xf32>
    %50 = tpu.matmul %48, %49, %cst_44 {dimension_numbers = #tpu.dot_dimension_numbers<[1], [0], [0], [1], [0, 0, 1, 1], [], []>} : vector<24x128xbf16>, vector<128x128xbf16>, vector<24x128xf32> -> vector<24x128xf32>
    %c0_45 = arith.constant 0 : index
    %c0_46 = arith.constant 0 : index
    %51 = vector.load %arg17[%c0_45, %c0_46] : memref<1x128xf32, #tpu.memory_space<vmem>>, vector<1x128xf32>
    %52 = vector.broadcast %51 : vector<1x128xf32> to vector<24x128xf32>
    %53 = arith.addf %50, %52 : vector<24x128xf32>
    %cst_47 = arith.constant 0.000000e+00 : f32
    %54 = vector.broadcast %cst_47 : f32 to vector<24x128xf32>
    %55 = arith.maximumf %53, %54 : vector<24x128xf32>
    %c0_48 = arith.constant 0 : index
    %c0_49 = arith.constant 0 : index
    %56 = vector.load %arg34[%c0_48, %c0_49] : memref<24x128xf32, #tpu.memory_space<vmem>>, vector<24x128xf32>
    tpu.vector_store %arg34[%c0_48, %c0_49], %55 {strides = array<i32>} : memref<24x128xf32, #tpu.memory_space<vmem>>, vector<24x128xf32>,
    %c0_50 = arith.constant 0 : index
    %c0_51 = arith.constant 0 : index
    %57 = vector.load %arg19[%c0_50, %c0_51] : memref<1x128xf32, #tpu.memory_space<vmem>>, vector<1x128xf32>
    %c0_52 = arith.constant 0 : index
    %c0_53 = arith.constant 0 : index
    %58 = vector.load %arg21[%c0_52, %c0_53] : memref<1x128xf32, #tpu.memory_space<vmem>>, vector<1x128xf32>
    %c0_i32_54 = arith.constant 0 : i32
    %c24_i32_55 = arith.constant 24 : i32
    %59 = arith.addi %c0_i32_54, %c24_i32_55 : i32
    %c1_i32_56 = arith.constant 1 : i32
    scf.for %arg38 = %c0_i32_54 to %59 step %c1_i32_56  : i32 {
      %200 = arith.index_cast %arg38 : i32 to index
      %201 = memref.load %arg0[%200] : memref<24xi32, #tpu.memory_space<smem>>
      %202 = arith.index_cast %arg38 : i32 to index
      %203 = memref.load %arg1[%202] : memref<24xi32, #tpu.memory_space<smem>>
      %204 = arith.index_cast %201 : i32 to index
      %c0_224 = arith.constant 0 : index
      %205 = vector.load %arg32[%204, %c0_224] : memref<16x128xf32, #tpu.memory_space<vmem>>, vector<1x128xf32>
      %206 = arith.index_cast %arg38 : i32 to index
      %c0_225 = arith.constant 0 : index
      %207 = vector.load %arg30[%206, %c0_225] : memref<24x128xf32, #tpu.memory_space<vmem>>, vector<1x128xf32>
      tpu.vector_store %arg30[%206, %c0_225], %205 {strides = array<i32>} : memref<24x128xf32, #tpu.memory_space<vmem>>, vector<1x128xf32>,
      %208 = arith.index_cast %203 : i32 to index
      %c0_226 = arith.constant 0 : index
      %209 = vector.load %arg32[%208, %c0_226] : memref<16x128xf32, #tpu.memory_space<vmem>>, vector<1x128xf32>
      %210 = arith.index_cast %arg38 : i32 to index
      %c0_227 = arith.constant 0 : index
      %211 = vector.load %arg31[%210, %c0_227] : memref<24x128xf32, #tpu.memory_space<vmem>>, vector<1x128xf32>
      tpu.vector_store %arg31[%210, %c0_227], %209 {strides = array<i32>} : memref<24x128xf32, #tpu.memory_space<vmem>>, vector<1x128xf32>,
    }
    %c24_i32_57 = arith.constant 24 : i32
    %c0_58 = arith.constant 0 : index
    %c0_59 = arith.constant 0 : index
    %60 = vector.load %arg34[%c0_58, %c0_59] : memref<24x128xf32, #tpu.memory_space<vmem>>, vector<24x128xf32>
    %61 = arith.truncf %60 : vector<24x128xf32> to vector<24x128xbf16>
    %c0_60 = arith.constant 0 : index
    %c0_61 = arith.constant 0 : index
    %62 = vector.load %arg36[%c0_60, %c0_61] : memref<24x384xbf16, #tpu.memory_space<vmem>>, vector<24x128xbf16>
    tpu.vector_store %arg36[%c0_60, %c0_61], %61 {strides = array<i32>} : memref<24x384xbf16, #tpu.memory_space<vmem>>, vector<24x128xbf16>,
    %c0_62 = arith.constant 0 : index
    %c0_63 = arith.constant 0 : index
    %63 = vector.load %arg30[%c0_62, %c0_63] : memref<24x128xf32, #tpu.memory_space<vmem>>, vector<24x128xf32>
    %64 = arith.truncf %63 : vector<24x128xf32> to vector<24x128xbf16>
    %c0_64 = arith.constant 0 : index
    %c128 = arith.constant 128 : index
    %65 = vector.load %arg36[%c0_64, %c128] : memref<24x384xbf16, #tpu.memory_space<vmem>>, vector<24x128xbf16>
    tpu.vector_store %arg36[%c0_64, %c128], %64 {strides = array<i32>} : memref<24x384xbf16, #tpu.memory_space<vmem>>, vector<24x128xbf16>,
    %c0_65 = arith.constant 0 : index
    %c0_66 = arith.constant 0 : index
    %66 = vector.load %arg31[%c0_65, %c0_66] : memref<24x128xf32, #tpu.memory_space<vmem>>, vector<24x128xf32>
    %67 = arith.truncf %66 : vector<24x128xf32> to vector<24x128xbf16>
    %c0_67 = arith.constant 0 : index
    %c256 = arith.constant 256 : index
    %68 = vector.load %arg36[%c0_67, %c256] : memref<24x384xbf16, #tpu.memory_space<vmem>>, vector<24x128xbf16>
    tpu.vector_store %arg36[%c0_67, %c256], %67 {strides = array<i32>} : memref<24x384xbf16, #tpu.memory_space<vmem>>, vector<24x128xbf16>,
    %c0_68 = arith.constant 0 : index
    %c0_69 = arith.constant 0 : index
    %69 = vector.load %arg36[%c0_68, %c0_69] : memref<24x384xbf16, #tpu.memory_space<vmem>>, vector<24x384xbf16>
    %c0_70 = arith.constant 0 : index
    %c0_71 = arith.constant 0 : index
    %70 = vector.load %arg18[%c0_70, %c0_71] : memref<384x128xbf16, #tpu.memory_space<vmem>>, vector<384x128xbf16>
    %cst_72 = arith.constant dense<0.000000e+00> : vector<24x128xf32>
    %71 = tpu.matmul %69, %70, %cst_72 {dimension_numbers = #tpu.dot_dimension_numbers<[1], [0], [0], [1], [0, 0, 1, 1], [], []>} : vector<24x384xbf16>, vector<384x128xbf16>, vector<24x128xf32> -> vector<24x128xf32>
    %72 = vector.broadcast %57 : vector<1x128xf32> to vector<24x128xf32>
    %73 = arith.addf %71, %72 : vector<24x128xf32>
    %cst_73 = arith.constant 0.000000e+00 : f32
    %74 = vector.broadcast %cst_73 : f32 to vector<24x128xf32>
    %75 = arith.maximumf %73, %74 : vector<24x128xf32>
    %c0_74 = arith.constant 0 : index
    %c0_75 = arith.constant 0 : index
    %76 = vector.load %arg34[%c0_74, %c0_75] : memref<24x128xf32, #tpu.memory_space<vmem>>, vector<24x128xf32>
    tpu.vector_store %arg34[%c0_74, %c0_75], %75 {strides = array<i32>} : memref<24x128xf32, #tpu.memory_space<vmem>>, vector<24x128xf32>,
    %cst_76 = arith.constant 0.000000e+00 : f32
    %77 = vector.broadcast %cst_76 : f32 to vector<16x128xf32>
    %c0_77 = arith.constant 0 : index
    %c0_78 = arith.constant 0 : index
    %78 = vector.load %arg35[%c0_77, %c0_78] : memref<16x128xf32, #tpu.memory_space<vmem>>, vector<16x128xf32>
    tpu.vector_store %arg35[%c0_77, %c0_78], %77 {strides = array<i32>} : memref<16x128xf32, #tpu.memory_space<vmem>>, vector<16x128xf32>,
    %c0_i32_79 = arith.constant 0 : i32
    %c24_i32_80 = arith.constant 24 : i32
    %79 = arith.addi %c0_i32_79, %c24_i32_80 : i32
    %c1_i32_81 = arith.constant 1 : i32
    scf.for %arg38 = %c0_i32_79 to %79 step %c1_i32_81  : i32 {
      %200 = arith.index_cast %arg38 : i32 to index
      %201 = memref.load %arg0[%200] : memref<24xi32, #tpu.memory_space<smem>>
      %202 = arith.index_cast %201 : i32 to index
      %c0_224 = arith.constant 0 : index
      %203 = vector.load %arg35[%202, %c0_224] : memref<16x128xf32, #tpu.memory_space<vmem>>, vector<1x128xf32>
      %204 = arith.index_cast %arg38 : i32 to index
      %c0_225 = arith.constant 0 : index
      %205 = vector.load %arg34[%204, %c0_225] : memref<24x128xf32, #tpu.memory_space<vmem>>, vector<1x128xf32>
      %206 = arith.addf %203, %205 : vector<1x128xf32>
      %207 = arith.index_cast %201 : i32 to index
      %c0_226 = arith.constant 0 : index
      %208 = vector.load %arg35[%207, %c0_226] : memref<16x128xf32, #tpu.memory_space<vmem>>, vector<1x128xf32>
      tpu.vector_store %arg35[%207, %c0_226], %206 {strides = array<i32>} : memref<16x128xf32, #tpu.memory_space<vmem>>, vector<1x128xf32>,
    }
    %c24_i32_82 = arith.constant 24 : i32
    %c0_83 = arith.constant 0 : index
    %c0_84 = arith.constant 0 : index
    %80 = vector.load %arg32[%c0_83, %c0_84] : memref<16x128xf32, #tpu.memory_space<vmem>>, vector<16x128xf32>
    %81 = arith.truncf %80 : vector<16x128xf32> to vector<16x128xbf16>
    %c0_85 = arith.constant 0 : index
    %c0_86 = arith.constant 0 : index
    %82 = vector.load %arg37[%c0_85, %c0_86] : memref<16x256xbf16, #tpu.memory_space<vmem>>, vector<16x128xbf16>
    tpu.vector_store %arg37[%c0_85, %c0_86], %81 {strides = array<i32>} : memref<16x256xbf16, #tpu.memory_space<vmem>>, vector<16x128xbf16>,
    %c0_87 = arith.constant 0 : index
    %c0_88 = arith.constant 0 : index
    %83 = vector.load %arg35[%c0_87, %c0_88] : memref<16x128xf32, #tpu.memory_space<vmem>>, vector<16x128xf32>
    %84 = arith.truncf %83 : vector<16x128xf32> to vector<16x128xbf16>
    %c0_89 = arith.constant 0 : index
    %c128_90 = arith.constant 128 : index
    %85 = vector.load %arg37[%c0_89, %c128_90] : memref<16x256xbf16, #tpu.memory_space<vmem>>, vector<16x128xbf16>
    tpu.vector_store %arg37[%c0_89, %c128_90], %84 {strides = array<i32>} : memref<16x256xbf16, #tpu.memory_space<vmem>>, vector<16x128xbf16>,
    %c0_91 = arith.constant 0 : index
    %c0_92 = arith.constant 0 : index
    %86 = vector.load %arg37[%c0_91, %c0_92] : memref<16x256xbf16, #tpu.memory_space<vmem>>, vector<16x256xbf16>
    %c0_93 = arith.constant 0 : index
    %c0_94 = arith.constant 0 : index
    %87 = vector.load %arg20[%c0_93, %c0_94] : memref<256x128xbf16, #tpu.memory_space<vmem>>, vector<256x128xbf16>
    %cst_95 = arith.constant dense<0.000000e+00> : vector<16x128xf32>
    %88 = tpu.matmul %86, %87, %cst_95 {dimension_numbers = #tpu.dot_dimension_numbers<[1], [0], [0], [1], [0, 0, 1, 1], [], []>} : vector<16x256xbf16>, vector<256x128xbf16>, vector<16x128xf32> -> vector<16x128xf32>
    %89 = vector.broadcast %58 : vector<1x128xf32> to vector<16x128xf32>
    %90 = arith.addf %88, %89 : vector<16x128xf32>
    %c0_96 = arith.constant 0 : index
    %c0_97 = arith.constant 0 : index
    %91 = vector.load %arg33[%c0_96, %c0_97] : memref<16x128xf32, #tpu.memory_space<vmem>>, vector<16x128xf32>
    %92 = arith.addf %90, %91 : vector<16x128xf32>
    %cst_98 = arith.constant 0.000000e+00 : f32
    %93 = vector.broadcast %cst_98 : f32 to vector<16x128xf32>
    %94 = arith.maximumf %92, %93 : vector<16x128xf32>
    %c0_99 = arith.constant 0 : index
    %c0_100 = arith.constant 0 : index
    %95 = vector.load %arg32[%c0_99, %c0_100] : memref<16x128xf32, #tpu.memory_space<vmem>>, vector<16x128xf32>
    tpu.vector_store %arg32[%c0_99, %c0_100], %94 {strides = array<i32>} : memref<16x128xf32, #tpu.memory_space<vmem>>, vector<16x128xf32>,
    %c0_i32_101 = arith.constant 0 : i32
    %c24_i32_102 = arith.constant 24 : i32
    %96 = arith.addi %c0_i32_101, %c24_i32_102 : i32
    %c1_i32_103 = arith.constant 1 : i32
    scf.for %arg38 = %c0_i32_101 to %96 step %c1_i32_103  : i32 {
      %200 = arith.index_cast %arg38 : i32 to index
      %201 = memref.load %arg0[%200] : memref<24xi32, #tpu.memory_space<smem>>
      %202 = arith.index_cast %arg38 : i32 to index
      %203 = memref.load %arg1[%202] : memref<24xi32, #tpu.memory_space<smem>>
      %204 = arith.index_cast %201 : i32 to index
      %c0_224 = arith.constant 0 : index
      %205 = vector.load %arg32[%204, %c0_224] : memref<16x128xf32, #tpu.memory_space<vmem>>, vector<1x128xf32>
      %206 = arith.index_cast %arg38 : i32 to index
      %c0_225 = arith.constant 0 : index
      %207 = vector.load %arg30[%206, %c0_225] : memref<24x128xf32, #tpu.memory_space<vmem>>, vector<1x128xf32>
      tpu.vector_store %arg30[%206, %c0_225], %205 {strides = array<i32>} : memref<24x128xf32, #tpu.memory_space<vmem>>, vector<1x128xf32>,
      %208 = arith.index_cast %203 : i32 to index
      %c0_226 = arith.constant 0 : index
      %209 = vector.load %arg32[%208, %c0_226] : memref<16x128xf32, #tpu.memory_space<vmem>>, vector<1x128xf32>
      %210 = arith.index_cast %arg38 : i32 to index
      %c0_227 = arith.constant 0 : index
      %211 = vector.load %arg31[%210, %c0_227] : memref<24x128xf32, #tpu.memory_space<vmem>>, vector<1x128xf32>
      tpu.vector_store %arg31[%210, %c0_227], %209 {strides = array<i32>} : memref<24x128xf32, #tpu.memory_space<vmem>>, vector<1x128xf32>,
    }
    %c24_i32_104 = arith.constant 24 : i32
    %c0_105 = arith.constant 0 : index
    %c0_106 = arith.constant 0 : index
    %97 = vector.load %arg34[%c0_105, %c0_106] : memref<24x128xf32, #tpu.memory_space<vmem>>, vector<24x128xf32>
    %98 = arith.truncf %97 : vector<24x128xf32> to vector<24x128xbf16>
    %c0_107 = arith.constant 0 : index
    %c0_108 = arith.constant 0 : index
    %99 = vector.load %arg36[%c0_107, %c0_108] : memref<24x384xbf16, #tpu.memory_space<vmem>>, vector<24x128xbf16>
    tpu.vector_store %arg36[%c0_107, %c0_108], %98 {strides = array<i32>} : memref<24x384xbf16, #tpu.memory_space<vmem>>, vector<24x128xbf16>,
    %c0_109 = arith.constant 0 : index
    %c0_110 = arith.constant 0 : index
    %100 = vector.load %arg30[%c0_109, %c0_110] : memref<24x128xf32, #tpu.memory_space<vmem>>, vector<24x128xf32>
    %101 = arith.truncf %100 : vector<24x128xf32> to vector<24x128xbf16>
    %c0_111 = arith.constant 0 : index
    %c128_112 = arith.constant 128 : index
    %102 = vector.load %arg36[%c0_111, %c128_112] : memref<24x384xbf16, #tpu.memory_space<vmem>>, vector<24x128xbf16>
    tpu.vector_store %arg36[%c0_111, %c128_112], %101 {strides = array<i32>} : memref<24x384xbf16, #tpu.memory_space<vmem>>, vector<24x128xbf16>,
    %c0_113 = arith.constant 0 : index
    %c0_114 = arith.constant 0 : index
    %103 = vector.load %arg31[%c0_113, %c0_114] : memref<24x128xf32, #tpu.memory_space<vmem>>, vector<24x128xf32>
    %104 = arith.truncf %103 : vector<24x128xf32> to vector<24x128xbf16>
    %c0_115 = arith.constant 0 : index
    %c256_116 = arith.constant 256 : index
    %105 = vector.load %arg36[%c0_115, %c256_116] : memref<24x384xbf16, #tpu.memory_space<vmem>>, vector<24x128xbf16>
    tpu.vector_store %arg36[%c0_115, %c256_116], %104 {strides = array<i32>} : memref<24x384xbf16, #tpu.memory_space<vmem>>, vector<24x128xbf16>,
    %c0_117 = arith.constant 0 : index
    %c0_118 = arith.constant 0 : index
    %106 = vector.load %arg36[%c0_117, %c0_118] : memref<24x384xbf16, #tpu.memory_space<vmem>>, vector<24x384xbf16>
    %c0_119 = arith.constant 0 : index
    %c0_120 = arith.constant 0 : index
    %107 = vector.load %arg18[%c0_119, %c0_120] : memref<384x128xbf16, #tpu.memory_space<vmem>>, vector<384x128xbf16>
    %cst_121 = arith.constant dense<0.000000e+00> : vector<24x128xf32>
    %108 = tpu.matmul %106, %107, %cst_121 {dimension_numbers = #tpu.dot_dimension_numbers<[1], [0], [0], [1], [0, 0, 1, 1], [], []>} : vector<24x384xbf16>, vector<384x128xbf16>, vector<24x128xf32> -> vector<24x128xf32>
    %109 = vector.broadcast %57 : vector<1x128xf32> to vector<24x128xf32>
    %110 = arith.addf %108, %109 : vector<24x128xf32>
    %cst_122 = arith.constant 0.000000e+00 : f32
    %111 = vector.broadcast %cst_122 : f32 to vector<24x128xf32>
    %112 = arith.maximumf %110, %111 : vector<24x128xf32>
    %c0_123 = arith.constant 0 : index
    %c0_124 = arith.constant 0 : index
    %113 = vector.load %arg34[%c0_123, %c0_124] : memref<24x128xf32, #tpu.memory_space<vmem>>, vector<24x128xf32>
    tpu.vector_store %arg34[%c0_123, %c0_124], %112 {strides = array<i32>} : memref<24x128xf32, #tpu.memory_space<vmem>>, vector<24x128xf32>,
    %cst_125 = arith.constant 0.000000e+00 : f32
    %114 = vector.broadcast %cst_125 : f32 to vector<16x128xf32>
    %c0_126 = arith.constant 0 : index
    %c0_127 = arith.constant 0 : index
    %115 = vector.load %arg35[%c0_126, %c0_127] : memref<16x128xf32, #tpu.memory_space<vmem>>, vector<16x128xf32>
    tpu.vector_store %arg35[%c0_126, %c0_127], %114 {strides = array<i32>} : memref<16x128xf32, #tpu.memory_space<vmem>>, vector<16x128xf32>,
    %c0_i32_128 = arith.constant 0 : i32
    %c24_i32_129 = arith.constant 24 : i32
    %116 = arith.addi %c0_i32_128, %c24_i32_129 : i32
    %c1_i32_130 = arith.constant 1 : i32
    scf.for %arg38 = %c0_i32_128 to %116 step %c1_i32_130  : i32 {
      %200 = arith.index_cast %arg38 : i32 to index
      %201 = memref.load %arg0[%200] : memref<24xi32, #tpu.memory_space<smem>>
      %202 = arith.index_cast %201 : i32 to index
      %c0_224 = arith.constant 0 : index
      %203 = vector.load %arg35[%202, %c0_224] : memref<16x128xf32, #tpu.memory_space<vmem>>, vector<1x128xf32>
      %204 = arith.index_cast %arg38 : i32 to index
      %c0_225 = arith.constant 0 : index
      %205 = vector.load %arg34[%204, %c0_225] : memref<24x128xf32, #tpu.memory_space<vmem>>, vector<1x128xf32>
      %206 = arith.addf %203, %205 : vector<1x128xf32>
      %207 = arith.index_cast %201 : i32 to index
      %c0_226 = arith.constant 0 : index
      %208 = vector.load %arg35[%207, %c0_226] : memref<16x128xf32, #tpu.memory_space<vmem>>, vector<1x128xf32>
      tpu.vector_store %arg35[%207, %c0_226], %206 {strides = array<i32>} : memref<16x128xf32, #tpu.memory_space<vmem>>, vector<1x128xf32>,
    }
    %c24_i32_131 = arith.constant 24 : i32
    %c0_132 = arith.constant 0 : index
    %c0_133 = arith.constant 0 : index
    %117 = vector.load %arg32[%c0_132, %c0_133] : memref<16x128xf32, #tpu.memory_space<vmem>>, vector<16x128xf32>
    %118 = arith.truncf %117 : vector<16x128xf32> to vector<16x128xbf16>
    %c0_134 = arith.constant 0 : index
    %c0_135 = arith.constant 0 : index
    %119 = vector.load %arg37[%c0_134, %c0_135] : memref<16x256xbf16, #tpu.memory_space<vmem>>, vector<16x128xbf16>
    tpu.vector_store %arg37[%c0_134, %c0_135], %118 {strides = array<i32>} : memref<16x256xbf16, #tpu.memory_space<vmem>>, vector<16x128xbf16>,
    %c0_136 = arith.constant 0 : index
    %c0_137 = arith.constant 0 : index
    %120 = vector.load %arg35[%c0_136, %c0_137] : memref<16x128xf32, #tpu.memory_space<vmem>>, vector<16x128xf32>
    %121 = arith.truncf %120 : vector<16x128xf32> to vector<16x128xbf16>
    %c0_138 = arith.constant 0 : index
    %c128_139 = arith.constant 128 : index
    %122 = vector.load %arg37[%c0_138, %c128_139] : memref<16x256xbf16, #tpu.memory_space<vmem>>, vector<16x128xbf16>
    tpu.vector_store %arg37[%c0_138, %c128_139], %121 {strides = array<i32>} : memref<16x256xbf16, #tpu.memory_space<vmem>>, vector<16x128xbf16>,
    %c0_140 = arith.constant 0 : index
    %c0_141 = arith.constant 0 : index
    %123 = vector.load %arg37[%c0_140, %c0_141] : memref<16x256xbf16, #tpu.memory_space<vmem>>, vector<16x256xbf16>
    %c0_142 = arith.constant 0 : index
    %c0_143 = arith.constant 0 : index
    %124 = vector.load %arg20[%c0_142, %c0_143] : memref<256x128xbf16, #tpu.memory_space<vmem>>, vector<256x128xbf16>
    %cst_144 = arith.constant dense<0.000000e+00> : vector<16x128xf32>
    %125 = tpu.matmul %123, %124, %cst_144 {dimension_numbers = #tpu.dot_dimension_numbers<[1], [0], [0], [1], [0, 0, 1, 1], [], []>} : vector<16x256xbf16>, vector<256x128xbf16>, vector<16x128xf32> -> vector<16x128xf32>
    %126 = vector.broadcast %58 : vector<1x128xf32> to vector<16x128xf32>
    %127 = arith.addf %125, %126 : vector<16x128xf32>
    %c0_145 = arith.constant 0 : index
    %c0_146 = arith.constant 0 : index
    %128 = vector.load %arg33[%c0_145, %c0_146] : memref<16x128xf32, #tpu.memory_space<vmem>>, vector<16x128xf32>
    %129 = arith.addf %127, %128 : vector<16x128xf32>
    %cst_147 = arith.constant 0.000000e+00 : f32
    %130 = vector.broadcast %cst_147 : f32 to vector<16x128xf32>
    %131 = arith.maximumf %129, %130 : vector<16x128xf32>
    %c0_148 = arith.constant 0 : index
    %c0_149 = arith.constant 0 : index
    %132 = vector.load %arg32[%c0_148, %c0_149] : memref<16x128xf32, #tpu.memory_space<vmem>>, vector<16x128xf32>
    tpu.vector_store %arg32[%c0_148, %c0_149], %131 {strides = array<i32>} : memref<16x128xf32, #tpu.memory_space<vmem>>, vector<16x128xf32>,
    %c0_i32_150 = arith.constant 0 : i32
    %c24_i32_151 = arith.constant 24 : i32
    %133 = arith.addi %c0_i32_150, %c24_i32_151 : i32
    %c1_i32_152 = arith.constant 1 : i32
    scf.for %arg38 = %c0_i32_150 to %133 step %c1_i32_152  : i32 {
      %200 = arith.index_cast %arg38 : i32 to index
      %201 = memref.load %arg0[%200] : memref<24xi32, #tpu.memory_space<smem>>
      %202 = arith.index_cast %arg38 : i32 to index
      %203 = memref.load %arg1[%202] : memref<24xi32, #tpu.memory_space<smem>>
      %204 = arith.index_cast %201 : i32 to index
      %c0_224 = arith.constant 0 : index
      %205 = vector.load %arg32[%204, %c0_224] : memref<16x128xf32, #tpu.memory_space<vmem>>, vector<1x128xf32>
      %206 = arith.index_cast %arg38 : i32 to index
      %c0_225 = arith.constant 0 : index
      %207 = vector.load %arg30[%206, %c0_225] : memref<24x128xf32, #tpu.memory_space<vmem>>, vector<1x128xf32>
      tpu.vector_store %arg30[%206, %c0_225], %205 {strides = array<i32>} : memref<24x128xf32, #tpu.memory_space<vmem>>, vector<1x128xf32>,
      %208 = arith.index_cast %203 : i32 to index
      %c0_226 = arith.constant 0 : index
      %209 = vector.load %arg32[%208, %c0_226] : memref<16x128xf32, #tpu.memory_space<vmem>>, vector<1x128xf32>
      %210 = arith.index_cast %arg38 : i32 to index
      %c0_227 = arith.constant 0 : index
      %211 = vector.load %arg31[%210, %c0_227] : memref<24x128xf32, #tpu.memory_space<vmem>>, vector<1x128xf32>
      tpu.vector_store %arg31[%210, %c0_227], %209 {strides = array<i32>} : memref<24x128xf32, #tpu.memory_space<vmem>>, vector<1x128xf32>,
    }
    %c24_i32_153 = arith.constant 24 : i32
    %c0_154 = arith.constant 0 : index
    %c0_155 = arith.constant 0 : index
    %134 = vector.load %arg34[%c0_154, %c0_155] : memref<24x128xf32, #tpu.memory_space<vmem>>, vector<24x128xf32>
    %135 = arith.truncf %134 : vector<24x128xf32> to vector<24x128xbf16>
    %c0_156 = arith.constant 0 : index
    %c0_157 = arith.constant 0 : index
    %136 = vector.load %arg36[%c0_156, %c0_157] : memref<24x384xbf16, #tpu.memory_space<vmem>>, vector<24x128xbf16>
    tpu.vector_store %arg36[%c0_156, %c0_157], %135 {strides = array<i32>} : memref<24x384xbf16, #tpu.memory_space<vmem>>, vector<24x128xbf16>,
    %c0_158 = arith.constant 0 : index
    %c0_159 = arith.constant 0 : index
    %137 = vector.load %arg30[%c0_158, %c0_159] : memref<24x128xf32, #tpu.memory_space<vmem>>, vector<24x128xf32>
    %138 = arith.truncf %137 : vector<24x128xf32> to vector<24x128xbf16>
    %c0_160 = arith.constant 0 : index
    %c128_161 = arith.constant 128 : index
    %139 = vector.load %arg36[%c0_160, %c128_161] : memref<24x384xbf16, #tpu.memory_space<vmem>>, vector<24x128xbf16>
    tpu.vector_store %arg36[%c0_160, %c128_161], %138 {strides = array<i32>} : memref<24x384xbf16, #tpu.memory_space<vmem>>, vector<24x128xbf16>,
    %c0_162 = arith.constant 0 : index
    %c0_163 = arith.constant 0 : index
    %140 = vector.load %arg31[%c0_162, %c0_163] : memref<24x128xf32, #tpu.memory_space<vmem>>, vector<24x128xf32>
    %141 = arith.truncf %140 : vector<24x128xf32> to vector<24x128xbf16>
    %c0_164 = arith.constant 0 : index
    %c256_165 = arith.constant 256 : index
    %142 = vector.load %arg36[%c0_164, %c256_165] : memref<24x384xbf16, #tpu.memory_space<vmem>>, vector<24x128xbf16>
    tpu.vector_store %arg36[%c0_164, %c256_165], %141 {strides = array<i32>} : memref<24x384xbf16, #tpu.memory_space<vmem>>, vector<24x128xbf16>,
    %c0_166 = arith.constant 0 : index
    %c0_167 = arith.constant 0 : index
    %143 = vector.load %arg36[%c0_166, %c0_167] : memref<24x384xbf16, #tpu.memory_space<vmem>>, vector<24x384xbf16>
    %c0_168 = arith.constant 0 : index
    %c0_169 = arith.constant 0 : index
    %144 = vector.load %arg18[%c0_168, %c0_169] : memref<384x128xbf16, #tpu.memory_space<vmem>>, vector<384x128xbf16>
    %cst_170 = arith.constant dense<0.000000e+00> : vector<24x128xf32>
    %145 = tpu.matmul %143, %144, %cst_170 {dimension_numbers = #tpu.dot_dimension_numbers<[1], [0], [0], [1], [0, 0, 1, 1], [], []>} : vector<24x384xbf16>, vector<384x128xbf16>, vector<24x128xf32> -> vector<24x128xf32>
    %146 = vector.broadcast %57 : vector<1x128xf32> to vector<24x128xf32>
    %147 = arith.addf %145, %146 : vector<24x128xf32>
    %cst_171 = arith.constant 0.000000e+00 : f32
    %148 = vector.broadcast %cst_171 : f32 to vector<24x128xf32>
    %149 = arith.maximumf %147, %148 : vector<24x128xf32>
    %c0_172 = arith.constant 0 : index
    %c0_173 = arith.constant 0 : index
    %150 = vector.load %arg34[%c0_172, %c0_173] : memref<24x128xf32, #tpu.memory_space<vmem>>, vector<24x128xf32>
    tpu.vector_store %arg34[%c0_172, %c0_173], %149 {strides = array<i32>} : memref<24x128xf32, #tpu.memory_space<vmem>>, vector<24x128xf32>,
    %cst_174 = arith.constant 0.000000e+00 : f32
    %151 = vector.broadcast %cst_174 : f32 to vector<16x128xf32>
    %c0_175 = arith.constant 0 : index
    %c0_176 = arith.constant 0 : index
    %152 = vector.load %arg35[%c0_175, %c0_176] : memref<16x128xf32, #tpu.memory_space<vmem>>, vector<16x128xf32>
    tpu.vector_store %arg35[%c0_175, %c0_176], %151 {strides = array<i32>} : memref<16x128xf32, #tpu.memory_space<vmem>>, vector<16x128xf32>,
    %c0_i32_177 = arith.constant 0 : i32
    %c24_i32_178 = arith.constant 24 : i32
    %153 = arith.addi %c0_i32_177, %c24_i32_178 : i32
    %c1_i32_179 = arith.constant 1 : i32
    scf.for %arg38 = %c0_i32_177 to %153 step %c1_i32_179  : i32 {
      %200 = arith.index_cast %arg38 : i32 to index
      %201 = memref.load %arg0[%200] : memref<24xi32, #tpu.memory_space<smem>>
      %202 = arith.index_cast %201 : i32 to index
      %c0_224 = arith.constant 0 : index
      %203 = vector.load %arg35[%202, %c0_224] : memref<16x128xf32, #tpu.memory_space<vmem>>, vector<1x128xf32>
      %204 = arith.index_cast %arg38 : i32 to index
      %c0_225 = arith.constant 0 : index
      %205 = vector.load %arg34[%204, %c0_225] : memref<24x128xf32, #tpu.memory_space<vmem>>, vector<1x128xf32>
      %206 = arith.addf %203, %205 : vector<1x128xf32>
      %207 = arith.index_cast %201 : i32 to index
      %c0_226 = arith.constant 0 : index
      %208 = vector.load %arg35[%207, %c0_226] : memref<16x128xf32, #tpu.memory_space<vmem>>, vector<1x128xf32>
      tpu.vector_store %arg35[%207, %c0_226], %206 {strides = array<i32>} : memref<16x128xf32, #tpu.memory_space<vmem>>, vector<1x128xf32>,
    }
    %c24_i32_180 = arith.constant 24 : i32
    %c0_181 = arith.constant 0 : index
    %c0_182 = arith.constant 0 : index
    %154 = vector.load %arg32[%c0_181, %c0_182] : memref<16x128xf32, #tpu.memory_space<vmem>>, vector<16x128xf32>
    %155 = arith.truncf %154 : vector<16x128xf32> to vector<16x128xbf16>
    %c0_183 = arith.constant 0 : index
    %c0_184 = arith.constant 0 : index
    %156 = vector.load %arg37[%c0_183, %c0_184] : memref<16x256xbf16, #tpu.memory_space<vmem>>, vector<16x128xbf16>
    tpu.vector_store %arg37[%c0_183, %c0_184], %155 {strides = array<i32>} : memref<16x256xbf16, #tpu.memory_space<vmem>>, vector<16x128xbf16>,
    %c0_185 = arith.constant 0 : index
    %c0_186 = arith.constant 0 : index
    %157 = vector.load %arg35[%c0_185, %c0_186] : memref<16x128xf32, #tpu.memory_space<vmem>>, vector<16x128xf32>
    %158 = arith.truncf %157 : vector<16x128xf32> to vector<16x128xbf16>
    %c0_187 = arith.constant 0 : index
    %c128_188 = arith.constant 128 : index
    %159 = vector.load %arg37[%c0_187, %c128_188] : memref<16x256xbf16, #tpu.memory_space<vmem>>, vector<16x128xbf16>
    tpu.vector_store %arg37[%c0_187, %c128_188], %158 {strides = array<i32>} : memref<16x256xbf16, #tpu.memory_space<vmem>>, vector<16x128xbf16>,
    %c0_189 = arith.constant 0 : index
    %c0_190 = arith.constant 0 : index
    %160 = vector.load %arg37[%c0_189, %c0_190] : memref<16x256xbf16, #tpu.memory_space<vmem>>, vector<16x256xbf16>
    %c0_191 = arith.constant 0 : index
    %c0_192 = arith.constant 0 : index
    %161 = vector.load %arg20[%c0_191, %c0_192] : memref<256x128xbf16, #tpu.memory_space<vmem>>, vector<256x128xbf16>
    %cst_193 = arith.constant dense<0.000000e+00> : vector<16x128xf32>
    %162 = tpu.matmul %160, %161, %cst_193 {dimension_numbers = #tpu.dot_dimension_numbers<[1], [0], [0], [1], [0, 0, 1, 1], [], []>} : vector<16x256xbf16>, vector<256x128xbf16>, vector<16x128xf32> -> vector<16x128xf32>
    %163 = vector.broadcast %58 : vector<1x128xf32> to vector<16x128xf32>
    %164 = arith.addf %162, %163 : vector<16x128xf32>
    %c0_194 = arith.constant 0 : index
    %c0_195 = arith.constant 0 : index
    %165 = vector.load %arg33[%c0_194, %c0_195] : memref<16x128xf32, #tpu.memory_space<vmem>>, vector<16x128xf32>
    %166 = arith.addf %164, %165 : vector<16x128xf32>
    %cst_196 = arith.constant 0.000000e+00 : f32
    %167 = vector.broadcast %cst_196 : f32 to vector<16x128xf32>
    %168 = arith.maximumf %166, %167 : vector<16x128xf32>
    %c0_197 = arith.constant 0 : index
    %c0_198 = arith.constant 0 : index
    %169 = vector.load %arg32[%c0_197, %c0_198] : memref<16x128xf32, #tpu.memory_space<vmem>>, vector<16x128xf32>
    tpu.vector_store %arg32[%c0_197, %c0_198], %168 {strides = array<i32>} : memref<16x128xf32, #tpu.memory_space<vmem>>, vector<16x128xf32>,
    %c0_199 = arith.constant 0 : index
    %c0_200 = arith.constant 0 : index
    %170 = vector.load %arg32[%c0_199, %c0_200] : memref<16x128xf32, #tpu.memory_space<vmem>>, vector<16x128xf32>
    %171 = arith.truncf %170 : vector<16x128xf32> to vector<16x128xbf16>
    %c0_201 = arith.constant 0 : index
    %c0_202 = arith.constant 0 : index
    %172 = vector.load %arg22[%c0_201, %c0_202] : memref<128x128xbf16, #tpu.memory_space<vmem>>, vector<128x128xbf16>
    %cst_203 = arith.constant dense<0.000000e+00> : vector<16x128xf32>
    %173 = tpu.matmul %171, %172, %cst_203 {dimension_numbers = #tpu.dot_dimension_numbers<[1], [0], [0], [1], [0, 0, 1, 1], [], []>} : vector<16x128xbf16>, vector<128x128xbf16>, vector<16x128xf32> -> vector<16x128xf32>
    %c0_204 = arith.constant 0 : index
    %c0_205 = arith.constant 0 : index
    %174 = vector.load %arg23[%c0_204, %c0_205] : memref<1x128xf32, #tpu.memory_space<vmem>>, vector<1x128xf32>
    %175 = vector.broadcast %174 : vector<1x128xf32> to vector<16x128xf32>
    %176 = arith.addf %173, %175 : vector<16x128xf32>
    %cst_206 = arith.constant 0.000000e+00 : f32
    %177 = vector.broadcast %cst_206 : f32 to vector<16x128xf32>
    %178 = arith.maximumf %176, %177 : vector<16x128xf32>
    %179 = arith.truncf %178 : vector<16x128xf32> to vector<16x128xbf16>
    %c0_207 = arith.constant 0 : index
    %c0_208 = arith.constant 0 : index
    %180 = vector.load %arg24[%c0_207, %c0_208] : memref<128x128xbf16, #tpu.memory_space<vmem>>, vector<128x128xbf16>
    %cst_209 = arith.constant dense<0.000000e+00> : vector<16x128xf32>
    %181 = tpu.matmul %179, %180, %cst_209 {dimension_numbers = #tpu.dot_dimension_numbers<[1], [0], [0], [1], [0, 0, 1, 1], [], []>} : vector<16x128xbf16>, vector<128x128xbf16>, vector<16x128xf32> -> vector<16x128xf32>
    %c0_210 = arith.constant 0 : index
    %c0_211 = arith.constant 0 : index
    %182 = vector.load %arg25[%c0_210, %c0_211] : memref<1x128xf32, #tpu.memory_space<vmem>>, vector<1x128xf32>
    %183 = vector.broadcast %182 : vector<1x128xf32> to vector<16x128xf32>
    %184 = arith.addf %181, %183 : vector<16x128xf32>
    %cst_212 = arith.constant 0.000000e+00 : f32
    %185 = vector.broadcast %cst_212 : f32 to vector<16x128xf32>
    %186 = arith.maximumf %184, %185 : vector<16x128xf32>
    %187 = arith.truncf %186 : vector<16x128xf32> to vector<16x128xbf16>
    %c0_213 = arith.constant 0 : index
    %c0_214 = arith.constant 0 : index
    %188 = vector.load %arg26[%c0_213, %c0_214] : memref<128x128xbf16, #tpu.memory_space<vmem>>, vector<128x128xbf16>
    %cst_215 = arith.constant dense<0.000000e+00> : vector<16x128xf32>
    %189 = tpu.matmul %187, %188, %cst_215 {dimension_numbers = #tpu.dot_dimension_numbers<[1], [0], [0], [1], [0, 0, 1, 1], [], []>} : vector<16x128xbf16>, vector<128x128xbf16>, vector<16x128xf32> -> vector<16x128xf32>
    %c0_216 = arith.constant 0 : index
    %c0_217 = arith.constant 0 : index
    %190 = vector.load %arg27[%c0_216, %c0_217] : memref<1x128xf32, #tpu.memory_space<vmem>>, vector<1x128xf32>
    %191 = vector.broadcast %190 : vector<1x128xf32> to vector<16x128xf32>
    %192 = arith.addf %189, %191 : vector<16x128xf32>
    %c0_218 = arith.constant 0 : index
    %c0_219 = arith.constant 0 : index
    %193 = vector.load %arg4[%c0_218, %c0_219] : memref<16x128xf32, #tpu.memory_space<vmem>>, vector<16x128xf32>
    %cst_220 = arith.constant -1.000000e+02 : f32
    %cst_221 = arith.constant 1.000000e+02 : f32
    %194 = vector.broadcast %cst_220 : f32 to vector<16x128xf32>
    %195 = arith.maximumf %194, %192 : vector<16x128xf32>
    %196 = vector.broadcast %cst_221 : f32 to vector<16x128xf32>
    %197 = arith.minimumf %196, %195 : vector<16x128xf32>
    %198 = arith.addf %193, %197 : vector<16x128xf32>
    %c0_222 = arith.constant 0 : index
    %c0_223 = arith.constant 0 : index
    %199 = vector.load %arg28[%c0_222, %c0_223] : memref<16x128xf32, #tpu.memory_space<vmem>>, vector<16x128xf32>
    tpu.vector_store %arg28[%c0_222, %c0_223], %198 {strides = array<i32>} : memref<16x128xf32, #tpu.memory_space<vmem>>, vector<16x128xf32>,
    return
  }
}

</mosaic_0001>

<bundles_post_ra>
// kernel: gnn_baseline_forward.1
= control target key start
LH: loop header
LB: loop body
LE: loop exit
PB: predicated region body
PF: predicated region fallthrough
CT: control target
= control target key end

     0   :  { %s5914_s0 = inlined_call_operand.vmem [shape: s32[24], index: 0, kind: input, shape index: {}]   ;;  %s5915_s1 = inlined_call_operand.vmem [shape: s32[24], index: 1, kind: input, shape index: {}]   ;;  %s5916_s2 = inlined_call_operand.vmem [shape: bf16[16,128], index: 2, kind: input, shape index: {}]   ;;  %s5917_s3 = inlined_call_operand.vmem [shape: bf16[24,128], index: 3, kind: input, shape index: {}]   ;;  %s5918_s4 = inlined_call_operand.vmem [shape: f32[16,128], index: 4, kind: input, shape index: {}]   ;;  %s5919_s5 = inlined_call_operand.hbm [shape: bf16[128,128], index: 5, kind: input, shape index: {}]   ;;  %s5920_s6 = inlined_call_operand.vmem [shape: f32[1,128], index: 6, kind: input, shape index: {}]   ;;  %s5921_s7 = inlined_call_operand.hbm [shape: bf16[128,128], index: 7, kind: input, shape index: {}]   ;;  %s5922_s8 = inlined_call_operand.hbm [shape: f32[1,128], index: 8, kind: input, shape index: {}]   ;;  %s5923_s9 = inlined_call_operand.hbm [shape: bf16[128,128], index: 9, kind: input, shape index: {}]   ;;  %s5924_s10 = inlined_call_operand.hbm [shape: f32[1,128], index: 10, kind: input, shape index: {}]   ;;  %s5925_s11 = inlined_call_operand.hbm [shape: bf16[128,128], index: 11, kind: input, shape index: {}]   ;;  %s5926_s12 = inlined_call_operand.hbm [shape: bf16[128,128], index: 12, kind: input, shape index: {}]   ;;  %s5927_s13 = inlined_call_operand.hbm [shape: f32[1,128], index: 13, kind: input, shape index: {}]   ;;  %s5928_s14 = inlined_call_operand.hbm [shape: bf16[128,128], index: 14, kind: input, shape index: {}]   ;;  %s5929_s15 = inlined_call_operand.hbm [shape: f32[1,128], index: 15, kind: input, shape index: {}]   ;;  %s5930_s16 = inlined_call_operand.hbm [shape: bf16[128,128], index: 16, kind: input, shape index: {}]   ;;  %s5931_s17 = inlined_call_operand.hbm [shape: f32[1,128], index: 17, kind: input, shape index: {}]   ;;  %s5932_s18 = inlined_call_operand.vmem [shape: bf16[384,128], index: 18, kind: input, shape index: {}]   ;;  %s5933_s19 = inlined_call_operand.hbm [shape: f32[1,128], index: 19, kind: input, shape index: {}]   ;;  %s5934_s20 = inlined_call_operand.vmem [shape: bf16[256,128], index: 20, kind: input, shape index: {}]   ;;  %s5935_s21 = inlined_call_operand.hbm [shape: f32[1,128], index: 21, kind: input, shape index: {}]   ;;  %s5936_s22 = inlined_call_operand.hbm [shape: bf16[128,128], index: 22, kind: input, shape index: {}]   ;;  %s5937_s23 = inlined_call_operand.hbm [shape: f32[1,128], index: 23, kind: input, shape index: {}]   ;;  %s5938_s24 = inlined_call_operand.hbm [shape: bf16[128,128], index: 24, kind: input, shape index: {}]   ;;  %s5939_s25 = inlined_call_operand.vmem [shape: f32[1,128], index: 25, kind: input, shape index: {}]   ;;  %s5940_s26 = inlined_call_operand.hbm [shape: bf16[128,128], index: 26, kind: input, shape index: {}]   ;;  %s5941_s27 = inlined_call_operand.vmem [shape: f32[1,128], index: 27, kind: input, shape index: {}]   ;;  %s5942_s28 = inlined_call_operand.vmem [shape: f32[16,128], index: 28, kind: output, shape index: {}]  }
   0x1   :  { %5946 = sst [smem:[#allocation55_spill]] %s5914_s0 }
   0x2   :  { %5947 = sst [smem:[#allocation56_spill]] %s5915_s1 }
   0x3   :  { %5948 = sst [smem:[#allocation57_spill]] %s5916_s2 }
   0x4   :  { %5949 = sst [smem:[#allocation58_spill]] %s5917_s3 }
   0x5   :  { %5950 = sst [smem:[#allocation59_spill]] %s5918_s4 }
   0x6   :  { %5951 = sst [smem:[#allocation60_spill]] %s5919_s5 }
   0x7   :  { %5952 = sst [smem:[#allocation61_spill]] %s5920_s6 }
   0x8   :  { %5953 = sst [smem:[#allocation62_spill]] %s5921_s7 }
   0x9   :  { %5954 = sst [smem:[#allocation63_spill]] %s5922_s8 }
   0xa   :  { %5955 = sst [smem:[#allocation64_spill]] %s5923_s9 }
   0xb   :  { %5956 = sst [smem:[#allocation65_spill]] %s5924_s10 }
   0xc   :  { %5957 = sst [smem:[#allocation66_spill]] %s5925_s11 }
   0xd   :  { %5958 = sst [smem:[#allocation67_spill]] %s5926_s12 }
   0xe   :  { %33 = vsyncpa [#allocation13], 0 }
   0xf   :  { %34 = vsyncpa [#allocation15], 0 }
  0x10   :  { %35 = vsyncpa [#allocation12], 0 }
  0x11   :  { %36 = vsyncpa [#allocation18], 0 }
  0x12   :  { %37 = vsyncpa [#allocation21], 0 }
  0x13   :  { %38 = vsyncpa [#allocation24], 0 }
  0x14   :  { %39 = vsyncpa [#allocation27], 0 }
  0x15   :  { %40 = vsyncpa [#allocation30], 0 }
  0x16   :  { %41 = vsyncpa [#allocation33], 0 }
  0x17   :  { %42 = vsyncpa [#allocation36], 0 }
  0x18   :  { %43 = vsyncpa [#allocation39], 0 }
  0x19   :  { %44 = vsyncpa [#allocation42], 0  ;;  %s5174_s8 = smov [#allocation17]   ;;  %s5175_s9 = smov [#allocation20]  }
  0x1a   :  { %s90_s5 = sshll.u32 %s5174_s8, 4  ;;  %s112_s30 = sshll.u32 %s5175_s9, 4  ;;  %s91_s5 = int_to_ptr.vmem [resolvable:$true] %s90_s5  ;;  %s113_s30 = int_to_ptr.vmem [resolvable:$true] %s112_s30 }
  0x1b   :  { %s4718_s3 = scalar_lea.vmem %s91_s5, 1024  ;;  %p4723_p1 = scmp.lt.s32.totalorder %s91_s5, %s91_s5 }
  0x1c   :  { %p4719_p0 = scmp.ne.s32.totalorder %s91_s5, %s4718_s3  ;;  %p4724_p2 = scmp.lt.s32.totalorder %s4718_s3, %s4718_s3 }
  0x1e   :  { %p4725_p3 = por %p4724_p2, %p4723_p1 }
  0x20   :  { %p4726_p4 = pnand %p4725_p3, %p4719_p0 }
  0x22   :  { %4729 = shalt.err (!%p4726_p4)
}
  0x23   :  { %s5176_s6 = smov 64   ;;  %s5177_s10 = smov 4  }
  0x24   :  { %s5959_s29 = sld [smem:[#allocation62_spill]]  ;;  %s4738_s2 = scalar_lea.vmem %s113_s30, 1024 }
  0x25   :  { %p4739_p5 = scmp.ne.s32.totalorder %s113_s30, %s4738_s2  ;;  %p4743_p6 = scmp.lt.s32.totalorder %s113_s30, %s113_s30 }
  0x26   :  { %p4744_p7 = scmp.lt.s32.totalorder %s4738_s2, %s4738_s2 }
  0x28   :  { %p4745_p8 = por %p4744_p7, %p4743_p6 }
  0x2a   :  { %96 = dma.hbm_to_vmem [thread:$0]  %s5959_s29, 1024, %s91_s5, [#allocation18], %s5176_s6, %s5176_s6, %s5177_s10  }
  0x2b   :  { %p4746_p9 = pnand %p4745_p8, %p4739_p5 }
  0x2d   :  { %4749 = shalt.err (!%p4746_p9)
}
  0x2e   :  { %s5960_s1 = sld [smem:[#allocation64_spill]]  ;;  %s5178_s4 = smov [#allocation23]  }
  0x2f   :  { %s134_s8 = sshll.u32 %s5178_s4, 4  ;;  %s5179_s9 = smov [#allocation26]   ;;  %s135_s8 = int_to_ptr.vmem [resolvable:$true] %s134_s8 }
  0x30   :  { %s159_s3 = sshll.u32 %s5179_s9, 4  ;;  %s4758_s5 = scalar_lea.vmem %s135_s8, 1024  ;;  %s160_s3 = int_to_ptr.vmem [resolvable:$true] %s159_s3 }
  0x31   :  { %p4759_p10 = scmp.ne.s32.totalorder %s135_s8, %s4758_s5  ;;  %p4763_p11 = scmp.lt.s32.totalorder %s135_s8, %s135_s8 }
  0x32   :  { %p4764_p12 = scmp.lt.s32.totalorder %s4758_s5, %s4758_s5 }
  0x34   :  { %118 = dma.hbm_to_vmem [thread:$0]  %s5960_s1, 1024, %s113_s30, [#allocation21], %s5176_s6, %s5176_s6, %s5177_s10  }
  0x35   :  { %p4765_p13 = por %p4764_p12, %p4763_p11 }
  0x37   :  { %p4766_p0 = pnand %p4765_p13, %p4759_p10 }
  0x39   :  { %4769 = shalt.err (!%p4766_p0)
}
  0x3a   :  { %s5961_s29 = sld [smem:[#allocation66_spill]]  ;;  %s4778_s30 = scalar_lea.vmem %s160_s3, 16 }
  0x3b   :  { %p4779_p1 = scmp.ne.s32.totalorder %s160_s3, %s4778_s30  ;;  %s4782_s2 = scalar_lea.vmem %s160_s3, 32 }
  0x3c   :  { %p4783_p2 = scmp.lt.s32.totalorder %s160_s3, %s160_s3  ;;  %p4784_p3 = scmp.lt.s32.totalorder %s4782_s2, %s4778_s30 }
  0x3e   :  { %p4785_p4 = por %p4784_p3, %p4783_p2 }
  0x40   :  { %140 = dma.hbm_to_vmem [thread:$0]  %s5961_s29, 1024, %s135_s8, [#allocation24], %s5176_s6, %s5176_s6, %s5177_s10  }
  0x41   :  { %p4786_p5 = pnand %p4785_p4, %p4779_p1 }
  0x43   :  { %4789 = shalt.err (!%p4786_p5)
}
  0x44   :  { %162 = dma.hbm_to_vmem [thread:$0]  %s5927_s13, 16, %s160_s3, [#allocation27]  }
  0x45   :  { %s5180_s1 = smov [#allocation29]   ;;  %s5181_s9 = smov [#allocation32]  }
  0x46   :  { %s181_s4 = sshll.u32 %s5180_s1, 4  ;;  %s203_s5 = sshll.u32 %s5181_s9, 4  ;;  %s182_s4 = int_to_ptr.vmem [resolvable:$true] %s181_s4  ;;  %s204_s5 = int_to_ptr.vmem [resolvable:$true] %s203_s5 }
  0x47   :  { %s4798_s0 = scalar_lea.vmem %s182_s4, 16  ;;  %s4802_s8 = scalar_lea.vmem %s182_s4, 32 }
  0x48   :  { %p4799_p6 = scmp.ne.s32.totalorder %s182_s4, %s4798_s0  ;;  %p4803_p7 = scmp.lt.s32.totalorder %s182_s4, %s182_s4 }
  0x49   :  { %p4804_p8 = scmp.lt.s32.totalorder %s4802_s8, %s4798_s0 }
  0x4b   :  { %p4805_p9 = por %p4804_p8, %p4803_p7 }
  0x4d   :  { %p4806_p10 = pnand %p4805_p9, %p4799_p6 }
  0x4f   :  { %4809 = shalt.err (!%p4806_p10)
}
  0x50   :  { %184 = dma.hbm_to_vmem [thread:$0]  %s5929_s15, 16, %s182_s4, [#allocation30]  }
  0x51   :  { %s4818_s30 = scalar_lea.vmem %s204_s5, 16  ;;  %s4822_s13 = scalar_lea.vmem %s204_s5, 32 }
  0x52   :  { %p4819_p11 = scmp.ne.s32.totalorder %s204_s5, %s4818_s30  ;;  %p4823_p12 = scmp.lt.s32.totalorder %s204_s5, %s204_s5 }
  0x53   :  { %p4824_p13 = scmp.lt.s32.totalorder %s4822_s13, %s4818_s30 }
  0x55   :  { %p4825_p0 = por %p4824_p13, %p4823_p12 }
  0x57   :  { %p4826_p1 = pnand %p4825_p0, %p4819_p11 }
  0x59   :  { %4829 = shalt.err (!%p4826_p1)
}
  0x5a   :  { %206 = dma.hbm_to_vmem [thread:$0]  %s5931_s17, 16, %s204_s5, [#allocation33]  }
  0x5b   :  { %s5182_s7 = smov [#allocation35]   ;;  %s5183_s1 = smov [#allocation38]  }
  0x5c   :  { %s227_s12 = sshll.u32 %s5182_s7, 4  ;;  %s249_s9 = sshll.u32 %s5183_s1, 4  ;;  %s228_s12 = int_to_ptr.vmem [resolvable:$true] %s227_s12  ;;  %s250_s9 = int_to_ptr.vmem [resolvable:$true] %s249_s9 }
  0x5d   :  { %s4838_s0 = scalar_lea.vmem %s228_s12, 16  ;;  %s4842_s15 = scalar_lea.vmem %s228_s12, 32 }
  0x5e   :  { %p4839_p2 = scmp.ne.s32.totalorder %s228_s12, %s4838_s0  ;;  %p4843_p3 = scmp.lt.s32.totalorder %s228_s12, %s228_s12 }
  0x5f   :  { %p4844_p4 = scmp.lt.s32.totalorder %s4842_s15, %s4838_s0 }
  0x61   :  { %p4845_p5 = por %p4844_p4, %p4843_p3 }
  0x63   :  { %p4846_p6 = pnand %p4845_p5, %p4839_p2 }
  0x65   :  { %4849 = shalt.err (!%p4846_p6)
}
  0x66   :  { %230 = dma.hbm_to_vmem [thread:$0]  %s5935_s21, 16, %s228_s12, [#allocation36]  }
  0x67   :  { %s4858_s11 = scalar_lea.vmem %s250_s9, 16  ;;  %s4862_s17 = scalar_lea.vmem %s250_s9, 32 }
  0x68   :  { %p4859_p7 = scmp.ne.s32.totalorder %s250_s9, %s4858_s11  ;;  %p4863_p8 = scmp.lt.s32.totalorder %s250_s9, %s250_s9 }
  0x69   :  { %p4864_p9 = scmp.lt.s32.totalorder %s4862_s17, %s4858_s11 }
  0x6b   :  { %p4865_p10 = por %p4864_p9, %p4863_p8 }
  0x6d   :  { %p4866_p11 = pnand %p4865_p10, %p4859_p7 }
  0x6f   :  { %4869 = shalt.err (!%p4866_p11)
}
  0x70   :  { %252 = dma.hbm_to_vmem [thread:$0]  %s5937_s23, 16, %s250_s9, [#allocation39]  }
  0x71   :  { %s5962_s3 = sld [smem:[#allocation55_spill]] }
  0x72   :  { %s5963_s21 = sld [smem:[#allocation56_spill]] }
  0x77   :  { %s51_s2 = sshll.u32 %s5962_s3, 4  ;;  %s52_s2 = int_to_ptr.vmem [resolvable:$true] %s51_s2 }
  0x78   :  { %s61_s12 = sshll.u32 %s5963_s21, 4  ;;  %s4870_s0 = scalar_lea.vmem %s52_s2, 16  ;;  %s62_s12 = int_to_ptr.vmem [resolvable:$true] %s61_s12 }
  0x79   :  { %p4871_p12 = scmp.ne.s32.totalorder %s52_s2, %s4870_s0  ;;  %p4875_p13 = scmp.lt.s32.totalorder %s52_s2, %s52_s2 }
  0x7a   :  { %p4876_p0 = scmp.lt.s32.totalorder %s4870_s0, %s4870_s0 }
  0x7c   :  { %p4877_p1 = por %p4876_p0, %p4875_p13 }
  0x7e   :  { %p4878_p2 = pnand %p4877_p1, %p4871_p12 }
  0x80   :  { %4881 = shalt.err (!%p4878_p2)
}
  0x81   :  { %s5184_s15 = smov [#allocation11]   ;;  %s4882_s23 = scalar_lea.vmem %s62_s12, 16 }
  0x82   :  { %54 = dma.vmem_to_smem %s52_s2, 16, %s5184_s15, [#allocation13]  }
  0x83   :  { %p4883_p3 = scmp.ne.s32.totalorder %s62_s12, %s4882_s23  ;;  %p4887_p4 = scmp.lt.s32.totalorder %s62_s12, %s62_s12 }
  0x84   :  { %p4888_p5 = scmp.lt.s32.totalorder %s4882_s23, %s4882_s23 }
  0x86   :  { %p4889_p6 = por %p4888_p5, %p4887_p4 }
  0x88   :  { %p4890_p7 = pnand %p4889_p6, %p4883_p3 }
  0x8a   :  { %4893 = shalt.err (!%p4890_p7)
}
  0x8b   :  { %s5185_s9 = smov [#allocation14]   ;;  %s5186_s4 = smov [#allocation16]  }
  0x8c   :  { %64 = dma.vmem_to_smem %s62_s12, 16, %s5185_s9, [#allocation15]  }
  0x8d   :  { %s76_s8 = sshll.u32 %s5186_s4, 4  ;;  %s5187_s11 = smov [#allocation19]   ;;  %s77_s8 = int_to_ptr.vmem [resolvable:$true] %s76_s8 }
  0x8e   :  { %s103_s17 = sshll.u32 %s5187_s11, 4  ;;  %s4902_s5 = scalar_lea.vmem %s77_s8, 1024  ;;  %s104_s17 = int_to_ptr.vmem [resolvable:$true] %s103_s17 }
  0x8f   :  { %p4903_p8 = scmp.ne.s32.totalorder %s77_s8, %s4902_s5  ;;  %p4907_p9 = scmp.lt.s32.totalorder %s77_s8, %s77_s8 }
  0x90   :  { %p4908_p10 = scmp.lt.s32.totalorder %s4902_s5, %s4902_s5 }
  0x92   :  { %p4909_p11 = por %p4908_p10, %p4907_p9 }
  0x94   :  { %p4910_p12 = pnand %p4909_p11, %p4903_p8 }
  0x96   :  { %4913 = shalt.err (!%p4910_p12)
}
  0x97   :  { %s5964_s13 = sld [smem:[#allocation60_spill]]  ;;  %s4922_s3 = scalar_lea.vmem %s104_s17, 16 }
  0x98   :  { %p4923_p13 = scmp.ne.s32.totalorder %s104_s17, %s4922_s3  ;;  %s4926_s2 = scalar_lea.vmem %s104_s17, 32 }
  0x99   :  { %p4927_p0 = scmp.lt.s32.totalorder %s104_s17, %s104_s17  ;;  %p4928_p1 = scmp.lt.s32.totalorder %s4926_s2, %s4922_s3 }
  0x9b   :  { %p4929_p2 = por %p4928_p1, %p4927_p0 }
  0x9d   :  { %82 = dma.hbm_to_vmem [thread:$0]  %s5964_s13, 1024, %s77_s8, [#allocation12], %s5176_s6, %s5176_s6, %s5177_s10  }
  0x9e   :  { %p4930_p3 = pnand %p4929_p2, %p4923_p13 }
  0xa0   :  { %4933 = shalt.err (!%p4930_p3)
}
  0xa1   :  { %s5965_s21 = sld [smem:[#allocation63_spill]]  ;;  %s5188_s12 = smov [#allocation22]  }
  0xa2   :  { %s125_s0 = sshll.u32 %s5188_s12, 4  ;;  %s5189_s15 = smov [#allocation25]   ;;  %s126_s0 = int_to_ptr.vmem [resolvable:$true] %s125_s0 }
  0xa3   :  { %s146_s23 = sshll.u32 %s5189_s15, 4  ;;  %s4942_s9 = scalar_lea.vmem %s126_s0, 16  ;;  %s147_s23 = int_to_ptr.vmem [resolvable:$true] %s146_s23 }
  0xa4   :  { %p4943_p4 = scmp.ne.s32.totalorder %s126_s0, %s4942_s9  ;;  %s4946_s4 = scalar_lea.vmem %s126_s0, 32 }
  0xa5   :  { %p4947_p5 = scmp.lt.s32.totalorder %s126_s0, %s126_s0  ;;  %p4948_p6 = scmp.lt.s32.totalorder %s4946_s4, %s4942_s9 }
  0xa7   :  { %106 = dma.hbm_to_vmem [thread:$0]  %s5965_s21, 16, %s104_s17, [#allocation18]  }
  0xa8   :  { %p4949_p7 = por %p4948_p6, %p4947_p5 }
  0xaa   :  { %p4950_p8 = pnand %p4949_p7, %p4943_p4 }
  0xac   :  { %4953 = shalt.err (!%p4950_p8)
}
  0xad   :  { %s5966_s5 = sld [smem:[#allocation65_spill]]  ;;  %s4962_s29 = scalar_lea.vmem %s147_s23, 1024 }
  0xae   :  { %p4963_p9 = scmp.ne.s32.totalorder %s147_s23, %s4962_s29  ;;  %p4967_p10 = scmp.lt.s32.totalorder %s147_s23, %s147_s23 }
  0xaf   :  { %p4968_p11 = scmp.lt.s32.totalorder %s4962_s29, %s4962_s29 }
  0xb1   :  { %p4969_p12 = por %p4968_p11, %p4967_p10 }
  0xb3   :  { %128 = dma.hbm_to_vmem [thread:$0]  %s5966_s5, 16, %s126_s0, [#allocation21]  }
  0xb4   :  { %p4970_p13 = pnand %p4969_p12, %p4963_p9 }
  0xb6   :  { %4973 = shalt.err (!%p4970_p13)
}
  0xb7   :  { %s5967_s13 = sld [smem:[#allocation67_spill]]  ;;  %s5190_s3 = smov [#allocation28]  }
  0xb8   :  { %s168_s2 = sshll.u32 %s5190_s3, 4  ;;  %s5191_s7 = smov [#allocation31]   ;;  %s169_s2 = int_to_ptr.vmem [resolvable:$true] %s168_s2 }
  0xb9   :  { %s190_s1 = sshll.u32 %s5191_s7, 4  ;;  %s4982_s21 = scalar_lea.vmem %s169_s2, 1024  ;;  %s191_s1 = int_to_ptr.vmem [resolvable:$true] %s190_s1 }
  0xba   :  { %p4983_p0 = scmp.ne.s32.totalorder %s169_s2, %s4982_s21  ;;  %p4987_p1 = scmp.lt.s32.totalorder %s169_s2, %s169_s2 }
  0xbb   :  { %p4988_p2 = scmp.lt.s32.totalorder %s4982_s21, %s4982_s21 }
  0xbd   :  { %152 = dma.hbm_to_vmem [thread:$0]  %s5967_s13, 1024, %s147_s23, [#allocation24], %s5176_s6, %s5176_s6, %s5177_s10  }
  0xbe   :  { %p4989_p3 = por %p4988_p2, %p4987_p1 }
  0xc0   :  { %p4990_p4 = pnand %p4989_p3, %p4983_p0 }
  0xc2   :  { %4993 = shalt.err (!%p4990_p4)
}
  0xc3   :  { %174 = dma.hbm_to_vmem [thread:$0]  %s5928_s14, 1024, %s169_s2, [#allocation27], %s5176_s6, %s5176_s6, %s5177_s10  }
  0xc4   :  { %s5002_s15 = scalar_lea.vmem %s191_s1, 1024  ;;  %p5007_p6 = scmp.lt.s32.totalorder %s191_s1, %s191_s1 }
  0xc5   :  { %p5003_p5 = scmp.ne.s32.totalorder %s191_s1, %s5002_s15  ;;  %p5008_p7 = scmp.lt.s32.totalorder %s5002_s15, %s5002_s15 }
  0xc7   :  { %p5009_p8 = por %p5008_p7, %p5007_p6 }
  0xc9   :  { %p5010_p9 = pnand %p5009_p8, %p5003_p5 }
  0xcb   :  { %5013 = shalt.err (!%p5010_p9)
}
  0xcc   :  { %196 = dma.hbm_to_vmem [thread:$0]  %s5930_s16, 1024, %s191_s1, [#allocation30], %s5176_s6, %s5176_s6, %s5177_s10  }
  0xcd   :  { %s5192_s4 = smov [#allocation34]   ;;  %s5193_s11 = smov [#allocation37]  }
  0xce   :  { %s215_s8 = sshll.u32 %s5192_s4, 4  ;;  %s236_s5 = sshll.u32 %s5193_s11, 4  ;;  %s216_s8 = int_to_ptr.vmem [resolvable:$true] %s215_s8  ;;  %s237_s5 = int_to_ptr.vmem [resolvable:$true] %s236_s5 }
  0xcf   :  { %s5022_s14 = scalar_lea.vmem %s216_s8, 16  ;;  %s5026_s29 = scalar_lea.vmem %s216_s8, 32 }
  0xd0   :  { %p5023_p10 = scmp.ne.s32.totalorder %s216_s8, %s5022_s14  ;;  %p5027_p11 = scmp.lt.s32.totalorder %s216_s8, %s216_s8 }
  0xd1   :  { %p5028_p12 = scmp.lt.s32.totalorder %s5026_s29, %s5022_s14 }
  0xd3   :  { %p5029_p13 = por %p5028_p12, %p5027_p11 }
  0xd5   :  { %p5030_p0 = pnand %p5029_p13, %p5023_p10 }
  0xd7   :  { %5033 = shalt.err (!%p5030_p0)
}
  0xd8   :  { %218 = dma.hbm_to_vmem [thread:$0]  %s5933_s19, 16, %s216_s8, [#allocation33]  }
  0xd9   :  { %s5042_s13 = scalar_lea.vmem %s237_s5, 1024  ;;  %p5047_p2 = scmp.lt.s32.totalorder %s237_s5, %s237_s5 }
  0xda   :  { %p5043_p1 = scmp.ne.s32.totalorder %s237_s5, %s5042_s13  ;;  %p5048_p3 = scmp.lt.s32.totalorder %s5042_s13, %s5042_s13 }
  0xdc   :  { %p5049_p4 = por %p5048_p3, %p5047_p2 }
  0xde   :  { %p5050_p5 = pnand %p5049_p4, %p5043_p1 }
  0xe0   :  { %5053 = shalt.err (!%p5050_p5)
}
  0xe1   :  { %242 = dma.hbm_to_vmem [thread:$0]  %s5936_s22, 1024, %s237_s5, [#allocation36], %s5176_s6, %s5176_s6, %s5177_s10  }
  0xe2   :  { %s5194_s2 = smov [#allocation40]   ;;  %s5195_s1 = smov [#allocation41]  }
  0xe3   :  { %s258_s7 = sshll.u32 %s5194_s2, 4  ;;  %s272_s21 = sshll.u32 %s5195_s1, 4  ;;  %s259_s7 = int_to_ptr.vmem [resolvable:$true] %s258_s7  ;;  %s273_s21 = int_to_ptr.vmem [resolvable:$true] %s272_s21 }
  0xe4   :  { %s5062_s19 = scalar_lea.vmem %s259_s7, 1024  ;;  %p5067_p7 = scmp.lt.s32.totalorder %s259_s7, %s259_s7 }
  0xe5   :  { %p5063_p6 = scmp.ne.s32.totalorder %s259_s7, %s5062_s19  ;;  %p5068_p8 = scmp.lt.s32.totalorder %s5062_s19, %s5062_s19 }
  0xe7   :  { %p5069_p9 = por %p5068_p8, %p5067_p7 }
  0xe9   :  { %p5070_p10 = pnand %p5069_p9, %p5063_p6 }
  0xeb   :  { %5073 = shalt.err (!%p5070_p10)
}
  0xec   :  { %264 = dma.hbm_to_vmem [thread:$0]  %s5938_s24, 1024, %s259_s7, [#allocation39], %s5176_s6, %s5176_s6, %s5177_s10  }
  0xed   :  { %s5082_s22 = scalar_lea.vmem %s273_s21, 1024  ;;  %p5087_p12 = scmp.lt.s32.totalorder %s273_s21, %s273_s21 }
  0xee   :  { %p5083_p11 = scmp.ne.s32.totalorder %s273_s21, %s5082_s22  ;;  %p5088_p13 = scmp.lt.s32.totalorder %s5082_s22, %s5082_s22 }
  0xf0   :  { %p5089_p0 = por %p5088_p13, %p5087_p12 }
  0xf2   :  { %p5090_p1 = pnand %p5089_p0, %p5083_p11 }
  0xf4   :  { %5093 = shalt.err (!%p5090_p1)
}
  0xf5   :  { %278 = dma.hbm_to_vmem [thread:$0]  %s5940_s26, 1024, %s273_s21, [#allocation42], %s5176_s6, %s5176_s6, %s5177_s10  }
  0xf6   :  { %5122 = dma.done.wait [#allocation13], 16  }
  0xf7   :  { %5123 = vsyncadd [#allocation13], 4294967280 }
  0xf8   :  { %5124 = dma.done.wait [#allocation15], 16  }
  0xf9   :  { %5125 = vsyncadd [#allocation15], 4294967280 }
  0xfa   :  { %5126 = dma.done.wait [#allocation12], 1024  }
  0xfb   :  { %5127 = vsyncadd [#allocation12], 4294966272 }
  0xfc   :  { %5128 = dma.done.wait [#allocation18], 1040  }
  0xfd   :  { %5129 = vsyncadd [#allocation18], 4294966256 }
  0xfe   :  { %5130 = dma.done.wait [#allocation21], 1040  }
  0xff   :  { %5131 = vsyncadd [#allocation21], 4294966256 }
 0x100   :  { %5132 = dma.done.wait [#allocation24], 2048  }
 0x101   :  { %5133 = vsyncadd [#allocation24], 4294965248 }
 0x102   :  { %5134 = dma.done.wait [#allocation27], 1040  }
 0x103   :  { %5135 = vsyncadd [#allocation27], 4294966256 }
 0x104   :  { %5136 = dma.done.wait [#allocation30], 1040  }
 0x105   :  { %5137 = vsyncadd [#allocation30], 4294966256 }
 0x106   :  { %5138 = dma.done.wait [#allocation33], 32  }
 0x107   :  { %5139 = vsyncadd [#allocation33], 4294967264 }
 0x108   :  { %5140 = dma.done.wait [#allocation36], 1040  }
 0x109   :  { %5141 = vsyncadd [#allocation36], 4294966256 }
 0x10a   :  { %5142 = dma.done.wait [#allocation39], 1040  }
 0x10b   :  { %5143 = vsyncadd [#allocation39], 4294966256 }
 0x10c   :  { %5144 = dma.done.wait [#allocation42], 1024  }
 0x10d   :  { %5145 = vsyncadd [#allocation42], 4294966272 }
 0x10e   :  { %341 = sfence }
 0x10f   :  { %v4477_v0 = vld [vmem:[#allocation16 + $0x38] sm:$0xff]   ;;  %v5196_v1 = vmov 0.0   ;;  %v4478_v2 = vld [vmem:[#allocation16 + $0x30] sm:$0xff]   ;;  %vm5197_vm0 = vmmov 0   ;;  %v4479_v3 = vld [vmem:[#allocation16 + $0x28] sm:$0xff]   ;;  %s5968_s6 = sld [smem:[#allocation57_spill]] }
 0x110   :  { %4137 = vmatprep.subr.bf16.mxu0 %v5196_v1  ;;  %4157 = vmatprep.subr.bf16.mxu1 %v5196_v1  ;;  %v4486_v4 = vld [vmem:[#allocation17 + $0x38] sm:$0xff]   ;;  %v4480_v5 = vld [vmem:[#allocation16 + $0x20] sm:$0xff]   ;;  %v4487_v6 = vld [vmem:[#allocation17 + $0x30] sm:$0xff]   ;;  %s5969_s4 = sld [smem:[#allocation61_spill]]  ;;  %s5146_s8 = smov 0  }
 0x111   :  { %4138 = vmatpush3.bf16.msra.mxu0 %v4477_v0  ;;  %4153 = vmatprep.mubr.msk.bf16.mxu0 %vm5197_vm0, %v5196_v1  ;;  %v4481_v7 = vld [vmem:[#allocation16 + $0x18] sm:$0xff]   ;;  %v4488_v8 = vld [vmem:[#allocation17 + $0x28] sm:$0xff]   ;;  %v4482_v9 = vld [vmem:[#allocation16 + $0x10] sm:$0xff]  }
 0x112   :  { %4139 = vmatprep.subr.bf16.mxu0 %v5196_v1  ;;  %4173 = vmatprep.mubr.msk.bf16.mxu1 %vm5197_vm0, %v5196_v1  ;;  %v4489_v10 = vld [vmem:[#allocation17 + $0x20] sm:$0xff]   ;;  %v4483_v11 = vld [vmem:[#allocation16 + $0x8] sm:$0xff]   ;;  %v4490_v12 = vld [vmem:[#allocation17 + $0x18] sm:$0xff]  }
 0x113   :  { %4158 = vmatpush3.bf16.msra.mxu1 %v4486_v4  ;;  %v4484_v13 = vld [vmem:[#allocation16] sm:$0xff]   ;;  %v4491_v15 = vld [vmem:[#allocation17 + $0x10] sm:$0xff]   ;;  %v4492_v16 = vld [vmem:[#allocation17 + $0x8] sm:$0xff]  }
 0x114   :  { %4159 = vmatprep.subr.bf16.mxu1 %v5196_v1  ;;  %v4493_v17 = vld [vmem:[#allocation17] sm:$0xff]   ;;  %v4495_v19 = vld [vmem:[#allocation20 + $0x30] sm:$0xff]   ;;  %v4496_v20 = vld [vmem:[#allocation20 + $0x28] sm:$0xff]  }
 0x115   :  { %4140 = vmatpush3.bf16.msra.mxu0 %v4478_v2  ;;  %v4485_v14 = vld [vmem:[%s5968_s6] sm:$0xff]   ;;  %v4499_v33 = vld [vmem:[#allocation20 + $0x10] sm:$0xff]   ;;  %v4500_v34 = vld [vmem:[#allocation20 + $0x8] sm:$0xff]  }
 0x116   :  { %4141 = vmatprep.subr.bf16.mxu0 %v5196_v1  ;;  %v4494_v18 = vld [vmem:[#allocation20 + $0x38] sm:$0xff]   ;;  %v4497_v21 = vld [vmem:[#allocation20 + $0x20] sm:$0xff]  }
 0x117   :  { %4160 = vmatpush3.bf16.msra.mxu1 %v4487_v6  ;;  %v4498_v22 = vld [vmem:[#allocation20 + $0x18] sm:$0xff]   ;;  %v4501_v35 = vld [vmem:[#allocation20] sm:$0xff]  }
 0x118   :  { %4161 = vmatprep.subr.bf16.mxu1 %v5196_v1  ;;  %v3545_v23 = vld [vmem:[%s5969_s4] ss:$0 sm:$0xff]  ;;  %v3555_v36 = vld [vmem:[#allocation19] ss:$0 sm:$0xff]  ;;  %v3564_v46 = vld [vmem:[#allocation22] ss:$0 sm:$0xff] }
 0x119   :  { %4142 = vmatpush3.bf16.msra.mxu0 %v4479_v3 }
 0x11a   :  { %4143 = vmatprep.subr.bf16.mxu0 %v5196_v1 }
 0x11b   :  { %4162 = vmatpush3.bf16.msra.mxu1 %v4488_v8 }
 0x11c   :  { %4163 = vmatprep.subr.bf16.mxu1 %v5196_v1 }
 0x11d   :  { %4144 = vmatpush3.bf16.msra.mxu0 %v4480_v5 }
 0x11e   :  { %4145 = vmatprep.subr.bf16.mxu0 %v5196_v1 }
 0x11f   :  { %4164 = vmatpush3.bf16.msra.mxu1 %v4489_v10 }
 0x120   :  { %4165 = vmatprep.subr.bf16.mxu1 %v5196_v1 }
 0x121   :  { %4146 = vmatpush3.bf16.msra.mxu0 %v4481_v7 }
 0x122   :  { %4147 = vmatprep.subr.bf16.mxu0 %v5196_v1 }
 0x123   :  { %4166 = vmatpush3.bf16.msra.mxu1 %v4490_v12 }
 0x124   :  { %4167 = vmatprep.subr.bf16.mxu1 %v5196_v1 }
 0x125   :  { %4148 = vmatpush3.bf16.msra.mxu0 %v4482_v9 }
 0x126   :  { %4149 = vmatprep.subr.bf16.mxu0 %v5196_v1 }
 0x127   :  { %4168 = vmatpush3.bf16.msra.mxu1 %v4491_v15 }
 0x128   :  { %4169 = vmatprep.subr.bf16.mxu1 %v5196_v1 }
 0x129   :  { %4150 = vmatpush3.bf16.msra.mxu0 %v4483_v11 }
 0x12a   :  { %4151 = vmatprep.subr.bf16.mxu0 %v5196_v1 }
 0x12b   :  { %4170 = vmatpush3.bf16.msra.mxu1 %v4492_v16 }
 0x12c   :  { %4171 = vmatprep.subr.bf16.mxu1 %v5196_v1 }
 0x12d   :  { %4152 = vmatpush3.bf16.msra.mxu0 %v4484_v13 }
 0x12e   :  { %4177 = vmatprep.subr.bf16.mxu0 %v5196_v1 }
 0x12f   :  { %4172 = vmatpush3.bf16.msra.mxu1 %v4493_v17 }
 0x130   :  { %4154 = vmatmul.mubr.bf16.vlgmr.msra.gmra.mxu0 %v4485_v14 }
 0x131   :  { %4193 = vmatprep.mubr.msk.bf16.mxu0 %vm5197_vm0, %v5196_v1  ;;  %4178 = vmatpush3.bf16.msra.mxu0 %v4494_v18 }
 0x132   :  { %4179 = vmatprep.subr.bf16.mxu0 %v5196_v1 }
 0x135   :  { %4180 = vmatpush3.bf16.msra.mxu0 %v4495_v19 }
 0x136   :  { %4181 = vmatprep.subr.bf16.mxu0 %v5196_v1 }
 0x139   :  { %4182 = vmatpush3.bf16.msra.mxu0 %v4496_v20 }
 0x13a   :  { %4183 = vmatprep.subr.bf16.mxu0 %v5196_v1 }
 0x13d   :  { %4184 = vmatpush3.bf16.msra.mxu0 %v4497_v21 }
 0x13e   :  { %4185 = vmatprep.subr.bf16.mxu0 %v5196_v1 }
 0x141   :  { %4186 = vmatpush3.bf16.msra.mxu0 %v4498_v22 }
 0x142   :  { %4187 = vmatprep.subr.bf16.mxu0 %v5196_v1 }
 0x145   :  { %4188 = vmatpush3.bf16.msra.mxu0 %v4499_v33 }
 0x146   :  { %4189 = vmatprep.subr.bf16.mxu0 %v5196_v1 }
 0x149   :  { %4190 = vmatpush3.bf16.msra.mxu0 %v4500_v34 }
 0x14a   :  { %4191 = vmatprep.subr.bf16.mxu0 %v5196_v1 }
 0x14d   :  { %4192 = vmatpush3.bf16.msra.mxu0 %v4501_v35 }
 0x1f0   :  { %v456_v24 = vpop.f32.mrf.mxu0 }
 0x1f1   :  { %v457_v26 = vadd.f32 %v3545_v23, %v456_v24 }
 0x1f2   :  { %v4155_v25 = vpop.f32.mrf.mxu0 }
 0x1f3   :  { %v463_v30 = vmax.f32 %v457_v26, 0.0 }
 0x1f4   :  { %v459_v27 = vpop.f32.mrf.mxu0 }
 0x1f5   :  { %v460_v28 = vadd.f32 %v3545_v23, %v459_v27 }
 0x1f6   :  { %v4156_v29 = vpop.f32.mrf.mxu0 }
 0x1f7   :  { %v464_v31 = vmax.f32 %v460_v28, 0.0 }
 0x1f9   :  { %v465_v32 = vpack.c.bf16 %v464_v31, %v463_v30 }
 0x1fb   :  { %4174 = vmatmul.mubr.bf16.vlgmr.msra.gmra.mxu1 %v465_v32 }
 0x2bb   :  { %v571_v37 = vpop.f32.mrf.mxu1 }
 0x2bc   :  { %v572_v39 = vadd.f32 %v3555_v36, %v571_v37 }
 0x2bd   :  { %v4175_v38 = vpop.f32.mrf.mxu1 }
 0x2be   :  { %v578_v43 = vmax.f32 %v572_v39, 0.0 }
 0x2bf   :  { %v574_v40 = vpop.f32.mrf.mxu1 }
 0x2c0   :  { %v575_v41 = vadd.f32 %v3555_v36, %v574_v40 }
 0x2c1   :  { %v4176_v42 = vpop.f32.mrf.mxu1 }
 0x2c2   :  { %v579_v44 = vmax.f32 %v575_v41, 0.0 }
 0x2c4   :  { %v580_v45 = vpack.c.bf16 %v579_v44, %v578_v43 }
 0x2c6   :  { %4194 = vmatmul.mubr.bf16.vlgmr.msra.gmra.mxu0 %v580_v45 }
 0x386   :  { %v686_v47 = vpop.f32.mrf.mxu0 }
 0x387   :  { %v687_v48 = vadd.f32 %v3564_v46, %v686_v47 }
 0x388   :  { %v4195_v49 = vpop.f32.mrf.mxu0 }
 0x389   :  { %v693_v50 = vmax.f32 %v687_v48, 0.0 }
 0x38a   :  { %v689_v51 = vpop.f32.mrf.mxu0 }
 0x38b   :  { %695 = vst [vmem:[#allocation5] sm:$0xff] %v693_v50  ;;  %697 = vst [vmem:[#allocation6] sm:$0xff] %v693_v50  ;;  %v690_v52 = vadd.f32 %v3564_v46, %v689_v51 }
 0x38c   :  { %v4196_v53 = vpop.f32.mrf.mxu0 }
 0x38d   :  { %v694_v54 = vmax.f32 %v690_v52, 0.0 }
 0x38f   :  { %696 = vst [vmem:[#allocation5 + $0x8] sm:$0xff] %v694_v54  ;;  %698 = vst [vmem:[#allocation6 + $0x8] sm:$0xff] %v694_v54 }
 0x390 LB: > { %s705_s11 = sld [smem:[#allocation11 + %s5148_s8]]  ;;  %s712_s2 = scalar_lea.vmem [#allocation2], %s5148_s8  ;;  %s5148_s8 = sphi %s5146_s8, %s704_s8  }
 0x391   : > { %s706_s5 = sld [smem:[#allocation14 + %s5148_s8]]  ;;  %s704_s8 = sadd.s32 1, %s5148_s8  }
 0x392   : > { %s5970_s17 = sld [smem:[#allocation59_spill]]  ;;  %p701_p2 = scmp.ge.s32.totalorder %s704_s8, 24  }
 0x393   :  { %v4502_v58 = vld [vmem:[#allocation25 + $0x38] sm:$0xff] (%p701_p2)   ;;  %v4504_v60 = vld [vmem:[#allocation25 + $0x30] sm:$0xff] (%p701_p2)   ;;  %v4506_v62 = vld [vmem:[#allocation25 + $0x28] sm:$0xff] (%p701_p2)   ;;  %s5971_s21 = sld [smem:[#allocation58_spill]] (%p701_p2)  ;;  %s5150_s0 = smov (%p701_p2), 0  }
 0x394   :  { %v4503_v59 = vld [vmem:[#allocation23 + $0x38] sm:$0xff] (%p701_p2)   ;;  %4197 = vmatprep.subr.bf16.mxu1 (%p701_p2), %v4502_v58  ;;  %v4505_v61 = vld [vmem:[#allocation23 + $0x30] sm:$0xff] (%p701_p2)   ;;  %v4507_v63 = vld [vmem:[#allocation23 + $0x28] sm:$0xff] (%p701_p2)  }
 0x395   :  { %4217 = vmatprep.subr.bf16.mxu0 (%p701_p2), %v4503_v59  ;;  %4198 = vmatpush3.bf16.msra.mxu1 (%p701_p2), %v4502_v58  ;;  %v4508_v0 = vld [vmem:[#allocation25 + $0x20] sm:$0xff] (%p701_p2)   ;;  %v4510_v3 = vld [vmem:[#allocation25 + $0x18] sm:$0xff] (%p701_p2)   ;;  %v4512_v5 = vld [vmem:[#allocation25 + $0x10] sm:$0xff] (%p701_p2)  }
 0x396   :  { %4218 = vmatpush3.bf16.msra.mxu0 (%p701_p2), %v4503_v59  ;;  %4199 = vmatprep.subr.bf16.mxu1 (%p701_p2), %v4504_v60  ;;  %v4509_v2 = vld [vmem:[#allocation23 + $0x20] sm:$0xff] (%p701_p2)   ;;  %v4511_v4 = vld [vmem:[#allocation23 + $0x18] sm:$0xff] (%p701_p2)   ;;  %v4513_v8 = vld [vmem:[#allocation23 + $0x10] sm:$0xff] (%p701_p2)  }
 0x397   :  { %4219 = vmatprep.subr.bf16.mxu0 (%p701_p2), %v4505_v61  ;;  %v4514_v11 = vld [vmem:[#allocation25 + $0x8] sm:$0xff] (%p701_p2)   ;;  %v4516_v13 = vld [vmem:[#allocation25] sm:$0xff] (%p701_p2)   ;;  %v4521_v19 = vld [vmem:[#allocation28 + $0x30] sm:$0xff] (%p701_p2)  }
 0x398   : > { %s707_s30 = scalar_lea.vmem %s5970_s17, %s705_s11  ;;  %s709_s3 = scalar_lea.vmem %s5970_s17, %s706_s5  ;;  %v4515_v12 = vld [vmem:[#allocation23 + $0x8] sm:$0xff] (%p701_p2)   ;;  %v4517_v14 = vld [vmem:[#allocation23] sm:$0xff] (%p701_p2)   ;;  %v4525_v23 = vld [vmem:[#allocation28 + $0x10] sm:$0xff] (%p701_p2)  }
 0x399   : > { %v708_v55 = vld [vmem:[%s707_s30] sm:$0x1]  ;;  %703 = sbr.rel (!%p701_p2) target bundleno = 912 (0x390), region = 282  ;;  %4200 = vmatpush3.bf16.msra.mxu1 (%p701_p2), %v4504_v60  ;;  %v4520_v16 = vld [vmem:[#allocation28 + $0x38] sm:$0xff] (%p701_p2)   ;;  %v4522_v20 = vld [vmem:[#allocation28 + $0x28] sm:$0xff] (%p701_p2)  }
 0x39a   : > { %v710_v56 = vld [vmem:[%s709_s3] sm:$0x1]  ;;  %4220 = vmatpush3.bf16.msra.mxu0 (%p701_p2), %v4505_v61  ;;  %4201 = vmatprep.subr.bf16.mxu1 (%p701_p2), %v4506_v62  ;;  %v4519_v18 = vld [vmem:[%s5971_s21 + $0x8] ss:$0 sps:$4 sm:$0xff] (%p701_p2)   ;;  %v4523_v21 = vld [vmem:[#allocation28 + $0x20] sm:$0xff] (%p701_p2)  }
 0x39b   : > { %v711_v57 = vsub.f32 %v708_v55, %v710_v56  ;;  %4221 = vmatprep.subr.bf16.mxu0 (%p701_p2), %v4507_v63  ;;  %v4518_v10 = vld [vmem:[%s5971_s21] sm:$0xff] (%p701_p2)   ;;  %v4526_v24 = vld [vmem:[#allocation28 + $0x8] sm:$0xff] (%p701_p2)   ;;  %v4527_v25 = vld [vmem:[#allocation28] sm:$0xff] (%p701_p2)  }
 0x39c   :  { %4233 = vmatprep.mubr.bf16.mxu0 (%p701_p2), %v4518_v10  ;;  %v4524_v22 = vld [vmem:[#allocation28 + $0x18] sm:$0xff] (%p701_p2)   ;;  %v4530_v28 = vld [vmem:[#allocation31 + $0x28] sm:$0xff] (%p701_p2)   ;;  %v4531_v29 = vld [vmem:[#allocation31 + $0x20] sm:$0xff] (%p701_p2)  }
 0x39d   : > { %713 = vst [vmem:[%s712_s2] sm:$0x1] %v711_v57  ;;  %4202 = vmatpush3.bf16.msra.mxu1 (%p701_p2), %v4506_v62  ;;  %v4528_v26 = vld [vmem:[#allocation31 + $0x38] sm:$0xff] (%p701_p2)   ;;  %v4529_v27 = vld [vmem:[#allocation31 + $0x30] sm:$0xff] (%p701_p2)   ;;  %v4534_v52 = vld [vmem:[#allocation31 + $0x8] sm:$0xff] (%p701_p2)  }
 0x39e   :  { %4222 = vmatpush3.bf16.msra.mxu0 %v4507_v63  ;;  %4203 = vmatprep.subr.bf16.mxu1 %v4508_v0  ;;  %v4532_v30 = vld [vmem:[#allocation31 + $0x18] sm:$0xff]   ;;  %v4533_v51 = vld [vmem:[#allocation31 + $0x10] sm:$0xff]   ;;  %v4535_v53 = vld [vmem:[#allocation31] sm:$0xff]  }
 0x39f   :  { %4223 = vmatprep.subr.bf16.mxu0 %v4509_v2  ;;  %v3591_v36 = vld [vmem:[#allocation26] ss:$0 sm:$0xff]  ;;  %v3592_v55 = vld [vmem:[#allocation29] ss:$0 sm:$0xff] }
 0x3a1   :  { %4204 = vmatpush3.bf16.msra.mxu1 %v4508_v0 }
 0x3a2   :  { %4224 = vmatpush3.bf16.msra.mxu0 %v4509_v2  ;;  %4205 = vmatprep.subr.bf16.mxu1 %v4510_v3 }
 0x3a3   :  { %4225 = vmatprep.subr.bf16.mxu0 %v4511_v4 }
 0x3a4   :  { %v733_v6 = vld [vmem:[#allocation2] sm:$0xff]  ;;  %v734_v7 = vld [vmem:[#allocation2 + $0x8] sm:$0xff]  ;;  %v735_v15 = vld [vmem:[#allocation2 + $0x10] sm:$0xff] }
 0x3a5   :  { %v736_v9 = vpack.c.bf16 %v734_v7, %v733_v6  ;;  %4206 = vmatpush3.bf16.msra.mxu1 %v4510_v3  ;;  %v737_v17 = vpack.c.bf16 %v735_v15, %v735_v15  ;;  %v3601_v6 = vld [vmem:[#allocation32] ss:$0 sm:$0xff] }
 0x3a6   :  { %4226 = vmatpush3.bf16.msra.mxu0 %v4511_v4  ;;  %4207 = vmatprep.subr.bf16.mxu1 %v4512_v5  ;;  %v5481_v4 = vld [vmem:[#allocation34] ss:$0 sm:$0xff] }
 0x3a7   :  { %4213 = vmatprep.mubr.bf16.mxu1 %v736_v9  ;;  %4227 = vmatprep.subr.bf16.mxu0 %v4513_v8 }
 0x3a9   :  { %4208 = vmatpush3.bf16.msra.mxu1 %v4512_v5  ;;  %v5483_v5 = vld [vmem:[#allocation35] ss:$0 sm:$0xff] }
 0x3aa   :  { %4228 = vmatpush3.bf16.msra.mxu0 %v4513_v8  ;;  %4209 = vmatprep.subr.bf16.mxu1 %v4514_v11 }
 0x3ab   :  { %4229 = vmatprep.subr.bf16.mxu0 %v4515_v12 }
 0x3ad   :  { %4210 = vmatpush3.bf16.msra.mxu1 %v4514_v11 }
 0x3ae   :  { %4230 = vmatpush3.bf16.msra.mxu0 %v4515_v12  ;;  %4211 = vmatprep.subr.bf16.mxu1 %v4516_v13 }
 0x3af   :  { %4231 = vmatprep.subr.bf16.mxu0 %v4517_v14 }
 0x3b1   :  { %4212 = vmatpush3.bf16.msra.mxu1 %v4516_v13 }
 0x3b2   :  { %4232 = vmatpush3.bf16.msra.mxu0 %v4517_v14  ;;  %4237 = vmatprep.subr.bf16.mxu1 %v4520_v16 }
 0x3b3   :  { %4257 = vmatprep.subr.bf16.mxu0 %v4528_v26 }
 0x3b4   :  { %4214 = vmatmul.mubr.bf16.vlgmr.msra.gmra.mxu1 %v737_v17 }
 0x3b5   :  { %4234 = vmatmul.mubr.bf16.vlgmr.msra.gmra.mxu0 %v4519_v18  ;;  %4238 = vmatpush3.bf16.msra.mxu1 %v4520_v16 }
 0x3b6   :  { %4239 = vmatprep.subr.bf16.mxu1 %v4521_v19  ;;  %4258 = vmatpush3.bf16.msra.mxu0 %v4528_v26 }
 0x3b7   :  { %4259 = vmatprep.subr.bf16.mxu0 %v4529_v27 }
 0x3b9   :  { %4240 = vmatpush3.bf16.msra.mxu1 %v4521_v19 }
 0x3ba   :  { %4241 = vmatprep.subr.bf16.mxu1 %v4522_v20  ;;  %4260 = vmatpush3.bf16.msra.mxu0 %v4529_v27 }
 0x3bb   :  { %4261 = vmatprep.subr.bf16.mxu0 %v4530_v28 }
 0x3bd   :  { %4242 = vmatpush3.bf16.msra.mxu1 %v4522_v20 }
 0x3be   :  { %4243 = vmatprep.subr.bf16.mxu1 %v4523_v21  ;;  %4262 = vmatpush3.bf16.msra.mxu0 %v4530_v28 }
 0x3bf   :  { %4263 = vmatprep.subr.bf16.mxu0 %v4531_v29 }
 0x3c1   :  { %4244 = vmatpush3.bf16.msra.mxu1 %v4523_v21 }
 0x3c2   :  { %4245 = vmatprep.subr.bf16.mxu1 %v4524_v22  ;;  %4264 = vmatpush3.bf16.msra.mxu0 %v4531_v29 }
 0x3c3   :  { %4265 = vmatprep.subr.bf16.mxu0 %v4532_v30 }
 0x3c5   :  { %4246 = vmatpush3.bf16.msra.mxu1 %v4524_v22 }
 0x3c6   :  { %4247 = vmatprep.subr.bf16.mxu1 %v4525_v23  ;;  %4266 = vmatpush3.bf16.msra.mxu0 %v4532_v30 }
 0x3c7   :  { %4267 = vmatprep.subr.bf16.mxu0 %v4533_v51 }
 0x3c9   :  { %4248 = vmatpush3.bf16.msra.mxu1 %v4525_v23 }
 0x3ca   :  { %4249 = vmatprep.subr.bf16.mxu1 %v4526_v24  ;;  %4268 = vmatpush3.bf16.msra.mxu0 %v4533_v51 }
 0x3cb   :  { %4269 = vmatprep.subr.bf16.mxu0 %v4534_v52 }
 0x3cd   :  { %4250 = vmatpush3.bf16.msra.mxu1 %v4526_v24 }
 0x3ce   :  { %4251 = vmatprep.subr.bf16.mxu1 %v4527_v25  ;;  %4270 = vmatpush3.bf16.msra.mxu0 %v4534_v52 }
 0x3cf   :  { %4271 = vmatprep.subr.bf16.mxu0 %v4535_v53 }
 0x3d1   :  { %4252 = vmatpush3.bf16.msra.mxu1 %v4527_v25 }
 0x3d2   :  { %4272 = vmatpush3.bf16.msra.mxu0 %v4535_v53 }
 0x474   :  { %v4215_v31 = vpop.f32.mrf.mxu1 }
 0x475   :  { %v4235_v32 = vpop.f32.mrf.mxu0 }
 0x476   :  { %v836_v33 = vpop.f32.mrf.mxu1  ;;  %v951_v34 = vadd.f32 %v4235_v32, %v4215_v31 }
 0x477   :  { %v942_v35 = vpop.f32.mrf.mxu0 }
 0x478   :  { %v943_v37 = vadd.f32 %v942_v35, %v836_v33  ;;  %v4216_v38 = vpop.f32.mrf.mxu1  ;;  %v965_v41 = vadd.f32 %v3591_v36, %v951_v34 }
 0x479   :  { %v4236_v39 = vpop.f32.mrf.mxu0 }
 0x47a   :  { %v839_v40 = vpop.f32.mrf.mxu1  ;;  %v963_v43 = vadd.f32 %v3591_v36, %v943_v37  ;;  %v968_v46 = vmax.f32 %v965_v41, 0.0 }
 0x47b   :  { %v945_v42 = vpop.f32.mrf.mxu0 }
 0x47c   :  { %v946_v44 = vadd.f32 %v945_v42, %v839_v40  ;;  %v966_v47 = vmax.f32 %v963_v43, 0.0  ;;  %v970_v50 = vpack.c.bf16 %v968_v46, %v968_v46 }
 0x47e   :  { %v964_v45 = vadd.f32 %v3591_v36, %v946_v44 }
 0x480   :  { %v967_v48 = vmax.f32 %v964_v45, 0.0 }
 0x482   :  { %v969_v49 = vpack.c.bf16 %v967_v48, %v966_v47 }
 0x484   :  { %4253 = vmatprep.mubr.bf16.mxu1 %v969_v49 }
 0x485   :  { %4254 = vmatmul.mubr.bf16.vlgmr.msra.gmra.mxu1 %v970_v50 }
 0x545   :  { %v4255_v54 = vpop.f32.mrf.mxu1 }
 0x546   :  { %v1085_v57 = vadd.f32 %v4255_v54, %v3592_v55 }
 0x547   :  { %v1076_v56 = vpop.f32.mrf.mxu1 }
 0x548   :  { %v1077_v59 = vadd.f32 %v3592_v55, %v1076_v56  ;;  %v1092_v62 = vmax.f32 %v1085_v57, 0.0 }
 0x549   :  { %v4256_v58 = vpop.f32.mrf.mxu1 }
 0x54a   :  { %v1090_v63 = vmax.f32 %v1077_v59, 0.0  ;;  %v1094_v3 = vpack.c.bf16 %v1092_v62, %v1092_v62 }
 0x54b   :  { %v1079_v60 = vpop.f32.mrf.mxu1 }
 0x54c   :  { %v1080_v61 = vadd.f32 %v3592_v55, %v1079_v60 }
 0x54e   :  { %v1091_v0 = vmax.f32 %v1080_v61, 0.0 }
 0x550   :  { %v1093_v2 = vpack.c.bf16 %v1091_v0, %v1090_v63 }
 0x552   :  { %4273 = vmatprep.mubr.bf16.mxu0 %v1093_v2 }
 0x553   :  { %4274 = vmatmul.mubr.bf16.vlgmr.msra.gmra.mxu0 %v1094_v3 }
 0x613   :  { %v4275_v7 = vpop.f32.mrf.mxu0 }
 0x614   :  { %v1209_v8 = vadd.f32 %v4275_v7, %v3601_v6 }
 0x615   :  { %v1200_v9 = vpop.f32.mrf.mxu0 }
 0x616   :  { %v1216_v10 = vmax.f32 %v1209_v8, 0.0  ;;  %v1201_v11 = vadd.f32 %v3601_v6, %v1200_v9 }
 0x617   :  { %v4276_v12 = vpop.f32.mrf.mxu0 }
 0x618   :  { %1219 = vst [vmem:[#allocation7 + $0x10] sm:$0xff] %v1216_v10  ;;  %v1214_v13 = vmax.f32 %v1201_v11, 0.0 }
 0x619   :  { %v1203_v14 = vpop.f32.mrf.mxu0 }
 0x61a   :  { %1217 = vst [vmem:[#allocation7] sm:$0xff] %v1214_v13  ;;  %v1204_v15 = vadd.f32 %v3601_v6, %v1203_v14 }
 0x61c   :  { %v1215_v16 = vmax.f32 %v1204_v15, 0.0 }
 0x61e   :  { %1218 = vst [vmem:[#allocation7 + $0x8] sm:$0xff] %v1215_v16 }
 0x61f LB: > { %s1228_s22 = sld [smem:[#allocation11 + %s5152_s0]]  ;;  %s1232_s24 = scalar_lea.vmem [#allocation3], %s5152_s0  ;;  %s5152_s0 = sphi %s5150_s0, %s1227_s0  }
 0x620   : > { %s1229_s15 = sld [smem:[#allocation14 + %s5152_s0]]  ;;  %s1236_s6 = scalar_lea.vmem [#allocation4], %s5152_s0 }
 0x621   : > { %s1227_s0 = sadd.s32 1, %s5152_s0  }
 0x622   : > { %p1224_p3 = scmp.ge.s32.totalorder %s1227_s0, 24  }
 0x623   :  { %v4536_v19 = vld [vmem:[%s5932_s18 + $0x78] sm:$0xff] (%p1224_p3)   ;;  %1628 = vst [vmem:[#allocation8] sm:$0xff] (%p1224_p3), %v5196_v1  ;;  %1629 = vst [vmem:[#allocation8 + $0x8] sm:$0xff] (%p1224_p3), %v5196_v1  ;;  %v4539_v22 = vld [vmem:[%s5932_s18 + $0x70] sm:$0xff] (%p1224_p3)  }
 0x624   :  { %1226 = sbr.rel (!%p1224_p3) target bundleno = 1567 (0x61f), region = 293  ;;  %v4537_v20 = vld [vmem:[%s5932_s18 + $0x38] sm:$0xff] (%p1224_p3)   ;;  %3930 = vmatprep.subr.bf16.mxu1 (%p1224_p3), %v4536_v19  ;;  %v4540_v23 = vld [vmem:[%s5932_s18 + $0x30] sm:$0xff] (%p1224_p3)   ;;  %v4542_v25 = vld [vmem:[%s5932_s18 + $0x68] sm:$0xff] (%p1224_p3)  }
 0x625   : > { %s1230_s23 = scalar_lea.vmem [#allocation5], %s1228_s22  ;;  %v4538_v21 = vld [vmem:[%s5932_s18 + $0xb8] sm:$0xff] (%p1224_p3)   ;;  %3931 = vmatpush3.bf16.msra.mxu1 (%p1224_p3), %v4537_v20  ;;  %v4541_v24 = vld [vmem:[%s5932_s18 + $0xb0] sm:$0xff] (%p1224_p3)   ;;  %v4543_v26 = vld [vmem:[%s5932_s18 + $0x28] sm:$0xff] (%p1224_p3)  }
 0x626   : > { %v1231_v17 = vld [vmem:[%s1230_s23] sm:$0x1]  ;;  %s1234_s26 = scalar_lea.vmem [#allocation5], %s1229_s15  ;;  %4277 = vmatprep.subr.bf16.mxu0 (%p1224_p3), %v4538_v21  ;;  %3932 = vmatprep.subr.bf16.mxu1 (%p1224_p3), %v4539_v22  ;;  %v4544_v27 = vld [vmem:[%s5932_s18 + $0xa8] sm:$0xff] (%p1224_p3)   ;;  %v4548_v31 = vld [vmem:[%s5932_s18 + $0x58] sm:$0xff] (%p1224_p3)   ;;  %s5154_s23 = smov (%p1224_p3), 0  }
 0x627   : > { %1233 = vst [vmem:[%s1232_s24] sm:$0x1] %v1231_v17  ;;  %v1235_v18 = vld [vmem:[%s1234_s26] sm:$0x1]  ;;  %4278 = vmatpush3.bf16.msra.mxu0 (%p1224_p3), %v4538_v21  ;;  %v4550_v32 = vld [vmem:[%s5932_s18 + $0x98] sm:$0xff] (%p1224_p3)   ;;  %v4551_v34 = vld [vmem:[%s5932_s18 + $0x50] sm:$0xff] (%p1224_p3)  }
 0x628   : > { %1237 = vst [vmem:[%s1236_s6] sm:$0x1] %v1235_v18  ;;  %4279 = vmatprep.subr.bf16.mxu0 (%p1224_p3), %v4541_v24  ;;  %v4545_v28 = vld [vmem:[%s5932_s18 + $0x60] sm:$0xff] (%p1224_p3)   ;;  %v4549_v33 = vld [vmem:[%s5932_s18 + $0x18] sm:$0xff] (%p1224_p3)   ;;  %v4553_v35 = vld [vmem:[%s5932_s18 + $0x90] sm:$0xff] (%p1224_p3)  }
 0x629   :  { %3933 = vmatpush3.bf16.msra.mxu1 %v4540_v23  ;;  %v4546_v29 = vld [vmem:[%s5932_s18 + $0x20] sm:$0xff]   ;;  %v4552_v36 = vld [vmem:[%s5932_s18 + $0x10] sm:$0xff]   ;;  %v4554_v37 = vld [vmem:[%s5932_s18 + $0x48] sm:$0xff]  }
 0x62a   :  { %3934 = vmatprep.subr.bf16.mxu1 %v4542_v25  ;;  %v4547_v30 = vld [vmem:[%s5932_s18 + $0xa0] sm:$0xff]   ;;  %v4555_v38 = vld [vmem:[%s5932_s18 + $0x8] sm:$0xff]   ;;  %v1239_v43 = vld [vmem:[#allocation7 + $0x8] sm:$0xff] }
 0x62b   :  { %4280 = vmatpush3.bf16.msra.mxu0 %v4541_v24  ;;  %v4556_v39 = vld [vmem:[%s5932_s18 + $0x88] sm:$0xff]   ;;  %v4557_v40 = vld [vmem:[%s5932_s18 + $0x40] sm:$0xff]   ;;  %v3825_v46 = vpack.c.bf16 %v1239_v43, %v1239_v43  ;;  %v1240_v55 = vld [vmem:[#allocation7 + $0x10] sm:$0xff] }
 0x62c   :  { %4281 = vmatprep.subr.bf16.mxu0 %v4544_v27  ;;  %v4559_v41 = vld [vmem:[%s5932_s18 + $0x80] sm:$0xff]   ;;  %v1238_v42 = vld [vmem:[#allocation7] sm:$0xff]  ;;  %v3826_v59 = vpack.c.bf16 %v1240_v55, %v1240_v55 }
 0x62d   :  { %3935 = vmatpush3.bf16.msra.mxu1 %v4543_v26  ;;  %v3824_v45 = vpack.c.bf16 %v1238_v42, %v1238_v42  ;;  %v4558_v57 = vld [vmem:[%s5932_s18] sm:$0xff]   ;;  %1255 = vst [vmem:[#allocation9 + $0xc] sm:$0xf] %v3825_v46 }
 0x62e   :  { %3936 = vmatprep.subr.bf16.mxu1 %v4545_v28  ;;  %v1257_v44 = vld [vmem:[#allocation3] sm:$0xff]  ;;  %v1258_v47 = vld [vmem:[#allocation3 + $0x8] sm:$0xff]  ;;  %v1259_v56 = vld [vmem:[#allocation3 + $0x10] sm:$0xff]  ;;  %1256 = vst [vmem:[#allocation9 + $0x18] sm:$0xf] %v3826_v59 }
 0x62f   :  { %4282 = vmatpush3.bf16.msra.mxu0 %v4544_v27  ;;  %v3827_v48 = vpack.c.bf16 %v1257_v44, %v1257_v44  ;;  %v1276_v49 = vld [vmem:[#allocation4] sm:$0xff]  ;;  %v1277_v50 = vld [vmem:[#allocation4 + $0x8] sm:$0xff]  ;;  %v3828_v51 = vpack.c.bf16 %v1258_v47, %v1258_v47  ;;  %v1278_v54 = vld [vmem:[#allocation4 + $0x10] sm:$0xff]  ;;  %1254 = vst [vmem:[#allocation9] sm:$0xf] %v3824_v45  ;;  %v3829_v60 = vpack.c.bf16 %v1259_v56, %v1259_v56 }
 0x630   :  { %4283 = vmatprep.subr.bf16.mxu0 %v4547_v30  ;;  %v3830_v52 = vpack.c.bf16 %v1276_v49, %v1276_v49  ;;  %v3831_v53 = vpack.c.bf16 %v1277_v50, %v1277_v50  ;;  %v3832_v58 = vpack.c.bf16 %v1278_v54, %v1278_v54 }
 0x631   :  { %3937 = vmatpush3.bf16.msra.mxu1 %v4546_v29  ;;  %1273 = vst [vmem:[#allocation9 + $0x4] sm:$0xf] %v3827_v48  ;;  %1274 = vst [vmem:[#allocation9 + $0x10] sm:$0xf] %v3828_v51 }
 0x632   :  { %3938 = vmatprep.subr.bf16.mxu1 %v4548_v31  ;;  %1292 = vst [vmem:[#allocation9 + $0x8] sm:$0xf] %v3830_v52  ;;  %1293 = vst [vmem:[#allocation9 + $0x14] sm:$0xf] %v3831_v53 }
 0x633   :  { %4284 = vmatpush3.bf16.msra.mxu0 %v4547_v30  ;;  %1294 = vst [vmem:[#allocation9 + $0x20] sm:$0xf] %v3832_v58  ;;  %1275 = vst [vmem:[#allocation9 + $0x1c] sm:$0xf] %v3829_v60 }
 0x634   :  { %4285 = vmatprep.subr.bf16.mxu0 %v4550_v32 }
 0x635   :  { %3939 = vmatpush3.bf16.msra.mxu1 %v4549_v33 }
 0x636   :  { %3940 = vmatprep.subr.bf16.mxu1 %v4551_v34  ;;  %v4560_v61 = vld [vmem:[#allocation9] ss:$12 sps:$4 sm:$0xff]  }
 0x637   :  { %4286 = vmatpush3.bf16.msra.mxu0 %v4550_v32 }
 0x638   :  { %4287 = vmatprep.subr.bf16.mxu0 %v4553_v35  ;;  %v4562_v62 = vld [vmem:[#allocation9 + $0x4] ss:$12 sps:$4 sm:$0xff]  }
 0x639   :  { %3941 = vmatpush3.bf16.msra.mxu1 %v4552_v36  ;;  %v4563_v63 = vld [vmem:[#allocation9 + $0x8] ss:$12 sps:$4 sm:$0xff]   ;;  %1558 = vmatprep.mubr.bf16.mxu1 %v4562_v62 }
 0x63a   :  { %3942 = vmatprep.subr.bf16.mxu1 %v4554_v37  ;;  %v4564_v0 = vld [vmem:[#allocation9 + $0x20] ss:$0 sps:$4 sm:$0xff]   ;;  %v1299_v2 = vld [vmem:[#allocation9 + $0x18] sm:$0xff]  ;;  %4293 = vmatprep.mubr.bf16.mxu0 %v4563_v63 }
 0x63b   :  { %4288 = vmatpush3.bf16.msra.mxu0 %v4553_v35  ;;  %v3624_v3 = vcombine.high %v1299_v2, %v1299_v2  ;;  %v3623_v6 = vcombine.low %v1299_v2, %v1299_v2 }
 0x63c   :  { %4289 = vmatprep.subr.bf16.mxu0 %v4556_v39 }
 0x63d   :  { %3943 = vmatpush3.bf16.msra.mxu1 %v4555_v38 }
 0x63e   :  { %3944 = vmatprep.subr.bf16.mxu1 %v4557_v40 }
 0x63f   :  { %4290 = vmatpush3.bf16.msra.mxu0 %v4556_v39 }
 0x640   :  { %4291 = vmatprep.subr.bf16.mxu0 %v4559_v41 }
 0x641   :  { %3945 = vmatpush3.bf16.msra.mxu1 %v4558_v57 }
 0x643   :  { %4292 = vmatpush3.bf16.msra.mxu0 %v4559_v41 }
 0x644   :  { %1559 = vmatmul.mubr.bf16.vlgmr.msra.gmra.mxu1 %v4560_v61 }
 0x645   :  { %1566 = vmatprep.mubr.bf16.mxu1 %v3624_v3 }
 0x646   :  { %4294 = vmatmul.mubr.bf16.vlgmr.msra.gmra.mxu0 %v4564_v0 }
 0x64c   :  { %1567 = vmatmul.mubr.bf16.gmra.mxu1 %v3623_v6 }
 0x704   :  { %v3946_v7 = vpop.f32.mrf.mxu1 }
 0x706   :  { %v4295_v8 = vpop.f32.mrf.mxu0  ;;  %v3947_v9 = vpop.f32.mrf.mxu1 }
 0x707   :  { %v3948_v10 = vadd.f32 %v3947_v9, %v3946_v7 }
 0x708   :  { %v1608_v11 = vpop.f32.mrf.mxu0  ;;  %v3949_v12 = vpop.f32.mrf.mxu1 }
 0x709   :  { %v1561_v13 = vadd.f32 %v3948_v10, %v5481_v4 }
 0x70a   :  { %v4296_v14 = vpop.f32.mrf.mxu0  ;;  %v3950_v15 = vpop.f32.mrf.mxu1 }
 0x70b   :  { %v1609_v16 = vadd.f32 %v1608_v11, %v1561_v13  ;;  %v3951_v17 = vadd.f32 %v3950_v15, %v3949_v12 }
 0x70c   :  { %v3952_v18 = vpop.f32.mrf.mxu1  ;;  %v1611_v21 = vpop.f32.mrf.mxu0 }
 0x70d   :  { %v1622_v19 = vmax.f32 %v1609_v16, 0.0  ;;  %v1564_v20 = vadd.f32 %v3951_v17, %v5481_v4 }
 0x70e   :  { %v3953_v22 = vpop.f32.mrf.mxu1 }
 0x70f   :  { %1625 = vst [vmem:[#allocation7] sm:$0xff] %v1622_v19  ;;  %v1612_v23 = vadd.f32 %v1611_v21, %v1564_v20  ;;  %v3954_v24 = vadd.f32 %v3953_v22, %v3952_v18 }
 0x710   :  { %v3955_v25 = vpop.f32.mrf.mxu1 }
 0x711   :  { %v1623_v26 = vmax.f32 %v1612_v23, 0.0  ;;  %v1569_v27 = vadd.f32 %v3954_v24, %v5481_v4 }
 0x712   :  { %v3956_v28 = vpop.f32.mrf.mxu1 }
 0x713   :  { %1626 = vst [vmem:[#allocation7 + $0x8] sm:$0xff] %v1623_v26  ;;  %v1617_v29 = vadd.f32 %v4295_v8, %v1569_v27 }
 0x715   :  { %v1624_v30 = vmax.f32 %v1617_v29, 0.0 }
 0x717   :  { %1627 = vst [vmem:[#allocation7 + $0x10] sm:$0xff] %v1624_v30 }
 0x718 LB: > { %s1636_s24 = sld [smem:[#allocation11 + %s5156_s23]]  ;;  %s1639_s26 = scalar_lea.vmem [#allocation7], %s5156_s23  ;;  %s5156_s23 = sphi %s5154_s23, %s1635_s23  }
 0x719   : > { %s1635_s23 = sadd.s32 1, %s5156_s23  }
 0x71a   : > { %p1632_p4 = scmp.ge.s32.totalorder %s1635_s23, 24  }
 0x71b   :  { %v4567_v34 = vld [vmem:[%s5934_s20 + $0x78] sm:$0xff] (%p1632_p4)   ;;  %v4569_v36 = vld [vmem:[%s5934_s20 + $0x70] sm:$0xff] (%p1632_p4)   ;;  %v4571_v38 = vld [vmem:[%s5934_s20 + $0x68] sm:$0xff] (%p1632_p4)   ;;  %s5158_s14 = smov (%p1632_p4), 0  }
 0x71c   :  { %v4568_v35 = vld [vmem:[%s5934_s20 + $0x38] sm:$0xff] (%p1632_p4)   ;;  %3968 = vmatprep.subr.bf16.mxu1 (%p1632_p4), %v4567_v34  ;;  %v4570_v37 = vld [vmem:[%s5934_s20 + $0x30] sm:$0xff] (%p1632_p4)   ;;  %v4572_v39 = vld [vmem:[%s5934_s20 + $0x28] sm:$0xff] (%p1632_p4)  }
 0x71d   :  { %3969 = vmatpush3.bf16.msra.mxu1 (%p1632_p4), %v4568_v35  ;;  %v4573_v40 = vld [vmem:[%s5934_s20 + $0x60] sm:$0xff] (%p1632_p4)   ;;  %v4575_v42 = vld [vmem:[%s5934_s20 + $0x58] sm:$0xff] (%p1632_p4)   ;;  %v4577_v44 = vld [vmem:[%s5934_s20 + $0x50] sm:$0xff] (%p1632_p4)  }
 0x71e   : > { %v1640_v31 = vld [vmem:[%s1639_s26] sm:$0x1]  ;;  %s1637_s6 = scalar_lea.vmem [#allocation8], %s1636_s24  ;;  %1634 = sbr.rel (!%p1632_p4) target bundleno = 1816 (0x718), region = 304  ;;  %3970 = vmatprep.subr.bf16.mxu1 (%p1632_p4), %v4569_v36  ;;  %v4576_v43 = vld [vmem:[%s5934_s20 + $0x18] sm:$0xff] (%p1632_p4)   ;;  %v1643_v45 = vld [vmem:[#allocation5] sm:$0xff] (%p1632_p4) }
 0x71f   : > { %v1638_v32 = vld [vmem:[%s1637_s6] sm:$0x1]  ;;  %v1644_v46 = vld [vmem:[#allocation5 + $0x8] sm:$0xff] (%p1632_p4)  ;;  %v3833_v48 = vpack.c.bf16 (%p1632_p4), %v1643_v45, %v1643_v45  ;;  %v4579_v54 = vld [vmem:[%s5934_s20 + $0x48] sm:$0xff] (%p1632_p4)  }
 0x720   : > { %v1641_v33 = vadd.f32 %v1640_v31, %v1638_v32  ;;  %v4574_v41 = vld [vmem:[%s5934_s20 + $0x20] sm:$0xff] (%p1632_p4)   ;;  %v3834_v49 = vpack.c.bf16 (%p1632_p4), %v1644_v46, %v1644_v46  ;;  %v4578_v53 = vld [vmem:[%s5934_s20 + $0x10] sm:$0xff] (%p1632_p4)   ;;  %v4580_v55 = vld [vmem:[%s5934_s20 + $0x8] sm:$0xff] (%p1632_p4)  }
 0x721   :  { %3971 = vmatpush3.bf16.msra.mxu1 (%p1632_p4), %v4570_v37  ;;  %1653 = vst [vmem:[#allocation10] sm:$0xf] (%p1632_p4), %v3833_v48  ;;  %v4581_v56 = vld [vmem:[%s5934_s20 + $0x40] sm:$0xff] (%p1632_p4)   ;;  %v1854_v63 = vld [vmem:[#allocation6] sm:$0xff] (%p1632_p4) }
 0x722   : > { %1642 = vst [vmem:[%s1637_s6] sm:$0x1] %v1641_v33  ;;  %3972 = vmatprep.subr.bf16.mxu1 (%p1632_p4), %v4571_v38  ;;  %1654 = vst [vmem:[#allocation10 + $0x8] sm:$0xf] (%p1632_p4), %v3834_v49  ;;  %v4582_v57 = vld [vmem:[%s5934_s20] sm:$0xff] (%p1632_p4)  }
 0x723   :  { %v1855_v8 = vld [vmem:[#allocation6 + $0x8] sm:$0xff] }
 0x725   :  { %3973 = vmatpush3.bf16.msra.mxu1 %v4572_v39 }
 0x726   :  { %3974 = vmatprep.subr.bf16.mxu1 %v4573_v40 }
 0x729   :  { %3975 = vmatpush3.bf16.msra.mxu1 %v4574_v41  ;;  %v1655_v47 = vld [vmem:[#allocation8] sm:$0xff]  ;;  %v1656_v50 = vld [vmem:[#allocation8 + $0x8] sm:$0xff]  ;;  %v4583_v59 = vld [vmem:[#allocation10] ss:$8 sps:$4 sm:$0xff]  }
 0x72a   :  { %3976 = vmatprep.subr.bf16.mxu1 %v4575_v42  ;;  %v3835_v51 = vpack.c.bf16 %v1655_v47, %v1655_v47  ;;  %v3836_v52 = vpack.c.bf16 %v1656_v50, %v1656_v50 }
 0x72c   :  { %1665 = vst [vmem:[#allocation10 + $0x4] sm:$0xf] %v3835_v51  ;;  %1666 = vst [vmem:[#allocation10 + $0xc] sm:$0xf] %v3836_v52 }
 0x72d   :  { %3977 = vmatpush3.bf16.msra.mxu1 %v4576_v43 }
 0x72e   :  { %3978 = vmatprep.subr.bf16.mxu1 %v4577_v44 }
 0x731   :  { %3979 = vmatpush3.bf16.msra.mxu1 %v4578_v53 }
 0x732   :  { %3980 = vmatprep.subr.bf16.mxu1 %v4579_v54 }
 0x733   :  { %v4585_v58 = vld [vmem:[#allocation10 + $0x4] ss:$8 sps:$4 sm:$0xff]  }
 0x734   :  { %1845 = vmatprep.mubr.bf16.mxu1 %v4585_v58 }
 0x735   :  { %3981 = vmatpush3.bf16.msra.mxu1 %v4580_v55 }
 0x736   :  { %3982 = vmatprep.subr.bf16.mxu1 %v4581_v56 }
 0x739   :  { %3983 = vmatpush3.bf16.msra.mxu1 %v4582_v57 }
 0x73c   :  { %1846 = vmatmul.mubr.bf16.vlgmr.msra.gmra.mxu1 %v4583_v59 }
 0x7fc   :  { %v3984_v60 = vpop.f32.mrf.mxu1 }
 0x7fe   :  { %v3985_v61 = vpop.f32.mrf.mxu1 }
 0x7ff   :  { %v3986_v62 = vadd.f32 %v3985_v61, %v3984_v60 }
 0x800   :  { %v3987_v0 = vpop.f32.mrf.mxu1 }
 0x801   :  { %v1848_v2 = vadd.f32 %v3986_v62, %v5483_v5 }
 0x802   :  { %v3988_v3 = vpop.f32.mrf.mxu1 }
 0x803   :  { %v1856_v6 = vadd.f32 %v1854_v63, %v1848_v2  ;;  %v3989_v7 = vadd.f32 %v3988_v3, %v3987_v0 }
 0x805   :  { %v1858_v9 = vmax.f32 %v1856_v6, 0.0  ;;  %v1851_v10 = vadd.f32 %v3989_v7, %v5483_v5 }
 0x807   :  { %1860 = vst [vmem:[#allocation5] sm:$0xff] %v1858_v9  ;;  %v1857_v11 = vadd.f32 %v1855_v8, %v1851_v10 }
 0x809   :  { %v1859_v12 = vmax.f32 %v1857_v11, 0.0 }
 0x80b   :  { %1861 = vst [vmem:[#allocation5 + $0x8] sm:$0xff] %v1859_v12 }
 0x80c LB: > { %s1868_s29 = sld [smem:[#allocation11 + %s5160_s14]]  ;;  %s1872_s13 = scalar_lea.vmem [#allocation3], %s5160_s14  ;;  %s5160_s14 = sphi %s5158_s14, %s1867_s14  }
 0x80d   : > { %s1869_s17 = sld [smem:[#allocation14 + %s5160_s14]]  ;;  %s1876_s3 = scalar_lea.vmem [#allocation4], %s5160_s14 }
 0x80e   : > { %s1867_s14 = sadd.s32 1, %s5160_s14  }
 0x80f   : > { %p1864_p5 = scmp.ge.s32.totalorder %s1867_s14, 24  }
 0x810   :  { %v4586_v15 = vld [vmem:[%s5932_s18 + $0x78] sm:$0xff] (%p1864_p5)   ;;  %2262 = vst [vmem:[#allocation8] sm:$0xff] (%p1864_p5), %v5196_v1  ;;  %2263 = vst [vmem:[#allocation8 + $0x8] sm:$0xff] (%p1864_p5), %v5196_v1  ;;  %v4589_v18 = vld [vmem:[%s5932_s18 + $0x70] sm:$0xff] (%p1864_p5)  }
 0x811   :  { %1866 = sbr.rel (!%p1864_p5) target bundleno = 2060 (0x80c), region = 315  ;;  %v4587_v16 = vld [vmem:[%s5932_s18 + $0x38] sm:$0xff] (%p1864_p5)   ;;  %3990 = vmatprep.subr.bf16.mxu0 (%p1864_p5), %v4586_v15  ;;  %v4590_v19 = vld [vmem:[%s5932_s18 + $0x30] sm:$0xff] (%p1864_p5)   ;;  %v4592_v21 = vld [vmem:[%s5932_s18 + $0x68] sm:$0xff] (%p1864_p5)  }
 0x812   : > { %s1870_s30 = scalar_lea.vmem [#allocation5], %s1868_s29  ;;  %v4588_v17 = vld [vmem:[%s5932_s18 + $0xb8] sm:$0xff] (%p1864_p5)   ;;  %3991 = vmatpush3.bf16.msra.mxu0 (%p1864_p5), %v4587_v16  ;;  %v4591_v20 = vld [vmem:[%s5932_s18 + $0xb0] sm:$0xff] (%p1864_p5)   ;;  %v4593_v22 = vld [vmem:[%s5932_s18 + $0x28] sm:$0xff] (%p1864_p5)  }
 0x813   : > { %v1871_v13 = vld [vmem:[%s1870_s30] sm:$0x1]  ;;  %s1874_s16 = scalar_lea.vmem [#allocation5], %s1869_s17  ;;  %4297 = vmatprep.subr.bf16.mxu1 (%p1864_p5), %v4588_v17  ;;  %3992 = vmatprep.subr.bf16.mxu0 (%p1864_p5), %v4589_v18  ;;  %v4594_v23 = vld [vmem:[%s5932_s18 + $0xa8] sm:$0xff] (%p1864_p5)   ;;  %v4598_v27 = vld [vmem:[%s5932_s18 + $0x58] sm:$0xff] (%p1864_p5)   ;;  %s5162_s30 = smov (%p1864_p5), 0  }
 0x814   : > { %1873 = vst [vmem:[%s1872_s13] sm:$0x1] %v1871_v13  ;;  %v1875_v14 = vld [vmem:[%s1874_s16] sm:$0x1]  ;;  %4298 = vmatpush3.bf16.msra.mxu1 (%p1864_p5), %v4588_v17  ;;  %v4600_v28 = vld [vmem:[%s5932_s18 + $0x98] sm:$0xff] (%p1864_p5)   ;;  %v4601_v30 = vld [vmem:[%s5932_s18 + $0x50] sm:$0xff] (%p1864_p5)  }
 0x815   : > { %1877 = vst [vmem:[%s1876_s3] sm:$0x1] %v1875_v14  ;;  %4299 = vmatprep.subr.bf16.mxu1 (%p1864_p5), %v4591_v20  ;;  %v4595_v24 = vld [vmem:[%s5932_s18 + $0x60] sm:$0xff] (%p1864_p5)   ;;  %v4599_v29 = vld [vmem:[%s5932_s18 + $0x18] sm:$0xff] (%p1864_p5)   ;;  %v4603_v31 = vld [vmem:[%s5932_s18 + $0x90] sm:$0xff] (%p1864_p5)  }
 0x816   :  { %3993 = vmatpush3.bf16.msra.mxu0 %v4590_v19  ;;  %v4596_v25 = vld [vmem:[%s5932_s18 + $0x20] sm:$0xff]   ;;  %v4602_v32 = vld [vmem:[%s5932_s18 + $0x10] sm:$0xff]   ;;  %v4604_v33 = vld [vmem:[%s5932_s18 + $0x48] sm:$0xff]  }
 0x817   :  { %3994 = vmatprep.subr.bf16.mxu0 %v4592_v21  ;;  %v4597_v26 = vld [vmem:[%s5932_s18 + $0xa0] sm:$0xff]   ;;  %v4605_v34 = vld [vmem:[%s5932_s18 + $0x8] sm:$0xff]   ;;  %v1879_v39 = vld [vmem:[#allocation7 + $0x8] sm:$0xff] }
 0x818   :  { %4300 = vmatpush3.bf16.msra.mxu1 %v4591_v20  ;;  %v4606_v35 = vld [vmem:[%s5932_s18 + $0x88] sm:$0xff]   ;;  %v4607_v36 = vld [vmem:[%s5932_s18 + $0x40] sm:$0xff]   ;;  %v3838_v42 = vpack.c.bf16 %v1879_v39, %v1879_v39  ;;  %v1880_v51 = vld [vmem:[#allocation7 + $0x10] sm:$0xff] }
 0x819   :  { %4301 = vmatprep.subr.bf16.mxu1 %v4594_v23  ;;  %v4609_v37 = vld [vmem:[%s5932_s18 + $0x80] sm:$0xff]   ;;  %v1878_v38 = vld [vmem:[#allocation7] sm:$0xff]  ;;  %v3839_v55 = vpack.c.bf16 %v1880_v51, %v1880_v51 }
 0x81a   :  { %3995 = vmatpush3.bf16.msra.mxu0 %v4593_v22  ;;  %v3837_v41 = vpack.c.bf16 %v1878_v38, %v1878_v38  ;;  %v4608_v53 = vld [vmem:[%s5932_s18] sm:$0xff]   ;;  %1895 = vst [vmem:[#allocation9 + $0xc] sm:$0xf] %v3838_v42 }
 0x81b   :  { %3996 = vmatprep.subr.bf16.mxu0 %v4595_v24  ;;  %v1897_v40 = vld [vmem:[#allocation3] sm:$0xff]  ;;  %v1898_v43 = vld [vmem:[#allocation3 + $0x8] sm:$0xff]  ;;  %v1899_v52 = vld [vmem:[#allocation3 + $0x10] sm:$0xff]  ;;  %1896 = vst [vmem:[#allocation9 + $0x18] sm:$0xf] %v3839_v55 }
 0x81c   :  { %4302 = vmatpush3.bf16.msra.mxu1 %v4594_v23  ;;  %v3840_v44 = vpack.c.bf16 %v1897_v40, %v1897_v40  ;;  %v1916_v45 = vld [vmem:[#allocation4] sm:$0xff]  ;;  %v1917_v46 = vld [vmem:[#allocation4 + $0x8] sm:$0xff]  ;;  %v3841_v47 = vpack.c.bf16 %v1898_v43, %v1898_v43  ;;  %v1918_v50 = vld [vmem:[#allocation4 + $0x10] sm:$0xff]  ;;  %1894 = vst [vmem:[#allocation9] sm:$0xf] %v3837_v41  ;;  %v3842_v56 = vpack.c.bf16 %v1899_v52, %v1899_v52 }
 0x81d   :  { %4303 = vmatprep.subr.bf16.mxu1 %v4597_v26  ;;  %v3843_v48 = vpack.c.bf16 %v1916_v45, %v1916_v45  ;;  %v3844_v49 = vpack.c.bf16 %v1917_v46, %v1917_v46  ;;  %v3845_v54 = vpack.c.bf16 %v1918_v50, %v1918_v50 }
 0x81e   :  { %3997 = vmatpush3.bf16.msra.mxu0 %v4596_v25  ;;  %1913 = vst [vmem:[#allocation9 + $0x4] sm:$0xf] %v3840_v44  ;;  %1914 = vst [vmem:[#allocation9 + $0x10] sm:$0xf] %v3841_v47 }
 0x81f   :  { %3998 = vmatprep.subr.bf16.mxu0 %v4598_v27  ;;  %1932 = vst [vmem:[#allocation9 + $0x8] sm:$0xf] %v3843_v48  ;;  %1933 = vst [vmem:[#allocation9 + $0x14] sm:$0xf] %v3844_v49 }
 0x820   :  { %4304 = vmatpush3.bf16.msra.mxu1 %v4597_v26  ;;  %1934 = vst [vmem:[#allocation9 + $0x20] sm:$0xf] %v3845_v54  ;;  %1915 = vst [vmem:[#allocation9 + $0x1c] sm:$0xf] %v3842_v56 }
 0x821   :  { %4305 = vmatprep.subr.bf16.mxu1 %v4600_v28 }
 0x822   :  { %3999 = vmatpush3.bf16.msra.mxu0 %v4599_v29 }
 0x823   :  { %4000 = vmatprep.subr.bf16.mxu0 %v4601_v30  ;;  %v4610_v57 = vld [vmem:[#allocation9] ss:$12 sps:$4 sm:$0xff]  }
 0x824   :  { %4306 = vmatpush3.bf16.msra.mxu1 %v4600_v28 }
 0x825   :  { %4307 = vmatprep.subr.bf16.mxu1 %v4603_v31  ;;  %v4612_v58 = vld [vmem:[#allocation9 + $0x4] ss:$12 sps:$4 sm:$0xff]  }
 0x826   :  { %4001 = vmatpush3.bf16.msra.mxu0 %v4602_v32  ;;  %v4613_v59 = vld [vmem:[#allocation9 + $0x8] ss:$12 sps:$4 sm:$0xff]   ;;  %2192 = vmatprep.mubr.bf16.mxu0 %v4612_v58 }
 0x827   :  { %4002 = vmatprep.subr.bf16.mxu0 %v4604_v33  ;;  %v4614_v60 = vld [vmem:[#allocation9 + $0x20] ss:$0 sps:$4 sm:$0xff]   ;;  %v1939_v61 = vld [vmem:[#allocation9 + $0x18] sm:$0xff]  ;;  %4313 = vmatprep.mubr.bf16.mxu1 %v4613_v59 }
 0x828   :  { %4308 = vmatpush3.bf16.msra.mxu1 %v4603_v31  ;;  %v3686_v62 = vcombine.high %v1939_v61, %v1939_v61  ;;  %v3685_v63 = vcombine.low %v1939_v61, %v1939_v61 }
 0x829   :  { %4309 = vmatprep.subr.bf16.mxu1 %v4606_v35 }
 0x82a   :  { %4003 = vmatpush3.bf16.msra.mxu0 %v4605_v34 }
 0x82b   :  { %4004 = vmatprep.subr.bf16.mxu0 %v4607_v36 }
 0x82c   :  { %4310 = vmatpush3.bf16.msra.mxu1 %v4606_v35 }
 0x82d   :  { %4311 = vmatprep.subr.bf16.mxu1 %v4609_v37 }
 0x82e   :  { %4005 = vmatpush3.bf16.msra.mxu0 %v4608_v53 }
 0x830   :  { %4312 = vmatpush3.bf16.msra.mxu1 %v4609_v37 }
 0x831   :  { %2193 = vmatmul.mubr.bf16.vlgmr.msra.gmra.mxu0 %v4610_v57 }
 0x832   :  { %2200 = vmatprep.mubr.bf16.mxu0 %v3686_v62 }
 0x833   :  { %4314 = vmatmul.mubr.bf16.vlgmr.msra.gmra.mxu1 %v4614_v60 }
 0x839   :  { %2201 = vmatmul.mubr.bf16.gmra.mxu0 %v3685_v63 }
 0x8f1   :  { %v4006_v0 = vpop.f32.mrf.mxu0 }
 0x8f3   :  { %v4315_v2 = vpop.f32.mrf.mxu1  ;;  %v4007_v3 = vpop.f32.mrf.mxu0 }
 0x8f4   :  { %v4008_v6 = vadd.f32 %v4007_v3, %v4006_v0 }
 0x8f5   :  { %v2242_v7 = vpop.f32.mrf.mxu1  ;;  %v4009_v8 = vpop.f32.mrf.mxu0 }
 0x8f6   :  { %v2195_v9 = vadd.f32 %v4008_v6, %v5481_v4 }
 0x8f7   :  { %v4316_v10 = vpop.f32.mrf.mxu1  ;;  %v4010_v11 = vpop.f32.mrf.mxu0 }
 0x8f8   :  { %v2243_v12 = vadd.f32 %v2242_v7, %v2195_v9  ;;  %v4011_v13 = vadd.f32 %v4010_v11, %v4009_v8 }
 0x8f9   :  { %v4012_v14 = vpop.f32.mrf.mxu0  ;;  %v2245_v17 = vpop.f32.mrf.mxu1 }
 0x8fa   :  { %v2256_v15 = vmax.f32 %v2243_v12, 0.0  ;;  %v2198_v16 = vadd.f32 %v4011_v13, %v5481_v4 }
 0x8fb   :  { %v4013_v18 = vpop.f32.mrf.mxu0 }
 0x8fc   :  { %2259 = vst [vmem:[#allocation7] sm:$0xff] %v2256_v15  ;;  %v2246_v19 = vadd.f32 %v2245_v17, %v2198_v16  ;;  %v4014_v20 = vadd.f32 %v4013_v18, %v4012_v14 }
 0x8fd   :  { %v4015_v21 = vpop.f32.mrf.mxu0 }
 0x8fe   :  { %v2257_v22 = vmax.f32 %v2246_v19, 0.0  ;;  %v2203_v23 = vadd.f32 %v4014_v20, %v5481_v4 }
 0x8ff   :  { %v4016_v24 = vpop.f32.mrf.mxu0 }
 0x900   :  { %2260 = vst [vmem:[#allocation7 + $0x8] sm:$0xff] %v2257_v22  ;;  %v2251_v25 = vadd.f32 %v4315_v2, %v2203_v23 }
 0x902   :  { %v2258_v26 = vmax.f32 %v2251_v25, 0.0 }
 0x904   :  { %2261 = vst [vmem:[#allocation7 + $0x10] sm:$0xff] %v2258_v26 }
 0x905 LB: > { %s2270_s13 = sld [smem:[#allocation11 + %s5164_s30]]  ;;  %s2273_s16 = scalar_lea.vmem [#allocation7], %s5164_s30  ;;  %s5164_s30 = sphi %s5162_s30, %s2269_s30  }
 0x906   : > { %s2269_s30 = sadd.s32 1, %s5164_s30  }
 0x907   : > { %p2266_p6 = scmp.ge.s32.totalorder %s2269_s30, 24  }
 0x908   :  { %v4617_v30 = vld [vmem:[%s5934_s20 + $0x78] sm:$0xff] (%p2266_p6)   ;;  %v4619_v32 = vld [vmem:[%s5934_s20 + $0x70] sm:$0xff] (%p2266_p6)   ;;  %v4621_v34 = vld [vmem:[%s5934_s20 + $0x68] sm:$0xff] (%p2266_p6)   ;;  %s5166_s0 = smov (%p2266_p6), 0  }
 0x909   :  { %v4618_v31 = vld [vmem:[%s5934_s20 + $0x38] sm:$0xff] (%p2266_p6)   ;;  %4028 = vmatprep.subr.bf16.mxu0 (%p2266_p6), %v4617_v30  ;;  %v4620_v33 = vld [vmem:[%s5934_s20 + $0x30] sm:$0xff] (%p2266_p6)   ;;  %v4622_v35 = vld [vmem:[%s5934_s20 + $0x28] sm:$0xff] (%p2266_p6)  }
 0x90a   :  { %4029 = vmatpush3.bf16.msra.mxu0 (%p2266_p6), %v4618_v31  ;;  %v4623_v36 = vld [vmem:[%s5934_s20 + $0x60] sm:$0xff] (%p2266_p6)   ;;  %v4625_v38 = vld [vmem:[%s5934_s20 + $0x58] sm:$0xff] (%p2266_p6)   ;;  %v4627_v40 = vld [vmem:[%s5934_s20 + $0x50] sm:$0xff] (%p2266_p6)  }
 0x90b   : > { %v2274_v27 = vld [vmem:[%s2273_s16] sm:$0x1]  ;;  %s2271_s3 = scalar_lea.vmem [#allocation8], %s2270_s13  ;;  %2268 = sbr.rel (!%p2266_p6) target bundleno = 2309 (0x905), region = 326  ;;  %4030 = vmatprep.subr.bf16.mxu0 (%p2266_p6), %v4619_v32  ;;  %v4626_v39 = vld [vmem:[%s5934_s20 + $0x18] sm:$0xff] (%p2266_p6)   ;;  %v2277_v41 = vld [vmem:[#allocation5] sm:$0xff] (%p2266_p6) }
 0x90c   : > { %v2272_v28 = vld [vmem:[%s2271_s3] sm:$0x1]  ;;  %v2278_v42 = vld [vmem:[#allocation5 + $0x8] sm:$0xff] (%p2266_p6)  ;;  %v3846_v44 = vpack.c.bf16 (%p2266_p6), %v2277_v41, %v2277_v41  ;;  %v4629_v50 = vld [vmem:[%s5934_s20 + $0x48] sm:$0xff] (%p2266_p6)  }
 0x90d   : > { %v2275_v29 = vadd.f32 %v2274_v27, %v2272_v28  ;;  %v4624_v37 = vld [vmem:[%s5934_s20 + $0x20] sm:$0xff] (%p2266_p6)   ;;  %v3847_v45 = vpack.c.bf16 (%p2266_p6), %v2278_v42, %v2278_v42  ;;  %v4628_v49 = vld [vmem:[%s5934_s20 + $0x10] sm:$0xff] (%p2266_p6)   ;;  %v4630_v51 = vld [vmem:[%s5934_s20 + $0x8] sm:$0xff] (%p2266_p6)  }
 0x90e   :  { %4031 = vmatpush3.bf16.msra.mxu0 (%p2266_p6), %v4620_v33  ;;  %2287 = vst [vmem:[#allocation10] sm:$0xf] (%p2266_p6), %v3846_v44  ;;  %v4631_v52 = vld [vmem:[%s5934_s20 + $0x40] sm:$0xff] (%p2266_p6)   ;;  %v2482_v59 = vld [vmem:[#allocation6] sm:$0xff] (%p2266_p6) }
 0x90f   : > { %2276 = vst [vmem:[%s2271_s3] sm:$0x1] %v2275_v29  ;;  %4032 = vmatprep.subr.bf16.mxu0 (%p2266_p6), %v4621_v34  ;;  %2288 = vst [vmem:[#allocation10 + $0x8] sm:$0xf] (%p2266_p6), %v3847_v45  ;;  %v4632_v53 = vld [vmem:[%s5934_s20] sm:$0xff] (%p2266_p6)  }
 0x910   :  { %v2483_v2 = vld [vmem:[#allocation6 + $0x8] sm:$0xff] }
 0x912   :  { %4033 = vmatpush3.bf16.msra.mxu0 %v4622_v35 }
 0x913   :  { %4034 = vmatprep.subr.bf16.mxu0 %v4623_v36 }
 0x916   :  { %4035 = vmatpush3.bf16.msra.mxu0 %v4624_v37  ;;  %v2289_v43 = vld [vmem:[#allocation8] sm:$0xff]  ;;  %v2290_v46 = vld [vmem:[#allocation8 + $0x8] sm:$0xff]  ;;  %v4633_v55 = vld [vmem:[#allocation10] ss:$8 sps:$4 sm:$0xff]  }
 0x917   :  { %4036 = vmatprep.subr.bf16.mxu0 %v4625_v38  ;;  %v3848_v47 = vpack.c.bf16 %v2289_v43, %v2289_v43  ;;  %v3849_v48 = vpack.c.bf16 %v2290_v46, %v2290_v46 }
 0x919   :  { %2299 = vst [vmem:[#allocation10 + $0x4] sm:$0xf] %v3848_v47  ;;  %2300 = vst [vmem:[#allocation10 + $0xc] sm:$0xf] %v3849_v48 }
 0x91a   :  { %4037 = vmatpush3.bf16.msra.mxu0 %v4626_v39 }
 0x91b   :  { %4038 = vmatprep.subr.bf16.mxu0 %v4627_v40 }
 0x91e   :  { %4039 = vmatpush3.bf16.msra.mxu0 %v4628_v49 }
 0x91f   :  { %4040 = vmatprep.subr.bf16.mxu0 %v4629_v50 }
 0x920   :  { %v4635_v54 = vld [vmem:[#allocation10 + $0x4] ss:$8 sps:$4 sm:$0xff]  }
 0x921   :  { %2473 = vmatprep.mubr.bf16.mxu0 %v4635_v54 }
 0x922   :  { %4041 = vmatpush3.bf16.msra.mxu0 %v4630_v51 }
 0x923   :  { %4042 = vmatprep.subr.bf16.mxu0 %v4631_v52 }
 0x926   :  { %4043 = vmatpush3.bf16.msra.mxu0 %v4632_v53 }
 0x929   :  { %2474 = vmatmul.mubr.bf16.vlgmr.msra.gmra.mxu0 %v4633_v55 }
 0x9e9   :  { %v4044_v56 = vpop.f32.mrf.mxu0 }
 0x9eb   :  { %v4045_v57 = vpop.f32.mrf.mxu0 }
 0x9ec   :  { %v4046_v58 = vadd.f32 %v4045_v57, %v4044_v56 }
 0x9ed   :  { %v4047_v60 = vpop.f32.mrf.mxu0 }
 0x9ee   :  { %v2476_v61 = vadd.f32 %v4046_v58, %v5483_v5 }
 0x9ef   :  { %v4048_v62 = vpop.f32.mrf.mxu0 }
 0x9f0   :  { %v2484_v63 = vadd.f32 %v2482_v59, %v2476_v61  ;;  %v4049_v0 = vadd.f32 %v4048_v62, %v4047_v60 }
 0x9f2   :  { %v2486_v3 = vmax.f32 %v2484_v63, 0.0  ;;  %v2479_v6 = vadd.f32 %v4049_v0, %v5483_v5 }
 0x9f4   :  { %2488 = vst [vmem:[#allocation5] sm:$0xff] %v2486_v3  ;;  %v2485_v7 = vadd.f32 %v2483_v2, %v2479_v6 }
 0x9f6   :  { %v2487_v8 = vmax.f32 %v2485_v7, 0.0 }
 0x9f8   :  { %2489 = vst [vmem:[#allocation5 + $0x8] sm:$0xff] %v2487_v8 }
 0x9f9 LB: > { %s2496_s22 = sld [smem:[#allocation11 + %s5168_s0]]  ;;  %s2500_s24 = scalar_lea.vmem [#allocation3], %s5168_s0  ;;  %s5168_s0 = sphi %s5166_s0, %s2495_s0  }
 0x9fa   : > { %s2497_s15 = sld [smem:[#allocation14 + %s5168_s0]]  ;;  %s2504_s6 = scalar_lea.vmem [#allocation4], %s5168_s0 }
 0x9fb   : > { %s2495_s0 = sadd.s32 1, %s5168_s0  }
 0x9fc   : > { %p2492_p7 = scmp.ge.s32.totalorder %s2495_s0, 24  }
 0x9fd   :  { %v4636_v11 = vld [vmem:[%s5932_s18 + $0x78] sm:$0xff] (%p2492_p7)   ;;  %2890 = vst [vmem:[#allocation8] sm:$0xff] (%p2492_p7), %v5196_v1  ;;  %2891 = vst [vmem:[#allocation8 + $0x8] sm:$0xff] (%p2492_p7), %v5196_v1  ;;  %v4639_v14 = vld [vmem:[%s5932_s18 + $0x70] sm:$0xff] (%p2492_p7)  }
 0x9fe   :  { %2494 = sbr.rel (!%p2492_p7) target bundleno = 2553 (0x9f9), region = 337  ;;  %v4637_v12 = vld [vmem:[%s5932_s18 + $0x38] sm:$0xff] (%p2492_p7)   ;;  %4050 = vmatprep.subr.bf16.mxu1 (%p2492_p7), %v4636_v11  ;;  %v4640_v15 = vld [vmem:[%s5932_s18 + $0x30] sm:$0xff] (%p2492_p7)   ;;  %v4642_v17 = vld [vmem:[%s5932_s18 + $0x68] sm:$0xff] (%p2492_p7)  }
 0x9ff   : > { %s2498_s23 = scalar_lea.vmem [#allocation5], %s2496_s22  ;;  %v4638_v13 = vld [vmem:[%s5932_s18 + $0xb8] sm:$0xff] (%p2492_p7)   ;;  %4051 = vmatpush3.bf16.msra.mxu1 (%p2492_p7), %v4637_v12  ;;  %v4641_v16 = vld [vmem:[%s5932_s18 + $0xb0] sm:$0xff] (%p2492_p7)   ;;  %v4643_v18 = vld [vmem:[%s5932_s18 + $0x28] sm:$0xff] (%p2492_p7)  }
 0xa00   : > { %v2499_v9 = vld [vmem:[%s2498_s23] sm:$0x1]  ;;  %s2502_s26 = scalar_lea.vmem [#allocation5], %s2497_s15  ;;  %4317 = vmatprep.subr.bf16.mxu0 (%p2492_p7), %v4638_v13  ;;  %4052 = vmatprep.subr.bf16.mxu1 (%p2492_p7), %v4639_v14  ;;  %v4644_v19 = vld [vmem:[%s5932_s18 + $0xa8] sm:$0xff] (%p2492_p7)   ;;  %v4648_v23 = vld [vmem:[%s5932_s18 + $0x58] sm:$0xff] (%p2492_p7)  }
 0xa01   : > { %2501 = vst [vmem:[%s2500_s24] sm:$0x1] %v2499_v9  ;;  %v2503_v10 = vld [vmem:[%s2502_s26] sm:$0x1]  ;;  %4318 = vmatpush3.bf16.msra.mxu0 (%p2492_p7), %v4638_v13  ;;  %v4650_v24 = vld [vmem:[%s5932_s18 + $0x98] sm:$0xff] (%p2492_p7)   ;;  %v4651_v26 = vld [vmem:[%s5932_s18 + $0x50] sm:$0xff] (%p2492_p7)  }
 0xa02   : > { %2505 = vst [vmem:[%s2504_s6] sm:$0x1] %v2503_v10  ;;  %4319 = vmatprep.subr.bf16.mxu0 (%p2492_p7), %v4641_v16  ;;  %v4645_v20 = vld [vmem:[%s5932_s18 + $0x60] sm:$0xff] (%p2492_p7)   ;;  %v4649_v25 = vld [vmem:[%s5932_s18 + $0x18] sm:$0xff] (%p2492_p7)   ;;  %v4653_v27 = vld [vmem:[%s5932_s18 + $0x90] sm:$0xff] (%p2492_p7)  }
 0xa03   :  { %4053 = vmatpush3.bf16.msra.mxu1 %v4640_v15  ;;  %v4646_v21 = vld [vmem:[%s5932_s18 + $0x20] sm:$0xff]   ;;  %v4652_v28 = vld [vmem:[%s5932_s18 + $0x10] sm:$0xff]   ;;  %v4654_v29 = vld [vmem:[%s5932_s18 + $0x48] sm:$0xff]  }
 0xa04   :  { %4054 = vmatprep.subr.bf16.mxu1 %v4642_v17  ;;  %v4647_v22 = vld [vmem:[%s5932_s18 + $0xa0] sm:$0xff]   ;;  %v4655_v30 = vld [vmem:[%s5932_s18 + $0x8] sm:$0xff]   ;;  %v2507_v35 = vld [vmem:[#allocation7 + $0x8] sm:$0xff] }
 0xa05   :  { %4320 = vmatpush3.bf16.msra.mxu0 %v4641_v16  ;;  %v4656_v31 = vld [vmem:[%s5932_s18 + $0x88] sm:$0xff]   ;;  %v4657_v32 = vld [vmem:[%s5932_s18 + $0x40] sm:$0xff]   ;;  %v3851_v38 = vpack.c.bf16 %v2507_v35, %v2507_v35  ;;  %v2508_v47 = vld [vmem:[#allocation7 + $0x10] sm:$0xff] }
 0xa06   :  { %4321 = vmatprep.subr.bf16.mxu0 %v4644_v19  ;;  %v4659_v33 = vld [vmem:[%s5932_s18 + $0x80] sm:$0xff]   ;;  %v2506_v34 = vld [vmem:[#allocation7] sm:$0xff]  ;;  %v3852_v51 = vpack.c.bf16 %v2508_v47, %v2508_v47 }
 0xa07   :  { %4055 = vmatpush3.bf16.msra.mxu1 %v4643_v18  ;;  %v3850_v37 = vpack.c.bf16 %v2506_v34, %v2506_v34  ;;  %v4658_v49 = vld [vmem:[%s5932_s18] sm:$0xff]   ;;  %2523 = vst [vmem:[#allocation9 + $0xc] sm:$0xf] %v3851_v38  ;;  %s5170_s18 = smov 0  }
 0xa08   :  { %4056 = vmatprep.subr.bf16.mxu1 %v4645_v20  ;;  %v2525_v36 = vld [vmem:[#allocation3] sm:$0xff]  ;;  %v2526_v39 = vld [vmem:[#allocation3 + $0x8] sm:$0xff]  ;;  %v2527_v48 = vld [vmem:[#allocation3 + $0x10] sm:$0xff]  ;;  %2524 = vst [vmem:[#allocation9 + $0x18] sm:$0xf] %v3852_v51 }
 0xa09   :  { %4322 = vmatpush3.bf16.msra.mxu0 %v4644_v19  ;;  %v3853_v40 = vpack.c.bf16 %v2525_v36, %v2525_v36  ;;  %v2544_v41 = vld [vmem:[#allocation4] sm:$0xff]  ;;  %v2545_v42 = vld [vmem:[#allocation4 + $0x8] sm:$0xff]  ;;  %v3854_v43 = vpack.c.bf16 %v2526_v39, %v2526_v39  ;;  %v2546_v46 = vld [vmem:[#allocation4 + $0x10] sm:$0xff]  ;;  %2522 = vst [vmem:[#allocation9] sm:$0xf] %v3850_v37  ;;  %v3855_v52 = vpack.c.bf16 %v2527_v48, %v2527_v48 }
 0xa0a   :  { %4323 = vmatprep.subr.bf16.mxu0 %v4647_v22  ;;  %v3856_v44 = vpack.c.bf16 %v2544_v41, %v2544_v41  ;;  %v3857_v45 = vpack.c.bf16 %v2545_v42, %v2545_v42  ;;  %v3858_v50 = vpack.c.bf16 %v2546_v46, %v2546_v46 }
 0xa0b   :  { %4057 = vmatpush3.bf16.msra.mxu1 %v4646_v21  ;;  %2541 = vst [vmem:[#allocation9 + $0x4] sm:$0xf] %v3853_v40  ;;  %2542 = vst [vmem:[#allocation9 + $0x10] sm:$0xf] %v3854_v43 }
 0xa0c   :  { %4058 = vmatprep.subr.bf16.mxu1 %v4648_v23  ;;  %2560 = vst [vmem:[#allocation9 + $0x8] sm:$0xf] %v3856_v44  ;;  %2561 = vst [vmem:[#allocation9 + $0x14] sm:$0xf] %v3857_v45 }
 0xa0d   :  { %4324 = vmatpush3.bf16.msra.mxu0 %v4647_v22  ;;  %2562 = vst [vmem:[#allocation9 + $0x20] sm:$0xf] %v3858_v50  ;;  %2543 = vst [vmem:[#allocation9 + $0x1c] sm:$0xf] %v3855_v52 }
 0xa0e   :  { %4325 = vmatprep.subr.bf16.mxu0 %v4650_v24 }
 0xa0f   :  { %4059 = vmatpush3.bf16.msra.mxu1 %v4649_v25 }
 0xa10   :  { %4060 = vmatprep.subr.bf16.mxu1 %v4651_v26  ;;  %v4660_v53 = vld [vmem:[#allocation9] ss:$12 sps:$4 sm:$0xff]  }
 0xa11   :  { %4326 = vmatpush3.bf16.msra.mxu0 %v4650_v24 }
 0xa12   :  { %4327 = vmatprep.subr.bf16.mxu0 %v4653_v27  ;;  %v4662_v54 = vld [vmem:[#allocation9 + $0x4] ss:$12 sps:$4 sm:$0xff]  }
 0xa13   :  { %4061 = vmatpush3.bf16.msra.mxu1 %v4652_v28  ;;  %v4663_v55 = vld [vmem:[#allocation9 + $0x8] ss:$12 sps:$4 sm:$0xff]   ;;  %2820 = vmatprep.mubr.bf16.mxu1 %v4662_v54 }
 0xa14   :  { %4062 = vmatprep.subr.bf16.mxu1 %v4654_v29  ;;  %v4664_v56 = vld [vmem:[#allocation9 + $0x20] ss:$0 sps:$4 sm:$0xff]   ;;  %v2567_v57 = vld [vmem:[#allocation9 + $0x18] sm:$0xff]  ;;  %4333 = vmatprep.mubr.bf16.mxu0 %v4663_v55 }
 0xa15   :  { %4328 = vmatpush3.bf16.msra.mxu0 %v4653_v27  ;;  %v3747_v58 = vcombine.high %v2567_v57, %v2567_v57  ;;  %v3746_v59 = vcombine.low %v2567_v57, %v2567_v57 }
 0xa16   :  { %4329 = vmatprep.subr.bf16.mxu0 %v4656_v31 }
 0xa17   :  { %4063 = vmatpush3.bf16.msra.mxu1 %v4655_v30 }
 0xa18   :  { %4064 = vmatprep.subr.bf16.mxu1 %v4657_v32 }
 0xa19   :  { %4330 = vmatpush3.bf16.msra.mxu0 %v4656_v31 }
 0xa1a   :  { %4331 = vmatprep.subr.bf16.mxu0 %v4659_v33 }
 0xa1b   :  { %4065 = vmatpush3.bf16.msra.mxu1 %v4658_v49 }
 0xa1d   :  { %4332 = vmatpush3.bf16.msra.mxu0 %v4659_v33 }
 0xa1e   :  { %2821 = vmatmul.mubr.bf16.vlgmr.msra.gmra.mxu1 %v4660_v53 }
 0xa1f   :  { %2828 = vmatprep.mubr.bf16.mxu1 %v3747_v58 }
 0xa20   :  { %4334 = vmatmul.mubr.bf16.vlgmr.msra.gmra.mxu0 %v4664_v56 }
 0xa26   :  { %2829 = vmatmul.mubr.bf16.gmra.mxu1 %v3746_v59 }
 0xade   :  { %v4066_v60 = vpop.f32.mrf.mxu1 }
 0xae0   :  { %v4335_v61 = vpop.f32.mrf.mxu0  ;;  %v4067_v62 = vpop.f32.mrf.mxu1 }
 0xae1   :  { %v4068_v63 = vadd.f32 %v4067_v62, %v4066_v60 }
 0xae2   :  { %v2870_v0 = vpop.f32.mrf.mxu0  ;;  %v4069_v2 = vpop.f32.mrf.mxu1 }
 0xae3   :  { %v2823_v3 = vadd.f32 %v4068_v63, %v5481_v4 }
 0xae4   :  { %v4336_v6 = vpop.f32.mrf.mxu0  ;;  %v4070_v7 = vpop.f32.mrf.mxu1 }
 0xae5   :  { %v2871_v8 = vadd.f32 %v2870_v0, %v2823_v3  ;;  %v4071_v9 = vadd.f32 %v4070_v7, %v4069_v2 }
 0xae6   :  { %v4072_v10 = vpop.f32.mrf.mxu1  ;;  %v2873_v13 = vpop.f32.mrf.mxu0 }
 0xae7   :  { %v2884_v11 = vmax.f32 %v2871_v8, 0.0  ;;  %v2826_v12 = vadd.f32 %v4071_v9, %v5481_v4 }
 0xae8   :  { %v4073_v14 = vpop.f32.mrf.mxu1 }
 0xae9   :  { %2887 = vst [vmem:[#allocation7] sm:$0xff] %v2884_v11  ;;  %v2874_v15 = vadd.f32 %v2873_v13, %v2826_v12  ;;  %v4074_v16 = vadd.f32 %v4073_v14, %v4072_v10 }
 0xaea   :  { %v4075_v17 = vpop.f32.mrf.mxu1 }
 0xaeb   :  { %v2885_v18 = vmax.f32 %v2874_v15, 0.0  ;;  %v2831_v19 = vadd.f32 %v4074_v16, %v5481_v4 }
 0xaec   :  { %v4076_v20 = vpop.f32.mrf.mxu1 }
 0xaed   :  { %2888 = vst [vmem:[#allocation7 + $0x8] sm:$0xff] %v2885_v18  ;;  %v2879_v21 = vadd.f32 %v4335_v61, %v2831_v19 }
 0xaef   :  { %v2886_v22 = vmax.f32 %v2879_v21, 0.0 }
 0xaf1   :  { %2889 = vst [vmem:[#allocation7 + $0x10] sm:$0xff] %v2886_v22 }
 0xaf2 LB: > { %s2898_s23 = sld [smem:[#allocation11 + %s5172_s18]]  ;;  %s2901_s24 = scalar_lea.vmem [#allocation7], %s5172_s18  ;;  %s5172_s18 = sphi %s5170_s18, %s2897_s18  }
 0xaf3   : > { %s2897_s18 = sadd.s32 1, %s5172_s18  }
 0xaf4   : > { %p2894_p8 = scmp.ge.s32.totalorder %s2897_s18, 24  }
 0xaf5   :  { %v4667_v4 = vld [vmem:[%s5934_s20 + $0x78] sm:$0xff] (%p2894_p8)   ;;  %4337 = vmatprep.subr.bf16.mxu0 (%p2894_p8), %v5196_v1  ;;  %4353 = vmatprep.mubr.msk.bf16.mxu0 (%p2894_p8), %vm5197_vm0, %v5196_v1  ;;  %v4669_v27 = vld [vmem:[%s5934_s20 + $0x70] sm:$0xff] (%p2894_p8)   ;;  %v4671_v29 = vld [vmem:[%s5934_s20 + $0x68] sm:$0xff] (%p2894_p8)   ;;  %s5972_s30 = sld [smem:[#allocation59_spill]] (%p2894_p8) }
 0xaf6   :  { %v4668_v26 = vld [vmem:[%s5934_s20 + $0x38] sm:$0xff] (%p2894_p8)   ;;  %4088 = vmatprep.subr.bf16.mxu1 (%p2894_p8), %v4667_v4  ;;  %v4670_v28 = vld [vmem:[%s5934_s20 + $0x30] sm:$0xff] (%p2894_p8)   ;;  %v4672_v30 = vld [vmem:[%s5934_s20 + $0x28] sm:$0xff] (%p2894_p8)  }
 0xaf7   :  { %4089 = vmatpush3.bf16.msra.mxu1 (%p2894_p8), %v4668_v26  ;;  %v4673_v31 = vld [vmem:[%s5934_s20 + $0x60] sm:$0xff] (%p2894_p8)   ;;  %v4675_v33 = vld [vmem:[%s5934_s20 + $0x58] sm:$0xff] (%p2894_p8)   ;;  %v4677_v35 = vld [vmem:[%s5934_s20 + $0x50] sm:$0xff] (%p2894_p8)  }
 0xaf8   : > { %v2902_v23 = vld [vmem:[%s2901_s24] sm:$0x1]  ;;  %s2899_s26 = scalar_lea.vmem [#allocation8], %s2898_s23  ;;  %2896 = sbr.rel (!%p2894_p8) target bundleno = 2802 (0xaf2), region = 348  ;;  %4090 = vmatprep.subr.bf16.mxu1 (%p2894_p8), %v4669_v27  ;;  %v4676_v34 = vld [vmem:[%s5934_s20 + $0x18] sm:$0xff] (%p2894_p8)   ;;  %v2905_v36 = vld [vmem:[#allocation5] sm:$0xff] (%p2894_p8) }
 0xaf9   : > { %v2900_v24 = vld [vmem:[%s2899_s26] sm:$0x1]  ;;  %v2906_v37 = vld [vmem:[#allocation5 + $0x8] sm:$0xff] (%p2894_p8)  ;;  %v3859_v40 = vpack.c.bf16 (%p2894_p8), %v2905_v36, %v2905_v36  ;;  %v4679_v44 = vld [vmem:[%s5934_s20 + $0x48] sm:$0xff] (%p2894_p8)  }
 0xafa   : > { %v2903_v25 = vadd.f32 %v2902_v23, %v2900_v24  ;;  %v4674_v32 = vld [vmem:[%s5934_s20 + $0x20] sm:$0xff] (%p2894_p8)   ;;  %v4678_v39 = vld [vmem:[%s5934_s20 + $0x10] sm:$0xff] (%p2894_p8)   ;;  %v3860_v41 = vpack.c.bf16 (%p2894_p8), %v2906_v37, %v2906_v37  ;;  %v4680_v48 = vld [vmem:[%s5934_s20 + $0x8] sm:$0xff] (%p2894_p8)  }
 0xafb   :  { %4091 = vmatpush3.bf16.msra.mxu1 (%p2894_p8), %v4670_v28  ;;  %v4686_v46 = vld [vmem:[#allocation37 + $0x38] sm:$0xff] (%p2894_p8)   ;;  %2915 = vst [vmem:[#allocation10] sm:$0xf] (%p2894_p8), %v3859_v40  ;;  %v4687_v47 = vld [vmem:[#allocation37 + $0x30] sm:$0xff] (%p2894_p8)   ;;  %v4688_v53 = vld [vmem:[#allocation37 + $0x28] sm:$0xff] (%p2894_p8)  }
 0xafc   : > { %2904 = vst [vmem:[%s2899_s26] sm:$0x1] %v2903_v25  ;;  %4092 = vmatprep.subr.bf16.mxu1 (%p2894_p8), %v4671_v29  ;;  %2916 = vst [vmem:[#allocation10 + $0x8] sm:$0xf] (%p2894_p8), %v3860_v41  ;;  %4338 = vmatpush3.bf16.msra.mxu0 (%p2894_p8), %v4686_v46  ;;  %v4681_v49 = vld [vmem:[%s5934_s20 + $0x40] sm:$0xff] (%p2894_p8)   ;;  %v4689_v54 = vld [vmem:[#allocation37 + $0x20] sm:$0xff] (%p2894_p8)  }
 0xafd   :  { %4339 = vmatprep.subr.bf16.mxu0 %v5196_v1  ;;  %v4682_v50 = vld [vmem:[%s5934_s20] sm:$0xff]   ;;  %v4690_v55 = vld [vmem:[#allocation37 + $0x18] sm:$0xff]   ;;  %v4693_v58 = vld [vmem:[#allocation37] sm:$0xff]  }
 0xafe   :  { %v4691_v56 = vld [vmem:[#allocation37 + $0x10] sm:$0xff]   ;;  %v4692_v57 = vld [vmem:[#allocation37 + $0x8] sm:$0xff]   ;;  %v4694_v59 = vld [vmem:[#allocation40 + $0x38] sm:$0xff]  }
 0xaff   :  { %4093 = vmatpush3.bf16.msra.mxu1 %v4672_v30  ;;  %v4695_v60 = vld [vmem:[#allocation40 + $0x30] sm:$0xff]   ;;  %v4696_v61 = vld [vmem:[#allocation40 + $0x28] sm:$0xff]   ;;  %v4697_v62 = vld [vmem:[#allocation40 + $0x20] sm:$0xff]  }
 0xb00   :  { %4094 = vmatprep.subr.bf16.mxu1 %v4673_v31  ;;  %4340 = vmatpush3.bf16.msra.mxu0 %v4687_v47  ;;  %v4698_v63 = vld [vmem:[#allocation40 + $0x18] sm:$0xff]   ;;  %v3110_v6 = vld [vmem:[#allocation6] sm:$0xff]  ;;  %v3111_v12 = vld [vmem:[#allocation6 + $0x8] sm:$0xff] }
 0xb01   :  { %4341 = vmatprep.subr.bf16.mxu0 %v5196_v1  ;;  %v4699_v18 = vld [vmem:[#allocation40 + $0x10] sm:$0xff]   ;;  %v4700_v19 = vld [vmem:[#allocation40 + $0x8] sm:$0xff]   ;;  %v4701_v20 = vld [vmem:[#allocation40] sm:$0xff]  }
 0xb02   :  { %v4703_v21 = vld [vmem:[#allocation41 + $0x30] sm:$0xff]   ;;  %v4704_v22 = vld [vmem:[#allocation41 + $0x28] sm:$0xff]   ;;  %v4705_v23 = vld [vmem:[#allocation41 + $0x20] sm:$0xff]  }
 0xb03   :  { %4095 = vmatpush3.bf16.msra.mxu1 %v4674_v32  ;;  %v2917_v38 = vld [vmem:[#allocation8] sm:$0xff]  ;;  %v2918_v42 = vld [vmem:[#allocation8 + $0x8] sm:$0xff]  ;;  %v4683_v52 = vld [vmem:[#allocation10] ss:$8 sps:$4 sm:$0xff]  }
 0xb04   :  { %4096 = vmatprep.subr.bf16.mxu1 %v4675_v33  ;;  %v3861_v43 = vpack.c.bf16 %v2917_v38, %v2917_v38  ;;  %v3862_v45 = vpack.c.bf16 %v2918_v42, %v2918_v42  ;;  %4342 = vmatpush3.bf16.msra.mxu0 %v4688_v53  ;;  %v4706_v24 = vld [vmem:[#allocation41 + $0x18] sm:$0xff]   ;;  %v4709_v36 = vld [vmem:[#allocation41] sm:$0xff]   ;;  %v3804_v37 = vld [vmem:[%s5939_s25] ss:$0 sm:$0xff] }
 0xb05   :  { %4343 = vmatprep.subr.bf16.mxu0 %v5196_v1  ;;  %v3795_v25 = vld [vmem:[#allocation38] ss:$0 sm:$0xff] }
 0xb06   :  { %2927 = vst [vmem:[#allocation10 + $0x4] sm:$0xf] %v3861_v43  ;;  %2928 = vst [vmem:[#allocation10 + $0xc] sm:$0xf] %v3862_v45 }
 0xb07   :  { %4097 = vmatpush3.bf16.msra.mxu1 %v4676_v34  ;;  %v4707_v34 = vld [vmem:[#allocation41 + $0x10] sm:$0xff]  }
 0xb08   :  { %4098 = vmatprep.subr.bf16.mxu1 %v4677_v35  ;;  %4344 = vmatpush3.bf16.msra.mxu0 %v4689_v54  ;;  %v4708_v35 = vld [vmem:[#allocation41 + $0x8] sm:$0xff]  }
 0xb09   :  { %4345 = vmatprep.subr.bf16.mxu0 %v5196_v1 }
 0xb0b   :  { %4099 = vmatpush3.bf16.msra.mxu1 %v4678_v39 }
 0xb0c   :  { %4100 = vmatprep.subr.bf16.mxu1 %v4679_v44  ;;  %4346 = vmatpush3.bf16.msra.mxu0 %v4690_v55  ;;  %v3464_v55 = vld [vmem:[%s5972_s30 + $0x8] sm:$0xff] }
 0xb0d   :  { %v4685_v51 = vld [vmem:[#allocation10 + $0x4] ss:$8 sps:$4 sm:$0xff]   ;;  %4347 = vmatprep.subr.bf16.mxu0 %v5196_v1 }
 0xb0e   :  { %3101 = vmatprep.mubr.bf16.mxu1 %v4685_v51 }
 0xb0f   :  { %4101 = vmatpush3.bf16.msra.mxu1 %v4680_v48 }
 0xb10   :  { %4102 = vmatprep.subr.bf16.mxu1 %v4681_v49  ;;  %4348 = vmatpush3.bf16.msra.mxu0 %v4691_v56  ;;  %v3463_v49 = vld [vmem:[%s5972_s30] sm:$0xff] }
 0xb11   :  { %4349 = vmatprep.subr.bf16.mxu0 %v5196_v1 }
 0xb13   :  { %4103 = vmatpush3.bf16.msra.mxu1 %v4682_v50 }
 0xb14   :  { %4357 = vmatprep.subr.bf16.mxu1 %v5196_v1  ;;  %4350 = vmatpush3.bf16.msra.mxu0 %v4692_v57 }
 0xb15   :  { %4351 = vmatprep.subr.bf16.mxu0 %v5196_v1 }
 0xb16   :  { %3102 = vmatmul.mubr.bf16.vlgmr.msra.gmra.mxu1 %v4683_v52 }
 0xb17   :  { %4373 = vmatprep.mubr.msk.bf16.mxu1 %vm5197_vm0, %v5196_v1  ;;  %4358 = vmatpush3.bf16.msra.mxu1 %v4694_v59 }
 0xb18   :  { %4352 = vmatpush3.bf16.msra.mxu0 %v4693_v58  ;;  %4359 = vmatprep.subr.bf16.mxu1 %v5196_v1 }
 0xb19   :  { %4377 = vmatprep.subr.bf16.mxu0 %v5196_v1 }
 0xb1b   :  { %4360 = vmatpush3.bf16.msra.mxu1 %v4695_v60 }
 0xb1c   :  { %4361 = vmatprep.subr.bf16.mxu1 %v5196_v1 }
 0xb1f   :  { %4362 = vmatpush3.bf16.msra.mxu1 %v4696_v61 }
 0xb20   :  { %4363 = vmatprep.subr.bf16.mxu1 %v5196_v1 }
 0xb23   :  { %4364 = vmatpush3.bf16.msra.mxu1 %v4697_v62 }
 0xb24   :  { %4365 = vmatprep.subr.bf16.mxu1 %v5196_v1 }
 0xb27   :  { %4366 = vmatpush3.bf16.msra.mxu1 %v4698_v63 }
 0xb28   :  { %4367 = vmatprep.subr.bf16.mxu1 %v5196_v1 }
 0xb2b   :  { %4368 = vmatpush3.bf16.msra.mxu1 %v4699_v18 }
 0xb2c   :  { %4369 = vmatprep.subr.bf16.mxu1 %v5196_v1 }
 0xb2f   :  { %4370 = vmatpush3.bf16.msra.mxu1 %v4700_v19 }
 0xb30   :  { %4371 = vmatprep.subr.bf16.mxu1 %v5196_v1 }
 0xb33   :  { %4372 = vmatpush3.bf16.msra.mxu1 %v4701_v20 }
 0xbd6   :  { %v4104_v0 = vpop.f32.mrf.mxu1 }
 0xbd8   :  { %v4105_v2 = vpop.f32.mrf.mxu1 }
 0xbd9   :  { %v4106_v3 = vadd.f32 %v4105_v2, %v4104_v0 }
 0xbda   :  { %v4107_v7 = vpop.f32.mrf.mxu1 }
 0xbdb   :  { %v3104_v8 = vadd.f32 %v4106_v3, %v5483_v5 }
 0xbdc   :  { %v4108_v9 = vpop.f32.mrf.mxu1 }
 0xbdd   :  { %v3112_v10 = vadd.f32 %v3110_v6, %v3104_v8  ;;  %v4109_v11 = vadd.f32 %v4108_v9, %v4107_v7 }
 0xbdf   :  { %v3114_v13 = vmax.f32 %v3112_v10, 0.0  ;;  %v3107_v14 = vadd.f32 %v4109_v11, %v5483_v5  ;;  %v4702_v5 = vld [vmem:[#allocation41 + $0x38] sm:$0xff]  }
 0xbe1   :  { %3116 = vst [vmem:[#allocation5] sm:$0xff] %v3114_v13  ;;  %v3113_v15 = vadd.f32 %v3111_v12, %v3107_v14 }
 0xbe3   :  { %v3115_v16 = vmax.f32 %v3113_v15, 0.0 }
 0xbe5   :  { %3117 = vst [vmem:[#allocation5 + $0x8] sm:$0xff] %v3115_v16  ;;  %v3120_v17 = vpack.c.bf16 %v3115_v16, %v3114_v13 }
 0xbe7   :  { %4354 = vmatmul.mubr.bf16.vlgmr.msra.gmra.mxu0 %v3120_v17 }
 0xbe8   :  { %4393 = vmatprep.mubr.msk.bf16.mxu0 %vm5197_vm0, %v5196_v1  ;;  %4378 = vmatpush3.bf16.msra.mxu0 %v4702_v5 }
 0xbe9   :  { %4379 = vmatprep.subr.bf16.mxu0 %v5196_v1 }
 0xbec   :  { %4380 = vmatpush3.bf16.msra.mxu0 %v4703_v21 }
 0xbed   :  { %4381 = vmatprep.subr.bf16.mxu0 %v5196_v1 }
 0xbf0   :  { %4382 = vmatpush3.bf16.msra.mxu0 %v4704_v22 }
 0xbf1   :  { %4383 = vmatprep.subr.bf16.mxu0 %v5196_v1 }
 0xbf4   :  { %4384 = vmatpush3.bf16.msra.mxu0 %v4705_v23 }
 0xbf5   :  { %4385 = vmatprep.subr.bf16.mxu0 %v5196_v1 }
 0xbf8   :  { %4386 = vmatpush3.bf16.msra.mxu0 %v4706_v24 }
 0xbf9   :  { %4387 = vmatprep.subr.bf16.mxu0 %v5196_v1 }
 0xbfc   :  { %4388 = vmatpush3.bf16.msra.mxu0 %v4707_v34 }
 0xbfd   :  { %4389 = vmatprep.subr.bf16.mxu0 %v5196_v1 }
 0xc00   :  { %4390 = vmatpush3.bf16.msra.mxu0 %v4708_v35 }
 0xc01   :  { %4391 = vmatprep.subr.bf16.mxu0 %v5196_v1  ;;  %v3813_v1 = vld [vmem:[%s5941_s27] ss:$0 sm:$0xff] }
 0xc04   :  { %4392 = vmatpush3.bf16.msra.mxu0 %v4709_v36 }
 0xca7   :  { %v3226_v4 = vpop.f32.mrf.mxu0 }
 0xca8   :  { %v3227_v27 = vadd.f32 %v3795_v25, %v3226_v4 }
 0xca9   :  { %v4355_v26 = vpop.f32.mrf.mxu0 }
 0xcaa   :  { %v3233_v31 = vmax.f32 %v3227_v27, 0.0 }
 0xcab   :  { %v3229_v28 = vpop.f32.mrf.mxu0 }
 0xcac   :  { %v3230_v29 = vadd.f32 %v3795_v25, %v3229_v28 }
 0xcad   :  { %v4356_v30 = vpop.f32.mrf.mxu0 }
 0xcae   :  { %v3234_v32 = vmax.f32 %v3230_v29, 0.0 }
 0xcb0   :  { %v3235_v33 = vpack.c.bf16 %v3234_v32, %v3233_v31 }
 0xcb2   :  { %4374 = vmatmul.mubr.bf16.vlgmr.msra.gmra.mxu1 %v3235_v33 }
 0xd72   :  { %v3341_v38 = vpop.f32.mrf.mxu1 }
 0xd73   :  { %v3342_v40 = vadd.f32 %v3804_v37, %v3341_v38 }
 0xd74   :  { %v4375_v39 = vpop.f32.mrf.mxu1 }
 0xd75   :  { %v3348_v44 = vmax.f32 %v3342_v40, 0.0 }
 0xd76   :  { %v3344_v41 = vpop.f32.mrf.mxu1 }
 0xd77   :  { %v3345_v42 = vadd.f32 %v3804_v37, %v3344_v41 }
 0xd78   :  { %v4376_v43 = vpop.f32.mrf.mxu1 }
 0xd79   :  { %v3349_v45 = vmax.f32 %v3345_v42, 0.0 }
 0xd7b   :  { %v3350_v46 = vpack.c.bf16 %v3349_v45, %v3348_v44 }
 0xd7d   :  { %4394 = vmatmul.mubr.bf16.vlgmr.msra.gmra.mxu0 %v3350_v46 }
 0xe3d   :  { %v3456_v47 = vpop.f32.mrf.mxu0 }
 0xe3e   :  { %v3457_v48 = vadd.f32 %v3813_v1, %v3456_v47 }
 0xe3f   :  { %v4395_v50 = vpop.f32.mrf.mxu0 }
 0xe40   :  { %v3822_v51 = vclamps-f32 %v3457_v48, 100.0 }
 0xe41   :  { %v3459_v52 = vpop.f32.mrf.mxu0 }
 0xe42   :  { %v3469_v53 = vadd.f32 %v3822_v51, %v3463_v49  ;;  %v3460_v54 = vadd.f32 %v3813_v1, %v3459_v52 }
 0xe43   :  { %v4396_v56 = vpop.f32.mrf.mxu0 }
 0xe44   :  { %3471 = vst [vmem:[%s5942_s28] sm:$0xff] %v3469_v53  ;;  %v3823_v57 = vclamps-f32 %v3460_v54, 100.0 }
 0xe46   :  { %v3470_v58 = vadd.f32 %v3823_v57, %v3464_v55 }
 0xe48   :  { %3472 = vst [vmem:[%s5942_s28 + $0x8] sm:$0xff] %v3470_v58 }
 0xe49   :  { %3477 = vsyncpa [#allocation12], 1 }
 0xe4a   :  { %3478 = vsyncpa [#allocation18], 1 }
 0xe4b   :  { %3479 = vsyncpa [#allocation21], 1 }
 0xe4c   :  { %3480 = vsyncpa [#allocation24], 1 }
 0xe4d   :  { %3481 = vsyncpa [#allocation27], 1 }
 0xe4e   :  { %3482 = vsyncpa [#allocation30], 1 }
 0xe4f   :  { %3483 = vsyncpa [#allocation33], 1 }
 0xe50   :  { %3484 = vsyncpa [#allocation36], 1 }
 0xe51   :  { %3485 = vsyncpa [#allocation39], 1 }
 0xe52   :  { %3486 = vsyncpa [#allocation42], 1 }
 0xe53   :  { %3487 = vsyncpa [#allocation13], 1 }
 0xe54   :  { %3488 = vsyncpa [#allocation15], 1 }

</bundles_post_ra>
